<compile_context>
chip_gen: v5e
topology: v5e:2x2
jax: 0.10.0
libtpu: 0.0.40
codegen_flags: <defaults>
</compile_context>

<pallas_src>
import numpy as np
import jax
import jax.numpy as jnp
from jax.experimental import pallas as pl
from jax.experimental.pallas import tpu as pltpu

# ----------------------------- static problem geometry -----------------------------
N = 2                       # batch
CIN = 4                     # input channels
C1, C2, C3 = 16, 32, 64     # conv1/2/3 output channels (deep_net assumption)
CF1, CF2 = 128, 256         # fc1/fc2 output channels   (fc2 = 256 forced by view(-1, 256))
H = W = 16                  # input spatial size
K, PAD = 3, 1               # conv kernel / padding     (deep_net assumption)
NEG = 0.01                  # F.leaky_relu default negative slope

HA, WA = H // 2, W // 2         # 8   after pool1
HB, WB = HA // 2, WA // 2       # 4   after pool2
HC, WC = HB // 2, WB // 2       # 2   after pool3  (== self.size in the PyTorch module)

# zero-padded, batch-flattened layouts used in-kernel: flat index = n*HP*WP + h*WP + w
HP0, WP0 = H + 2 * PAD, W + 2 * PAD        # 18, 18   conv1 input
HP1, WP1 = HA + 2 * PAD, WA + 2 * PAD      # 10, 10   conv2 input
HP2, WP2 = HB + 2 * PAD, WB + 2 * PAD      # 6, 6     conv3 input
WIMG0 = HP0 * WP0                          # 324      per-image padded length (conv1 input)
MP0, MP1, MP2 = N * HP0 * WP0, N * HP1 * WP1, N * HP2 * WP2     # 648, 200, 72

# conv-output width in the "compute everywhere (incl. garbage columns)" flattened layout
L0 = MP0 - (K - 1) * WP0 - (K - 1)         # 610
L1 = MP1 - (K - 1) * WP1 - (K - 1)         # 178
L2 = MP2 - (K - 1) * WP2 - (K - 1)         # 58
# width after the two pooling max-shifts
LZ0, LZ1, LZ2 = L0 - WP0 - 1, L1 - WP1 - 1, L2 - WP2 - 1        # 591, 167, 51

MOUT = N * HC * WC                          # 8 output rows, 256 output columns (lane-dense)


# ----------------------------- in-kernel 0/1 matrix builders -----------------------------
def _one_hot_from_col_targets(g_row, num_rows):
    """M[r, q] = 1.0 iff r == g_row[0, q]; entries of -1 give all-zero columns."""
    num_cols = g_row.shape[-1]
    r = jax.lax.broadcasted_iota(jnp.int32, (num_rows, num_cols), 0)
    return (r == g_row).astype(jnp.float32)


def _one_hot_from_row_targets(g_col, num_cols):
    """M[r, q] = 1.0 iff q == g_col[r, 0]; entries of -1 give all-zero rows."""
    num_rows = g_col.shape[0]
    c = jax.lax.broadcasted_iota(jnp.int32, (num_rows, num_cols), 1)
    return (c == g_col).astype(jnp.float32)


# ----------------------------- the fused Pallas kernel -----------------------------
def _posenet_kernel(xr_ref, ge_ref, w1_ref, b1_ref, g1_ref,
                    w2_ref, b2_ref, g2_ref,
                    w3_ref, b3_ref, g3_ref,
                    wf1_ref, bf1_ref, wf2_ref, bf2_ref,
                    out_ref, x0_s, a1_s, a2_s, a3_s):
    f32 = jnp.float32

    def lrelu(v):
        return jnp.where(v >= 0.0, v, NEG * v)

    # ---- input embedding: (N*CIN, H*W) rows -> zero-padded batch-flattened (CIN, MP0) ----
    # pad + NCHW->(C, n*Hp*Wp) flatten fused into the kernel via one 0/1 embedding GEMM
    # (no separate XLA pre-processing fusion, no extra HBM round trip of x0).
    emb = _one_hot_from_col_targets(ge_ref[...], H * W)                  # (H*W, WIMG0)
    x0f = jnp.dot(xr_ref[...], emb, preferred_element_type=f32)         # (N*CIN, WIMG0)
    x0_s[:, 0:WIMG0] = x0f[0:CIN, :]
    x0_s[:, WIMG0:MP0] = x0f[CIN:2 * CIN, :]
    x0 = x0_s[...]                                                       # (CIN, MP0)

    # ---- stage 1: conv1(3x3, pad1) + leaky_relu + maxpool(2)  (channels on sublanes) ----
    # ONE GEMM over a (9*CIN, L0) im2col slab (9 shifted slices written once to scratch).
    for kh in range(K):
        for kw in range(K):
            t = kh * K + kw
            a1_s[t * CIN:(t + 1) * CIN, :] = x0[:, kh * WP0 + kw: kh * WP0 + kw + L0]
    y = lrelu(jnp.dot(w1_ref[...], a1_s[...], preferred_element_type=f32) + b1_ref[...])
    y = jnp.maximum(y[:, :L0 - WP0], y[:, WP0:])                         # max over (h, h+1)
    y = jnp.maximum(y[:, :LZ0], y[:, 1:LZ0 + 1])                         # max over (w, w+1)
    # pool-select + re-zero-pad in one GEMM; the 0/1 matrix is generated in VMEM (no DMA)
    s1 = _one_hot_from_col_targets(g1_ref[...], LZ0)                     # (LZ0, MP1)
    x1 = jnp.dot(y, s1, preferred_element_type=f32)                      # (C1, MP1)
    # TODO(synk): nn.Dropout2d(0.3) is identity in eval mode; training-mode dropout omitted.

    # ---- stage 2: conv2 + leaky_relu + maxpool(2) ----
    for kh in range(K):
        for kw in range(K):
            t = kh * K + kw
            a2_s[t * C1:(t + 1) * C1, :] = x1[:, kh * WP1 + kw: kh * WP1 + kw + L1]
    y = lrelu(jnp.dot(w2_ref[...], a2_s[...], preferred_element_type=f32) + b2_ref[...])
    y = jnp.maximum(y[:, :L1 - WP1], y[:, WP1:])
    y = jnp.maximum(y[:, :LZ1], y[:, 1:LZ1 + 1])
    # pool-select + orientation flip to (spatial, channels): x2[m, c] = sum_l s2t[m, l] * y[c, l]
    s2t = _one_hot_from_row_targets(g2_ref[...], LZ1)                    # (MP2, LZ1)
    x2 = jax.lax.dot_general(s2t, y, (((1,), (1,)), ((), ())),
                             preferred_element_type=f32)                 # (MP2, C2)

    # ---- stage 3: conv3 + leaky_relu + maxpool(2)  (spatial on sublanes, lane-dense channels) ----
    for kh in range(K):
        for kw in range(K):
            t = kh * K + kw
            a3_s[:, t * C2:(t + 1) * C2] = x2[kh * WP2 + kw: kh * WP2 + kw + L2, :]
    y = lrelu(jnp.dot(a3_s[...], w3_ref[...], preferred_element_type=f32) + b3_ref[...])
    y = jnp.maximum(y[:L2 - WP2, :], y[WP2:, :])
    y = jnp.maximum(y[:LZ2, :], y[1:LZ2 + 1, :])
    s3t = _one_hot_from_row_targets(g3_ref[...], LZ2)                    # (MOUT, LZ2)
    p3 = jnp.dot(s3t, y, preferred_element_type=f32)                     # (MOUT, C3)

    # ---- fc1 / fc2 (1x1 convs == per-pixel linear), output already (N*HC*WC, 256) lane-dense ----
    # TODO(synk): bf16 MXU inputs (v6e/v7x) skipped to keep exact f32 parity with the reference.
    a = lrelu(jnp.dot(p3, wf1_ref[...], preferred_element_type=f32) + bf1_ref[...])  # (MOUT, CF1)
    a = lrelu(jnp.dot(a, wf2_ref[...], preferred_element_type=f32) + bf2_ref[...])   # (MOUT, CF2)
    out_ref[...] = a


# ----------------------------- host-side one-time parameter packing -----------------------------
def _index_vectors():
    """Tiny int32 target-index vectors from which the kernel rebuilds its 0/1 matrices via iota."""
    # ge[q]: per-image source pixel h*W + w for padded-frame position q = hp*WP0 + wp; -1 = zero pad
    ge = np.full((1, WIMG0), -1, np.int32)
    for hp in range(HP0):
        for wp in range(WP0):
            if 1 <= hp <= H and 1 <= wp <= W:
                ge[0, hp * WP0 + wp] = (hp - 1) * W + (wp - 1)

    # g1[q]: source column (stage-1 post-max slab) for padded conv2-input position q; -1 = zero pad
    g1 = np.full((1, MP1), -1, np.int32)
    for n in range(N):
        for hp in range(HP1):
            for wp in range(WP1):
                if 1 <= hp <= HA and 1 <= wp <= WA:
                    g1[0, n * HP1 * WP1 + hp * WP1 + wp] = (
                        n * HP0 * WP0 + 2 * (hp - 1) * WP0 + 2 * (wp - 1))

    # g2[m]: source column (stage-2 post-max slab) for padded conv3-input row m; -1 = zero pad
    g2 = np.full((MP2, 1), -1, np.int32)
    for n in range(N):
        for hp in range(HP2):
            for wp in range(WP2):
                if 1 <= hp <= HB and 1 <= wp <= WB:
                    g2[n * HP2 * WP2 + hp * WP2 + wp, 0] = (
                        n * HP1 * WP1 + 2 * (hp - 1) * WP1 + 2 * (wp - 1))

    # g3[m]: source row (stage-3 post-max slab) for output row m = n*HC*WC + i*WC + j (all valid)
    g3 = np.zeros((MOUT, 1), np.int32)
    for n in range(N):
        for i in range(HC):
            for j in range(WC):
                g3[n * HC * WC + i * WC + j, 0] = n * HP2 * WP2 + 2 * i * WP2 + 2 * j
    return ge, g1, g2, g3


def prepare_params(w1, b1, w2, b2, w3, b3, wf1, bf1, wf2, bf2):
    """Repack PyTorch-layout weights into kernel layouts (hoisted out of the jitted forward)."""
    w1 = np.asarray(w1, np.float32)
    w2 = np.asarray(w2, np.float32)
    w3 = np.asarray(w3, np.float32)
    # fold the 9 taps of each 3x3 conv into the contraction dim of ONE GEMM (slab row = tap*Cin+ci)
    w1p = np.concatenate([w1[:, :, kh, kw] for kh in range(K) for kw in range(K)], axis=1)    # (C1, 9*CIN)
    w2p = np.concatenate([w2[:, :, kh, kw] for kh in range(K) for kw in range(K)], axis=1)    # (C2, 9*C1)
    w3p = np.concatenate([w3[:, :, kh, kw].T for kh in range(K) for kw in range(K)], axis=0)  # (9*C2, C3)
    ge, g1, g2, g3 = _index_vectors()
    return dict(
        ge=jnp.asarray(ge), g1=jnp.asarray(g1), g2=jnp.asarray(g2), g3=jnp.asarray(g3),
        w1p=jnp.asarray(w1p), b1=jnp.asarray(b1, jnp.float32).reshape(C1, 1),
        w2p=jnp.asarray(w2p), b2=jnp.asarray(b2, jnp.float32).reshape(C2, 1),
        w3p=jnp.asarray(w3p), b3=jnp.asarray(b3, jnp.float32).reshape(1, C3),
        wf1=jnp.asarray(wf1, jnp.float32).T, bf1=jnp.asarray(bf1, jnp.float32).reshape(1, CF1),
        wf2=jnp.asarray(wf2, jnp.float32).T, bf2=jnp.asarray(bf2, jnp.float32).reshape(1, CF2),
    )


# ----------------------------- forward (single fused pallas_call) -----------------------------
@jax.jit
def posenet_forward(x, params):
    """x: (N, CIN, H, W) float32 NCHW -> (N*HC*WC, 256), matching the PyTorch view(-1, 256)."""
    xr = x.reshape(N * CIN, H * W)   # contiguous reshape: free bitcast, no extra XLA fusion

    args = (xr, params["ge"], params["w1p"], params["b1"], params["g1"],
            params["w2p"], params["b2"], params["g2"],
            params["w3p"], params["b3"], params["g3"],
            params["wf1"], params["bf1"], params["wf2"], params["bf2"])

    def full_spec(a):
        nd = a.ndim
        return pl.BlockSpec(a.shape, lambda i, _nd=nd: (0,) * _nd)

    return pl.pallas_call(
        _posenet_kernel,
        out_shape=jax.ShapeDtypeStruct((MOUT, CF2), jnp.float32),
        grid=(1,),   # whole net resident in VMEM in one step; only ~270 KB of params remain
                     # now that the select/pad matrices are built in-kernel, so no pipelining.
                     # TODO(synk): add a leading "parallel" grid axis over images for v7x 2-TC scaling.
        in_specs=[full_spec(a) for a in args],
        out_specs=pl.BlockSpec((MOUT, CF2), lambda i: (0, 0)),
        scratch_shapes=[
            pltpu.VMEM((CIN, MP0), jnp.float32),         # x0: zero-padded batch-flattened conv1 input
            pltpu.VMEM((K * K * CIN, L0), jnp.float32),  # stage-1 im2col slab
            pltpu.VMEM((K * K * C1, L1), jnp.float32),   # stage-2 im2col slab
            pltpu.VMEM((L2, K * K * C2), jnp.float32),   # stage-3 im2col slab
        ],
        compiler_params=pltpu.CompilerParams(dimension_semantics=("arbitrary",)),
    )(*args)


# ----------------------------- numpy reference -----------------------------
def _reference_forward_np(x, w1, b1, w2, b2, w3, b3, wf1, bf1, wf2, bf2):
    def lrelu(v):
        return np.where(v >= 0, v, NEG * v)

    def conv3x3(v, w, b):
        n, c, h, wd = v.shape
        vp = np.pad(v, ((0, 0), (0, 0), (PAD, PAD), (PAD, PAD)))
        o = np.zeros((n, w.shape[0], h, wd), np.float32)
        for kh in range(K):
            for kw in range(K):
                o += np.einsum("nchw,oc->nohw", vp[:, :, kh:kh + h, kw:kw + wd], w[:, :, kh, kw])
        return o + b[None, :, None, None]

    def pool2(v):
        n, c, h, wd = v.shape
        return v.reshape(n, c, h // 2, 2, wd // 2, 2).max(axis=(3, 5))

    y = pool2(lrelu(conv3x3(x, w1, b1)))     # Dropout2d == identity in eval mode
    y = pool2(lrelu(conv3x3(y, w2, b2)))
    y = pool2(lrelu(conv3x3(y, w3, b3)))
    y = lrelu(np.einsum("nchw,oc->nohw", y, wf1) + bf1[None, :, None, None])
    y = lrelu(np.einsum("nchw,oc->nohw", y, wf2) + bf2[None, :, None, None])
    return y.transpose(0, 2, 3, 1).reshape(-1, CF2).astype(np.float32)


# ----------------------------- main -----------------------------
if __name__ == "__main__":
    key = jax.random.PRNGKey(0)
    ks = jax.random.split(key, 11)
    w1 = 0.1 * jax.random.normal(ks[0], (C1, CIN, K, K), jnp.float32)    # conv1 weight
    b1 = 0.1 * jax.random.normal(ks[1], (C1,), jnp.float32)
    w2 = 0.1 * jax.random.normal(ks[2], (C2, C1, K, K), jnp.float32)     # conv2 weight
    b2 = 0.1 * jax.random.normal(ks[3], (C2,), jnp.float32)
    w3 = 0.1 * jax.random.normal(ks[4], (C3, C2, K, K), jnp.float32)     # conv3 weight
    b3 = 0.1 * jax.random.normal(ks[5], (C3,), jnp.float32)
    wf1 = 0.1 * jax.random.normal(ks[6], (CF1, C3), jnp.float32)         # fc1 (1x1 conv) weight
    bf1 = 0.1 * jax.random.normal(ks[7], (CF1,), jnp.float32)
    wf2 = 0.1 * jax.random.normal(ks[8], (CF2, CF1), jnp.float32)        # fc2 (1x1 conv) weight
    bf2 = 0.1 * jax.random.normal(ks[9], (CF2,), jnp.float32)
    x = jax.random.normal(ks[10], (N, CIN, H, W), jnp.float32)           # NCHW input

    params = prepare_params(w1, b1, w2, b2, w3, b3, wf1, bf1, wf2, bf2)
    out = jax.block_until_ready(posenet_forward(x, params))

    ref = _reference_forward_np(*(np.asarray(a) for a in
                                  (x, w1, b1, w2, b2, w3, b3, wf1, bf1, wf2, bf2)))
    assert out.shape == (N * HC * WC, CF2)
    np.testing.assert_allclose(np.asarray(out), ref, rtol=1e-3, atol=1e-3)
    print("KERNEL_OK")
</pallas_src>

<mosaic_0001>
module attributes {stable_mosaic.version = 11 : i64} {
  func.func @_posenet_kernel(%arg0: i32, %arg1: memref<8x256xf32, #tpu.memory_space<vmem>>, %arg2: memref<1x324xi32, #tpu.memory_space<vmem>>, %arg3: memref<16x36xf32, #tpu.memory_space<vmem>>, %arg4: memref<16x1xf32, #tpu.memory_space<vmem>>, %arg5: memref<1x200xi32, #tpu.memory_space<vmem>>, %arg6: memref<32x144xf32, #tpu.memory_space<vmem>>, %arg7: memref<32x1xf32, #tpu.memory_space<vmem>>, %arg8: memref<72x1xi32, #tpu.memory_space<vmem>>, %arg9: memref<288x64xf32, #tpu.memory_space<vmem>>, %arg10: memref<1x64xf32, #tpu.memory_space<vmem>>, %arg11: memref<8x1xi32, #tpu.memory_space<vmem>>, %arg12: memref<64x128xf32, #tpu.memory_space<vmem>>, %arg13: memref<1x128xf32, #tpu.memory_space<vmem>>, %arg14: memref<128x256xf32, #tpu.memory_space<vmem>>, %arg15: memref<1x256xf32, #tpu.memory_space<vmem>>, %arg16: memref<8x256xf32, #tpu.memory_space<vmem>>, %arg17: memref<4x648xf32, #tpu.memory_space<vmem>>, %arg18: memref<36x610xf32, #tpu.memory_space<vmem>>, %arg19: memref<144x178xf32, #tpu.memory_space<vmem>>, %arg20: memref<58x288xf32, #tpu.memory_space<vmem>>) attributes {dimension_semantics = [#tpu.dimension_semantics<arbitrary>], iteration_bounds = array<i64: 1>, scalar_prefetch = 0 : i64, scratch_operands = 4 : i64, tpu.core_type = #tpu.core_type<tc>, window_params = [{pipeline_mode = #tpu.pipeline_mode<synchronous>, transform_indices = @transform_0, window_bounds = array<i64: 8, 256>}, {pipeline_mode = #tpu.pipeline_mode<synchronous>, transform_indices = @transform_1, window_bounds = array<i64: 1, 324>}, {pipeline_mode = #tpu.pipeline_mode<synchronous>, transform_indices = @transform_2, window_bounds = array<i64: 16, 36>}, {pipeline_mode = #tpu.pipeline_mode<synchronous>, transform_indices = @transform_3, window_bounds = array<i64: 16, 1>}, {pipeline_mode = #tpu.pipeline_mode<synchronous>, transform_indices = @transform_4, window_bounds = array<i64: 1, 200>}, {pipeline_mode = #tpu.pipeline_mode<synchronous>, transform_indices = @transform_5, window_bounds = array<i64: 32, 144>}, {pipeline_mode = #tpu.pipeline_mode<synchronous>, transform_indices = @transform_6, window_bounds = array<i64: 32, 1>}, {pipeline_mode = #tpu.pipeline_mode<synchronous>, transform_indices = @transform_7, window_bounds = array<i64: 72, 1>}, {pipeline_mode = #tpu.pipeline_mode<synchronous>, transform_indices = @transform_8, window_bounds = array<i64: 288, 64>}, {pipeline_mode = #tpu.pipeline_mode<synchronous>, transform_indices = @transform_9, window_bounds = array<i64: 1, 64>}, {pipeline_mode = #tpu.pipeline_mode<synchronous>, transform_indices = @transform_10, window_bounds = array<i64: 8, 1>}, {pipeline_mode = #tpu.pipeline_mode<synchronous>, transform_indices = @transform_11, window_bounds = array<i64: 64, 128>}, {pipeline_mode = #tpu.pipeline_mode<synchronous>, transform_indices = @transform_12, window_bounds = array<i64: 1, 128>}, {pipeline_mode = #tpu.pipeline_mode<synchronous>, transform_indices = @transform_13, window_bounds = array<i64: 128, 256>}, {pipeline_mode = #tpu.pipeline_mode<synchronous>, transform_indices = @transform_14, window_bounds = array<i64: 1, 256>}, {pipeline_mode = #tpu.pipeline_mode<synchronous>, transform_indices = @transform_15, window_bounds = array<i64: 8, 256>}]} {
    %c0 = arith.constant 0 : index
    %c0_0 = arith.constant 0 : index
    %0 = vector.load %arg2[%c0, %c0_0] : memref<1x324xi32, #tpu.memory_space<vmem>>, vector<1x324xi32>
    %1 = tpu.iota {dimensions = array<i32: 0>} : vector<256x324xi32>
    %2 = vector.broadcast %0 : vector<1x324xi32> to vector<256x324xi32>
    %3 = arith.cmpi eq, %1, %2 : vector<256x324xi32>
    %4 = arith.extui %3 : vector<256x324xi1> to vector<256x324xi32>
    %5 = arith.sitofp %4 : vector<256x324xi32> to vector<256x324xf32>
    %c0_1 = arith.constant 0 : index
    %c0_2 = arith.constant 0 : index
    %6 = vector.load %arg1[%c0_1, %c0_2] : memref<8x256xf32, #tpu.memory_space<vmem>>, vector<8x256xf32>
    %cst = arith.constant dense<0.000000e+00> : vector<8x324xf32>
    %7 = tpu.matmul %6, %5, %cst {dimension_numbers = #tpu.dot_dimension_numbers<[1], [0], [0], [1], [0, 0, 1, 1], [], []>} : vector<8x256xf32>, vector<256x324xf32>, vector<8x324xf32> -> vector<8x324xf32>
    %8 = vector.extract_strided_slice %7 {offsets = [0, 0], sizes = [4, 324], strides = [1, 1]} : vector<8x324xf32> to vector<4x324xf32>
    %c0_3 = arith.constant 0 : index
    %c0_4 = arith.constant 0 : index
    %9 = vector.load %arg17[%c0_3, %c0_4] : memref<4x648xf32, #tpu.memory_space<vmem>>, vector<4x324xf32>
    tpu.vector_store %arg17[%c0_3, %c0_4], %8 {strides = array<i32>} : memref<4x648xf32, #tpu.memory_space<vmem>>, vector<4x324xf32>,
    %10 = vector.extract_strided_slice %7 {offsets = [4, 0], sizes = [4, 324], strides = [1, 1]} : vector<8x324xf32> to vector<4x324xf32>
    %c0_5 = arith.constant 0 : index
    %c324 = arith.constant 324 : index
    %11 = vector.load %arg17[%c0_5, %c324] : memref<4x648xf32, #tpu.memory_space<vmem>>, vector<4x324xf32>
    tpu.vector_store %arg17[%c0_5, %c324], %10 {strides = array<i32>} : memref<4x648xf32, #tpu.memory_space<vmem>>, vector<4x324xf32>,
    %c0_6 = arith.constant 0 : index
    %c0_7 = arith.constant 0 : index
    %12 = vector.load %arg17[%c0_6, %c0_7] : memref<4x648xf32, #tpu.memory_space<vmem>>, vector<4x648xf32>
    %13 = vector.extract_strided_slice %12 {offsets = [0, 0], sizes = [4, 610], strides = [1, 1]} : vector<4x648xf32> to vector<4x610xf32>
    %c0_8 = arith.constant 0 : index
    %c0_9 = arith.constant 0 : index
    %14 = vector.load %arg18[%c0_8, %c0_9] : memref<36x610xf32, #tpu.memory_space<vmem>>, vector<4x610xf32>
    tpu.vector_store %arg18[%c0_8, %c0_9], %13 {strides = array<i32>} : memref<36x610xf32, #tpu.memory_space<vmem>>, vector<4x610xf32>,
    %15 = vector.extract_strided_slice %12 {offsets = [0, 1], sizes = [4, 610], strides = [1, 1]} : vector<4x648xf32> to vector<4x610xf32>
    %c4 = arith.constant 4 : index
    %c0_10 = arith.constant 0 : index
    %16 = vector.load %arg18[%c4, %c0_10] : memref<36x610xf32, #tpu.memory_space<vmem>>, vector<4x610xf32>
    tpu.vector_store %arg18[%c4, %c0_10], %15 {strides = array<i32>} : memref<36x610xf32, #tpu.memory_space<vmem>>, vector<4x610xf32>,
    %17 = vector.extract_strided_slice %12 {offsets = [0, 2], sizes = [4, 610], strides = [1, 1]} : vector<4x648xf32> to vector<4x610xf32>
    %c8 = arith.constant 8 : index
    %c0_11 = arith.constant 0 : index
    %18 = vector.load %arg18[%c8, %c0_11] : memref<36x610xf32, #tpu.memory_space<vmem>>, vector<4x610xf32>
    tpu.vector_store %arg18[%c8, %c0_11], %17 {strides = array<i32>} : memref<36x610xf32, #tpu.memory_space<vmem>>, vector<4x610xf32>,
    %19 = vector.extract_strided_slice %12 {offsets = [0, 18], sizes = [4, 610], strides = [1, 1]} : vector<4x648xf32> to vector<4x610xf32>
    %c12 = arith.constant 12 : index
    %c0_12 = arith.constant 0 : index
    %20 = vector.load %arg18[%c12, %c0_12] : memref<36x610xf32, #tpu.memory_space<vmem>>, vector<4x610xf32>
    tpu.vector_store %arg18[%c12, %c0_12], %19 {strides = array<i32>} : memref<36x610xf32, #tpu.memory_space<vmem>>, vector<4x610xf32>,
    %21 = vector.extract_strided_slice %12 {offsets = [0, 19], sizes = [4, 610], strides = [1, 1]} : vector<4x648xf32> to vector<4x610xf32>
    %c16 = arith.constant 16 : index
    %c0_13 = arith.constant 0 : index
    %22 = vector.load %arg18[%c16, %c0_13] : memref<36x610xf32, #tpu.memory_space<vmem>>, vector<4x610xf32>
    tpu.vector_store %arg18[%c16, %c0_13], %21 {strides = array<i32>} : memref<36x610xf32, #tpu.memory_space<vmem>>, vector<4x610xf32>,
    %23 = vector.extract_strided_slice %12 {offsets = [0, 20], sizes = [4, 610], strides = [1, 1]} : vector<4x648xf32> to vector<4x610xf32>
    %c20 = arith.constant 20 : index
    %c0_14 = arith.constant 0 : index
    %24 = vector.load %arg18[%c20, %c0_14] : memref<36x610xf32, #tpu.memory_space<vmem>>, vector<4x610xf32>
    tpu.vector_store %arg18[%c20, %c0_14], %23 {strides = array<i32>} : memref<36x610xf32, #tpu.memory_space<vmem>>, vector<4x610xf32>,
    %25 = vector.extract_strided_slice %12 {offsets = [0, 36], sizes = [4, 610], strides = [1, 1]} : vector<4x648xf32> to vector<4x610xf32>
    %c24 = arith.constant 24 : index
    %c0_15 = arith.constant 0 : index
    %26 = vector.load %arg18[%c24, %c0_15] : memref<36x610xf32, #tpu.memory_space<vmem>>, vector<4x610xf32>
    tpu.vector_store %arg18[%c24, %c0_15], %25 {strides = array<i32>} : memref<36x610xf32, #tpu.memory_space<vmem>>, vector<4x610xf32>,
    %27 = vector.extract_strided_slice %12 {offsets = [0, 37], sizes = [4, 610], strides = [1, 1]} : vector<4x648xf32> to vector<4x610xf32>
    %c28 = arith.constant 28 : index
    %c0_16 = arith.constant 0 : index
    %28 = vector.load %arg18[%c28, %c0_16] : memref<36x610xf32, #tpu.memory_space<vmem>>, vector<4x610xf32>
    tpu.vector_store %arg18[%c28, %c0_16], %27 {strides = array<i32>} : memref<36x610xf32, #tpu.memory_space<vmem>>, vector<4x610xf32>,
    %29 = vector.extract_strided_slice %12 {offsets = [0, 38], sizes = [4, 610], strides = [1, 1]} : vector<4x648xf32> to vector<4x610xf32>
    %c32 = arith.constant 32 : index
    %c0_17 = arith.constant 0 : index
    %30 = vector.load %arg18[%c32, %c0_17] : memref<36x610xf32, #tpu.memory_space<vmem>>, vector<4x610xf32>
    tpu.vector_store %arg18[%c32, %c0_17], %29 {strides = array<i32>} : memref<36x610xf32, #tpu.memory_space<vmem>>, vector<4x610xf32>,
    %c0_18 = arith.constant 0 : index
    %c0_19 = arith.constant 0 : index
    %31 = vector.load %arg3[%c0_18, %c0_19] : memref<16x36xf32, #tpu.memory_space<vmem>>, vector<16x36xf32>
    %c0_20 = arith.constant 0 : index
    %c0_21 = arith.constant 0 : index
    %32 = vector.load %arg18[%c0_20, %c0_21] : memref<36x610xf32, #tpu.memory_space<vmem>>, vector<36x610xf32>
    %cst_22 = arith.constant dense<0.000000e+00> : vector<16x610xf32>
    %33 = tpu.matmul %31, %32, %cst_22 {dimension_numbers = #tpu.dot_dimension_numbers<[1], [0], [0], [1], [0, 0, 1, 1], [], []>} : vector<16x36xf32>, vector<36x610xf32>, vector<16x610xf32> -> vector<16x610xf32>
    %c0_23 = arith.constant 0 : index
    %c0_24 = arith.constant 0 : index
    %34 = vector.load %arg4[%c0_23, %c0_24] : memref<16x1xf32, #tpu.memory_space<vmem>>, vector<16x1xf32>
    %35 = vector.broadcast %34 : vector<16x1xf32> to vector<16x610xf32>
    %36 = arith.addf %33, %35 : vector<16x610xf32>
    %cst_25 = arith.constant 0.000000e+00 : f32
    %37 = vector.broadcast %cst_25 : f32 to vector<16x610xf32>
    %38 = arith.cmpf oge, %36, %37 : vector<16x610xf32>
    %cst_26 = arith.constant 0.00999999977 : f32
    %39 = vector.broadcast %cst_26 : f32 to vector<16x610xf32>
    %40 = arith.mulf %39, %36 : vector<16x610xf32>
    %41 = arith.select %38, %36, %40 : vector<16x610xi1>, vector<16x610xf32>
    %42 = vector.extract_strided_slice %41 {offsets = [0, 0], sizes = [16, 592], strides = [1, 1]} : vector<16x610xf32> to vector<16x592xf32>
    %43 = vector.extract_strided_slice %41 {offsets = [0, 18], sizes = [16, 592], strides = [1, 1]} : vector<16x610xf32> to vector<16x592xf32>
    %44 = arith.maximumf %42, %43 : vector<16x592xf32>
    %45 = vector.extract_strided_slice %44 {offsets = [0, 0], sizes = [16, 591], strides = [1, 1]} : vector<16x592xf32> to vector<16x591xf32>
    %46 = vector.extract_strided_slice %44 {offsets = [0, 1], sizes = [16, 591], strides = [1, 1]} : vector<16x592xf32> to vector<16x591xf32>
    %47 = arith.maximumf %45, %46 : vector<16x591xf32>
    %c0_27 = arith.constant 0 : index
    %c0_28 = arith.constant 0 : index
    %48 = vector.load %arg5[%c0_27, %c0_28] : memref<1x200xi32, #tpu.memory_space<vmem>>, vector<1x200xi32>
    %49 = tpu.iota {dimensions = array<i32: 0>} : vector<591x200xi32>
    %50 = vector.broadcast %48 : vector<1x200xi32> to vector<591x200xi32>
    %51 = arith.cmpi eq, %49, %50 : vector<591x200xi32>
    %52 = arith.extui %51 : vector<591x200xi1> to vector<591x200xi32>
    %53 = arith.sitofp %52 : vector<591x200xi32> to vector<591x200xf32>
    %cst_29 = arith.constant dense<0.000000e+00> : vector<16x200xf32>
    %54 = tpu.matmul %47, %53, %cst_29 {dimension_numbers = #tpu.dot_dimension_numbers<[1], [0], [0], [1], [0, 0, 1, 1], [], []>} : vector<16x591xf32>, vector<591x200xf32>, vector<16x200xf32> -> vector<16x200xf32>
    %55 = vector.extract_strided_slice %54 {offsets = [0, 0], sizes = [16, 178], strides = [1, 1]} : vector<16x200xf32> to vector<16x178xf32>
    %c0_30 = arith.constant 0 : index
    %c0_31 = arith.constant 0 : index
    %56 = vector.load %arg19[%c0_30, %c0_31] : memref<144x178xf32, #tpu.memory_space<vmem>>, vector<16x178xf32>
    tpu.vector_store %arg19[%c0_30, %c0_31], %55 {strides = array<i32>} : memref<144x178xf32, #tpu.memory_space<vmem>>, vector<16x178xf32>,
    %57 = vector.extract_strided_slice %54 {offsets = [0, 1], sizes = [16, 178], strides = [1, 1]} : vector<16x200xf32> to vector<16x178xf32>
    %c16_32 = arith.constant 16 : index
    %c0_33 = arith.constant 0 : index
    %58 = vector.load %arg19[%c16_32, %c0_33] : memref<144x178xf32, #tpu.memory_space<vmem>>, vector<16x178xf32>
    tpu.vector_store %arg19[%c16_32, %c0_33], %57 {strides = array<i32>} : memref<144x178xf32, #tpu.memory_space<vmem>>, vector<16x178xf32>,
    %59 = vector.extract_strided_slice %54 {offsets = [0, 2], sizes = [16, 178], strides = [1, 1]} : vector<16x200xf32> to vector<16x178xf32>
    %c32_34 = arith.constant 32 : index
    %c0_35 = arith.constant 0 : index
    %60 = vector.load %arg19[%c32_34, %c0_35] : memref<144x178xf32, #tpu.memory_space<vmem>>, vector<16x178xf32>
    tpu.vector_store %arg19[%c32_34, %c0_35], %59 {strides = array<i32>} : memref<144x178xf32, #tpu.memory_space<vmem>>, vector<16x178xf32>,
    %61 = vector.extract_strided_slice %54 {offsets = [0, 10], sizes = [16, 178], strides = [1, 1]} : vector<16x200xf32> to vector<16x178xf32>
    %c48 = arith.constant 48 : index
    %c0_36 = arith.constant 0 : index
    %62 = vector.load %arg19[%c48, %c0_36] : memref<144x178xf32, #tpu.memory_space<vmem>>, vector<16x178xf32>
    tpu.vector_store %arg19[%c48, %c0_36], %61 {strides = array<i32>} : memref<144x178xf32, #tpu.memory_space<vmem>>, vector<16x178xf32>,
    %63 = vector.extract_strided_slice %54 {offsets = [0, 11], sizes = [16, 178], strides = [1, 1]} : vector<16x200xf32> to vector<16x178xf32>
    %c64 = arith.constant 64 : index
    %c0_37 = arith.constant 0 : index
    %64 = vector.load %arg19[%c64, %c0_37] : memref<144x178xf32, #tpu.memory_space<vmem>>, vector<16x178xf32>
    tpu.vector_store %arg19[%c64, %c0_37], %63 {strides = array<i32>} : memref<144x178xf32, #tpu.memory_space<vmem>>, vector<16x178xf32>,
    %65 = vector.extract_strided_slice %54 {offsets = [0, 12], sizes = [16, 178], strides = [1, 1]} : vector<16x200xf32> to vector<16x178xf32>
    %c80 = arith.constant 80 : index
    %c0_38 = arith.constant 0 : index
    %66 = vector.load %arg19[%c80, %c0_38] : memref<144x178xf32, #tpu.memory_space<vmem>>, vector<16x178xf32>
    tpu.vector_store %arg19[%c80, %c0_38], %65 {strides = array<i32>} : memref<144x178xf32, #tpu.memory_space<vmem>>, vector<16x178xf32>,
    %67 = vector.extract_strided_slice %54 {offsets = [0, 20], sizes = [16, 178], strides = [1, 1]} : vector<16x200xf32> to vector<16x178xf32>
    %c96 = arith.constant 96 : index
    %c0_39 = arith.constant 0 : index
    %68 = vector.load %arg19[%c96, %c0_39] : memref<144x178xf32, #tpu.memory_space<vmem>>, vector<16x178xf32>
    tpu.vector_store %arg19[%c96, %c0_39], %67 {strides = array<i32>} : memref<144x178xf32, #tpu.memory_space<vmem>>, vector<16x178xf32>,
    %69 = vector.extract_strided_slice %54 {offsets = [0, 21], sizes = [16, 178], strides = [1, 1]} : vector<16x200xf32> to vector<16x178xf32>
    %c112 = arith.constant 112 : index
    %c0_40 = arith.constant 0 : index
    %70 = vector.load %arg19[%c112, %c0_40] : memref<144x178xf32, #tpu.memory_space<vmem>>, vector<16x178xf32>
    tpu.vector_store %arg19[%c112, %c0_40], %69 {strides = array<i32>} : memref<144x178xf32, #tpu.memory_space<vmem>>, vector<16x178xf32>,
    %71 = vector.extract_strided_slice %54 {offsets = [0, 22], sizes = [16, 178], strides = [1, 1]} : vector<16x200xf32> to vector<16x178xf32>
    %c128 = arith.constant 128 : index
    %c0_41 = arith.constant 0 : index
    %72 = vector.load %arg19[%c128, %c0_41] : memref<144x178xf32, #tpu.memory_space<vmem>>, vector<16x178xf32>
    tpu.vector_store %arg19[%c128, %c0_41], %71 {strides = array<i32>} : memref<144x178xf32, #tpu.memory_space<vmem>>, vector<16x178xf32>,
    %c0_42 = arith.constant 0 : index
    %c0_43 = arith.constant 0 : index
    %73 = vector.load %arg6[%c0_42, %c0_43] : memref<32x144xf32, #tpu.memory_space<vmem>>, vector<32x144xf32>
    %c0_44 = arith.constant 0 : index
    %c0_45 = arith.constant 0 : index
    %74 = vector.load %arg19[%c0_44, %c0_45] : memref<144x178xf32, #tpu.memory_space<vmem>>, vector<144x178xf32>
    %cst_46 = arith.constant dense<0.000000e+00> : vector<32x178xf32>
    %75 = tpu.matmul %73, %74, %cst_46 {dimension_numbers = #tpu.dot_dimension_numbers<[1], [0], [0], [1], [0, 0, 1, 1], [], []>} : vector<32x144xf32>, vector<144x178xf32>, vector<32x178xf32> -> vector<32x178xf32>
    %c0_47 = arith.constant 0 : index
    %c0_48 = arith.constant 0 : index
    %76 = vector.load %arg7[%c0_47, %c0_48] : memref<32x1xf32, #tpu.memory_space<vmem>>, vector<32x1xf32>
    %77 = vector.broadcast %76 : vector<32x1xf32> to vector<32x178xf32>
    %78 = arith.addf %75, %77 : vector<32x178xf32>
    %cst_49 = arith.constant 0.000000e+00 : f32
    %79 = vector.broadcast %cst_49 : f32 to vector<32x178xf32>
    %80 = arith.cmpf oge, %78, %79 : vector<32x178xf32>
    %cst_50 = arith.constant 0.00999999977 : f32
    %81 = vector.broadcast %cst_50 : f32 to vector<32x178xf32>
    %82 = arith.mulf %81, %78 : vector<32x178xf32>
    %83 = arith.select %80, %78, %82 : vector<32x178xi1>, vector<32x178xf32>
    %84 = vector.extract_strided_slice %83 {offsets = [0, 0], sizes = [32, 168], strides = [1, 1]} : vector<32x178xf32> to vector<32x168xf32>
    %85 = vector.extract_strided_slice %83 {offsets = [0, 10], sizes = [32, 168], strides = [1, 1]} : vector<32x178xf32> to vector<32x168xf32>
    %86 = arith.maximumf %84, %85 : vector<32x168xf32>
    %87 = vector.extract_strided_slice %86 {offsets = [0, 0], sizes = [32, 167], strides = [1, 1]} : vector<32x168xf32> to vector<32x167xf32>
    %88 = vector.extract_strided_slice %86 {offsets = [0, 1], sizes = [32, 167], strides = [1, 1]} : vector<32x168xf32> to vector<32x167xf32>
    %89 = arith.maximumf %87, %88 : vector<32x167xf32>
    %c0_51 = arith.constant 0 : index
    %c0_52 = arith.constant 0 : index
    %90 = vector.load %arg8[%c0_51, %c0_52] : memref<72x1xi32, #tpu.memory_space<vmem>>, vector<72x1xi32>
    %91 = tpu.iota {dimensions = array<i32: 1>} : vector<72x167xi32>
    %92 = vector.broadcast %90 : vector<72x1xi32> to vector<72x167xi32>
    %93 = arith.cmpi eq, %91, %92 : vector<72x167xi32>
    %94 = arith.extui %93 : vector<72x167xi1> to vector<72x167xi32>
    %95 = arith.sitofp %94 : vector<72x167xi32> to vector<72x167xf32>
    %cst_53 = arith.constant dense<0.000000e+00> : vector<72x32xf32>
    %96 = tpu.matmul %95, %89, %cst_53 {dimension_numbers = #tpu.dot_dimension_numbers<[1], [1], [0], [0], [0, 0, 1, 0], [], []>} : vector<72x167xf32>, vector<32x167xf32>, vector<72x32xf32> -> vector<72x32xf32>
    %97 = vector.extract_strided_slice %96 {offsets = [0, 0], sizes = [58, 32], strides = [1, 1]} : vector<72x32xf32> to vector<58x32xf32>
    %c0_54 = arith.constant 0 : index
    %c0_55 = arith.constant 0 : index
    %98 = vector.load %arg20[%c0_54, %c0_55] : memref<58x288xf32, #tpu.memory_space<vmem>>, vector<58x32xf32>
    tpu.vector_store %arg20[%c0_54, %c0_55], %97 {strides = array<i32>} : memref<58x288xf32, #tpu.memory_space<vmem>>, vector<58x32xf32>,
    %99 = vector.extract_strided_slice %96 {offsets = [1, 0], sizes = [58, 32], strides = [1, 1]} : vector<72x32xf32> to vector<58x32xf32>
    %c0_56 = arith.constant 0 : index
    %c32_57 = arith.constant 32 : index
    %100 = vector.load %arg20[%c0_56, %c32_57] : memref<58x288xf32, #tpu.memory_space<vmem>>, vector<58x32xf32>
    tpu.vector_store %arg20[%c0_56, %c32_57], %99 {strides = array<i32>} : memref<58x288xf32, #tpu.memory_space<vmem>>, vector<58x32xf32>,
    %101 = vector.extract_strided_slice %96 {offsets = [2, 0], sizes = [58, 32], strides = [1, 1]} : vector<72x32xf32> to vector<58x32xf32>
    %c0_58 = arith.constant 0 : index
    %c64_59 = arith.constant 64 : index
    %102 = vector.load %arg20[%c0_58, %c64_59] : memref<58x288xf32, #tpu.memory_space<vmem>>, vector<58x32xf32>
    tpu.vector_store %arg20[%c0_58, %c64_59], %101 {strides = array<i32>} : memref<58x288xf32, #tpu.memory_space<vmem>>, vector<58x32xf32>,
    %103 = vector.extract_strided_slice %96 {offsets = [6, 0], sizes = [58, 32], strides = [1, 1]} : vector<72x32xf32> to vector<58x32xf32>
    %c0_60 = arith.constant 0 : index
    %c96_61 = arith.constant 96 : index
    %104 = vector.load %arg20[%c0_60, %c96_61] : memref<58x288xf32, #tpu.memory_space<vmem>>, vector<58x32xf32>
    tpu.vector_store %arg20[%c0_60, %c96_61], %103 {strides = array<i32>} : memref<58x288xf32, #tpu.memory_space<vmem>>, vector<58x32xf32>,
    %105 = vector.extract_strided_slice %96 {offsets = [7, 0], sizes = [58, 32], strides = [1, 1]} : vector<72x32xf32> to vector<58x32xf32>
    %c0_62 = arith.constant 0 : index
    %c128_63 = arith.constant 128 : index
    %106 = vector.load %arg20[%c0_62, %c128_63] : memref<58x288xf32, #tpu.memory_space<vmem>>, vector<58x32xf32>
    tpu.vector_store %arg20[%c0_62, %c128_63], %105 {strides = array<i32>} : memref<58x288xf32, #tpu.memory_space<vmem>>, vector<58x32xf32>,
    %107 = vector.extract_strided_slice %96 {offsets = [8, 0], sizes = [58, 32], strides = [1, 1]} : vector<72x32xf32> to vector<58x32xf32>
    %c0_64 = arith.constant 0 : index
    %c160 = arith.constant 160 : index
    %108 = vector.load %arg20[%c0_64, %c160] : memref<58x288xf32, #tpu.memory_space<vmem>>, vector<58x32xf32>
    tpu.vector_store %arg20[%c0_64, %c160], %107 {strides = array<i32>} : memref<58x288xf32, #tpu.memory_space<vmem>>, vector<58x32xf32>,
    %109 = vector.extract_strided_slice %96 {offsets = [12, 0], sizes = [58, 32], strides = [1, 1]} : vector<72x32xf32> to vector<58x32xf32>
    %c0_65 = arith.constant 0 : index
    %c192 = arith.constant 192 : index
    %110 = vector.load %arg20[%c0_65, %c192] : memref<58x288xf32, #tpu.memory_space<vmem>>, vector<58x32xf32>
    tpu.vector_store %arg20[%c0_65, %c192], %109 {strides = array<i32>} : memref<58x288xf32, #tpu.memory_space<vmem>>, vector<58x32xf32>,
    %111 = vector.extract_strided_slice %96 {offsets = [13, 0], sizes = [58, 32], strides = [1, 1]} : vector<72x32xf32> to vector<58x32xf32>
    %c0_66 = arith.constant 0 : index
    %c224 = arith.constant 224 : index
    %112 = vector.load %arg20[%c0_66, %c224] : memref<58x288xf32, #tpu.memory_space<vmem>>, vector<58x32xf32>
    tpu.vector_store %arg20[%c0_66, %c224], %111 {strides = array<i32>} : memref<58x288xf32, #tpu.memory_space<vmem>>, vector<58x32xf32>,
    %113 = vector.extract_strided_slice %96 {offsets = [14, 0], sizes = [58, 32], strides = [1, 1]} : vector<72x32xf32> to vector<58x32xf32>
    %c0_67 = arith.constant 0 : index
    %c256 = arith.constant 256 : index
    %114 = vector.load %arg20[%c0_67, %c256] : memref<58x288xf32, #tpu.memory_space<vmem>>, vector<58x32xf32>
    tpu.vector_store %arg20[%c0_67, %c256], %113 {strides = array<i32>} : memref<58x288xf32, #tpu.memory_space<vmem>>, vector<58x32xf32>,
    %c0_68 = arith.constant 0 : index
    %c0_69 = arith.constant 0 : index
    %115 = vector.load %arg20[%c0_68, %c0_69] : memref<58x288xf32, #tpu.memory_space<vmem>>, vector<58x288xf32>
    %c0_70 = arith.constant 0 : index
    %c0_71 = arith.constant 0 : index
    %116 = vector.load %arg9[%c0_70, %c0_71] : memref<288x64xf32, #tpu.memory_space<vmem>>, vector<288x64xf32>
    %cst_72 = arith.constant dense<0.000000e+00> : vector<58x64xf32>
    %117 = tpu.matmul %115, %116, %cst_72 {dimension_numbers = #tpu.dot_dimension_numbers<[1], [0], [0], [1], [0, 0, 1, 1], [], []>} : vector<58x288xf32>, vector<288x64xf32>, vector<58x64xf32> -> vector<58x64xf32>
    %c0_73 = arith.constant 0 : index
    %c0_74 = arith.constant 0 : index
    %118 = vector.load %arg10[%c0_73, %c0_74] : memref<1x64xf32, #tpu.memory_space<vmem>>, vector<1x64xf32>
    %119 = vector.broadcast %118 : vector<1x64xf32> to vector<58x64xf32>
    %120 = arith.addf %117, %119 : vector<58x64xf32>
    %cst_75 = arith.constant 0.000000e+00 : f32
    %121 = vector.broadcast %cst_75 : f32 to vector<58x64xf32>
    %122 = arith.cmpf oge, %120, %121 : vector<58x64xf32>
    %cst_76 = arith.constant 0.00999999977 : f32
    %123 = vector.broadcast %cst_76 : f32 to vector<58x64xf32>
    %124 = arith.mulf %123, %120 : vector<58x64xf32>
    %125 = arith.select %122, %120, %124 : vector<58x64xi1>, vector<58x64xf32>
    %126 = vector.extract_strided_slice %125 {offsets = [0, 0], sizes = [52, 64], strides = [1, 1]} : vector<58x64xf32> to vector<52x64xf32>
    %127 = vector.extract_strided_slice %125 {offsets = [6, 0], sizes = [52, 64], strides = [1, 1]} : vector<58x64xf32> to vector<52x64xf32>
    %128 = arith.maximumf %126, %127 : vector<52x64xf32>
    %129 = vector.extract_strided_slice %128 {offsets = [0, 0], sizes = [51, 64], strides = [1, 1]} : vector<52x64xf32> to vector<51x64xf32>
    %130 = vector.extract_strided_slice %128 {offsets = [1, 0], sizes = [51, 64], strides = [1, 1]} : vector<52x64xf32> to vector<51x64xf32>
    %131 = arith.maximumf %129, %130 : vector<51x64xf32>
    %c0_77 = arith.constant 0 : index
    %c0_78 = arith.constant 0 : index
    %132 = vector.load %arg11[%c0_77, %c0_78] : memref<8x1xi32, #tpu.memory_space<vmem>>, vector<8x1xi32>
    %133 = tpu.iota {dimensions = array<i32: 1>} : vector<8x51xi32>
    %134 = vector.broadcast %132 : vector<8x1xi32> to vector<8x51xi32>
    %135 = arith.cmpi eq, %133, %134 : vector<8x51xi32>
    %136 = arith.extui %135 : vector<8x51xi1> to vector<8x51xi32>
    %137 = arith.sitofp %136 : vector<8x51xi32> to vector<8x51xf32>
    %cst_79 = arith.constant dense<0.000000e+00> : vector<8x64xf32>
    %138 = tpu.matmul %137, %131, %cst_79 {dimension_numbers = #tpu.dot_dimension_numbers<[1], [0], [0], [1], [0, 0, 1, 1], [], []>} : vector<8x51xf32>, vector<51x64xf32>, vector<8x64xf32> -> vector<8x64xf32>
    %c0_80 = arith.constant 0 : index
    %c0_81 = arith.constant 0 : index
    %139 = vector.load %arg12[%c0_80, %c0_81] : memref<64x128xf32, #tpu.memory_space<vmem>>, vector<64x128xf32>
    %cst_82 = arith.constant dense<0.000000e+00> : vector<8x128xf32>
    %140 = tpu.matmul %138, %139, %cst_82 {dimension_numbers = #tpu.dot_dimension_numbers<[1], [0], [0], [1], [0, 0, 1, 1], [], []>} : vector<8x64xf32>, vector<64x128xf32>, vector<8x128xf32> -> vector<8x128xf32>
    %c0_83 = arith.constant 0 : index
    %c0_84 = arith.constant 0 : index
    %141 = vector.load %arg13[%c0_83, %c0_84] : memref<1x128xf32, #tpu.memory_space<vmem>>, vector<1x128xf32>
    %142 = vector.broadcast %141 : vector<1x128xf32> to vector<8x128xf32>
    %143 = arith.addf %140, %142 : vector<8x128xf32>
    %cst_85 = arith.constant 0.000000e+00 : f32
    %144 = vector.broadcast %cst_85 : f32 to vector<8x128xf32>
    %145 = arith.cmpf oge, %143, %144 : vector<8x128xf32>
    %cst_86 = arith.constant 0.00999999977 : f32
    %146 = vector.broadcast %cst_86 : f32 to vector<8x128xf32>
    %147 = arith.mulf %146, %143 : vector<8x128xf32>
    %148 = arith.select %145, %143, %147 : vector<8x128xi1>, vector<8x128xf32>
    %c0_87 = arith.constant 0 : index
    %c0_88 = arith.constant 0 : index
    %149 = vector.load %arg14[%c0_87, %c0_88] : memref<128x256xf32, #tpu.memory_space<vmem>>, vector<128x256xf32>
    %cst_89 = arith.constant dense<0.000000e+00> : vector<8x256xf32>
    %150 = tpu.matmul %148, %149, %cst_89 {dimension_numbers = #tpu.dot_dimension_numbers<[1], [0], [0], [1], [0, 0, 1, 1], [], []>} : vector<8x128xf32>, vector<128x256xf32>, vector<8x256xf32> -> vector<8x256xf32>
    %c0_90 = arith.constant 0 : index
    %c0_91 = arith.constant 0 : index
    %151 = vector.load %arg15[%c0_90, %c0_91] : memref<1x256xf32, #tpu.memory_space<vmem>>, vector<1x256xf32>
    %152 = vector.broadcast %151 : vector<1x256xf32> to vector<8x256xf32>
    %153 = arith.addf %150, %152 : vector<8x256xf32>
    %cst_92 = arith.constant 0.000000e+00 : f32
    %154 = vector.broadcast %cst_92 : f32 to vector<8x256xf32>
    %155 = arith.cmpf oge, %153, %154 : vector<8x256xf32>
    %cst_93 = arith.constant 0.00999999977 : f32
    %156 = vector.broadcast %cst_93 : f32 to vector<8x256xf32>
    %157 = arith.mulf %156, %153 : vector<8x256xf32>
    %158 = arith.select %155, %153, %157 : vector<8x256xi1>, vector<8x256xf32>
    %c0_94 = arith.constant 0 : index
    %c0_95 = arith.constant 0 : index
    %159 = vector.load %arg16[%c0_94, %c0_95] : memref<8x256xf32, #tpu.memory_space<vmem>>, vector<8x256xf32>
    tpu.vector_store %arg16[%c0_94, %c0_95], %158 {strides = array<i32>} : memref<8x256xf32, #tpu.memory_space<vmem>>, vector<8x256xf32>,
    return
  }
  func.func @transform_0(%arg0: i32) -> (i32, i32) {
    %c0_i32 = arith.constant 0 : i32
    %c0_i32_0 = arith.constant 0 : i32
    %c0_i32_1 = arith.constant 0 : i32
    return %c0_i32, %c0_i32_0 : i32, i32
  }
  func.func @transform_1(%arg0: i32) -> (i32, i32) {
    %c0_i32 = arith.constant 0 : i32
    %c0_i32_0 = arith.constant 0 : i32
    %c0_i32_1 = arith.constant 0 : i32
    return %c0_i32, %c0_i32_0 : i32, i32
  }
  func.func @transform_2(%arg0: i32) -> (i32, i32) {
    %c0_i32 = arith.constant 0 : i32
    %c0_i32_0 = arith.constant 0 : i32
    %c0_i32_1 = arith.constant 0 : i32
    return %c0_i32, %c0_i32_0 : i32, i32
  }
  func.func @transform_3(%arg0: i32) -> (i32, i32) {
    %c0_i32 = arith.constant 0 : i32
    %c0_i32_0 = arith.constant 0 : i32
    %c0_i32_1 = arith.constant 0 : i32
    return %c0_i32, %c0_i32_0 : i32, i32
  }
  func.func @transform_4(%arg0: i32) -> (i32, i32) {
    %c0_i32 = arith.constant 0 : i32
    %c0_i32_0 = arith.constant 0 : i32
    %c0_i32_1 = arith.constant 0 : i32
    return %c0_i32, %c0_i32_0 : i32, i32
  }
  func.func @transform_5(%arg0: i32) -> (i32, i32) {
    %c0_i32 = arith.constant 0 : i32
    %c0_i32_0 = arith.constant 0 : i32
    %c0_i32_1 = arith.constant 0 : i32
    return %c0_i32, %c0_i32_0 : i32, i32
  }
  func.func @transform_6(%arg0: i32) -> (i32, i32) {
    %c0_i32 = arith.constant 0 : i32
    %c0_i32_0 = arith.constant 0 : i32
    %c0_i32_1 = arith.constant 0 : i32
    return %c0_i32, %c0_i32_0 : i32, i32
  }
  func.func @transform_7(%arg0: i32) -> (i32, i32) {
    %c0_i32 = arith.constant 0 : i32
    %c0_i32_0 = arith.constant 0 : i32
    %c0_i32_1 = arith.constant 0 : i32
    return %c0_i32, %c0_i32_0 : i32, i32
  }
  func.func @transform_8(%arg0: i32) -> (i32, i32) {
    %c0_i32 = arith.constant 0 : i32
    %c0_i32_0 = arith.constant 0 : i32
    %c0_i32_1 = arith.constant 0 : i32
    return %c0_i32, %c0_i32_0 : i32, i32
  }
  func.func @transform_9(%arg0: i32) -> (i32, i32) {
    %c0_i32 = arith.constant 0 : i32
    %c0_i32_0 = arith.constant 0 : i32
    %c0_i32_1 = arith.constant 0 : i32
    return %c0_i32, %c0_i32_0 : i32, i32
  }
  func.func @transform_10(%arg0: i32) -> (i32, i32) {
    %c0_i32 = arith.constant 0 : i32
    %c0_i32_0 = arith.constant 0 : i32
    %c0_i32_1 = arith.constant 0 : i32
    return %c0_i32, %c0_i32_0 : i32, i32
  }
  func.func @transform_11(%arg0: i32) -> (i32, i32) {
    %c0_i32 = arith.constant 0 : i32
    %c0_i32_0 = arith.constant 0 : i32
    %c0_i32_1 = arith.constant 0 : i32
    return %c0_i32, %c0_i32_0 : i32, i32
  }
  func.func @transform_12(%arg0: i32) -> (i32, i32) {
    %c0_i32 = arith.constant 0 : i32
    %c0_i32_0 = arith.constant 0 : i32
    %c0_i32_1 = arith.constant 0 : i32
    return %c0_i32, %c0_i32_0 : i32, i32
  }
  func.func @transform_13(%arg0: i32) -> (i32, i32) {
    %c0_i32 = arith.constant 0 : i32
    %c0_i32_0 = arith.constant 0 : i32
    %c0_i32_1 = arith.constant 0 : i32
    return %c0_i32, %c0_i32_0 : i32, i32
  }
  func.func @transform_14(%arg0: i32) -> (i32, i32) {
    %c0_i32 = arith.constant 0 : i32
    %c0_i32_0 = arith.constant 0 : i32
    %c0_i32_1 = arith.constant 0 : i32
    return %c0_i32, %c0_i32_0 : i32, i32
  }
  func.func @transform_15(%arg0: i32) -> (i32, i32) {
    %c0_i32 = arith.constant 0 : i32
    %c0_i32_0 = arith.constant 0 : i32
    %c0_i32_1 = arith.constant 0 : i32
    return %c0_i32, %c0_i32_0 : i32, i32
  }
}

</mosaic_0001>

<bundles_post_ra>
// kernel: posenet_forward.1
= control target key start
LH: loop header
LB: loop body
LE: loop exit
PB: predicated region body
PF: predicated region fallthrough
CT: control target
= control target key end

     0   :  { %v6474_v1 = vlaneseq  ;;  %s6458_s0 = inlined_call_operand.vmem [shape: f32[8,256], index: 0, kind: input, shape index: {}]   ;;  %s6459_s1 = inlined_call_operand.vmem [shape: s32[1,324], index: 1, kind: input, shape index: {}]   ;;  %s6460_s2 = inlined_call_operand.vmem [shape: f32[16,36], index: 2, kind: input, shape index: {}]   ;;  %s6461_s3 = inlined_call_operand.vmem [shape: f32[16,1], index: 3, kind: input, shape index: {}]   ;;  %s6462_s4 = inlined_call_operand.vmem [shape: s32[1,200], index: 4, kind: input, shape index: {}]   ;;  %s6463_s5 = inlined_call_operand.vmem [shape: f32[32,144], index: 5, kind: input, shape index: {}]   ;;  %s6464_s6 = inlined_call_operand.vmem [shape: f32[32,1], index: 6, kind: input, shape index: {}]   ;;  %s6465_s7 = inlined_call_operand.vmem [shape: s32[72,1], index: 7, kind: input, shape index: {}]   ;;  %s6466_s8 = inlined_call_operand.vmem [shape: f32[288,64], index: 8, kind: input, shape index: {}]   ;;  %s6467_s9 = inlined_call_operand.vmem [shape: f32[1,64], index: 9, kind: input, shape index: {}]   ;;  %s6468_s10 = inlined_call_operand.vmem [shape: s32[8,1], index: 10, kind: input, shape index: {}]   ;;  %s6469_s11 = inlined_call_operand.vmem [shape: f32[64,128], index: 11, kind: input, shape index: {}]   ;;  %s6470_s12 = inlined_call_operand.vmem [shape: f32[1,128], index: 12, kind: input, shape index: {}]   ;;  %s6471_s13 = inlined_call_operand.vmem [shape: f32[128,256], index: 13, kind: input, shape index: {}]   ;;  %s6472_s14 = inlined_call_operand.vmem [shape: f32[1,256], index: 14, kind: input, shape index: {}]   ;;  %s6473_s15 = inlined_call_operand.hbm [shape: f32[8,256], index: 15, kind: output, shape index: {}]  }
   0x1   :  { %v4213_v0 = vld [vmem:[%s6459_s1] sm:$0x7] }
   0x2   :  { %20 = vsyncpa [#allocation7], 0  ;;  %v4216_v2 = vshrl.u32 %v6474_v1, 7  ;;  %v4219_v3 = vperm.slane %v4213_v0, 0  ;;  %v4222_v4 = vperm.slane %v4213_v0, 1  ;;  %v6477_v13 = vmov 1.0  }
   0x3   :  { %v4492_v37 = vperm.slane %v4213_v0, 2  ;;  %v4511_v38 = vld [vmem:[%s6458_s0] sm:$0xff]  ;;  %v4516_v39 = vld [vmem:[%s6458_s0 + $0x8] sm:$0xff]  ;;  %s4110_s0 = smov 68   ;;  %s4111_s23 = smov 127  }
   0x4   :  { %v4225_v5 = vadd.s32 120, %v4216_v2  ;;  %v4228_v6 = vadd.s32 248, %v4216_v2  ;;  %v4231_v7 = vadd.s32 112, %v4216_v2  ;;  %v4234_v8 = vadd.s32 240, %v4216_v2  ;;  %s4112_s24 = smov 126   ;;  %s4113_s25 = smov 110  }
   0x5   :  { %v4237_v9 = vadd.s32 104, %v4216_v2  ;;  %v4240_v10 = vadd.s32 232, %v4216_v2  ;;  %v4243_v11 = vadd.s32 96, %v4216_v2  ;;  %v4246_v12 = vadd.s32 224, %v4216_v2  ;;  %s4114_s26 = smov 109   ;;  %s4115_s27 = smov 108  }
   0x6   :  { %vm133_vm0 = vcmp.eq.s32.totalorder %v4225_v5, %v4219_v3  ;;  %vm181_vm1 = vcmp.eq.s32.totalorder %v4228_v6, %v4219_v3  ;;  %vm134_vm2 = vcmp.eq.s32.totalorder %v4225_v5, %v4222_v4  ;;  %vm182_vm3 = vcmp.eq.s32.totalorder %v4228_v6, %v4222_v4  ;;  %s4116_s28 = smov 92   ;;  %s4117_s29 = smov 91  }
   0x7   :  { %3525 = vmatpush.msk.msra.mxu0 %vm133_vm0, %v6477_v13  ;;  %3541 = vmatpush.msk.msra.mxu1 %vm181_vm1, %v6477_v13  ;;  %vm130_vm4 = vcmp.eq.s32.totalorder %v4231_v7, %v4219_v3  ;;  %vm178_vm5 = vcmp.eq.s32.totalorder %v4234_v8, %v4219_v3  ;;  %vm131_vm6 = vcmp.eq.s32.totalorder %v4231_v7, %v4222_v4  ;;  %v4265_v14 = vadd.s32 88, %v4216_v2  ;;  %s4118_s30 = smov 90  }
   0x8   :  { %3557 = vmatpush.msk.msra.mxu2 %vm134_vm2, %v6477_v13  ;;  %3573 = vmatpush.msk.msra.mxu3 %vm182_vm3, %v6477_v13  ;;  %vm179_vm7 = vcmp.eq.s32.totalorder %v4234_v8, %v4222_v4  ;;  %vm127_vm8 = vcmp.eq.s32.totalorder %v4237_v9, %v4219_v3  ;;  %vm175_vm9 = vcmp.eq.s32.totalorder %v4240_v10, %v4219_v3  ;;  %v4276_v15 = vadd.s32 216, %v4216_v2 }
   0x9   :  { %3526 = vmatpush.msk.msra.mxu0 %vm130_vm4, %v6477_v13  ;;  %3542 = vmatpush.msk.msra.mxu1 %vm178_vm5, %v6477_v13  ;;  %vm128_vm10 = vcmp.eq.s32.totalorder %v4237_v9, %v4222_v4  ;;  %vm176_vm11 = vcmp.eq.s32.totalorder %v4240_v10, %v4222_v4  ;;  %vm124_vm12 = vcmp.eq.s32.totalorder %v4243_v11, %v4219_v3  ;;  %v4291_v16 = vadd.s32 80, %v4216_v2 }
   0xa   :  { %3558 = vmatpush.msk.msra.mxu2 %vm131_vm6, %v6477_v13  ;;  %3574 = vmatpush.msk.msra.mxu3 %vm179_vm7, %v6477_v13  ;;  %vm172_vm13 = vcmp.eq.s32.totalorder %v4246_v12, %v4219_v3  ;;  %v4294_v17 = vadd.s32 208, %v4216_v2  ;;  %vm125_vm14 = vcmp.eq.s32.totalorder %v4243_v11, %v4222_v4  ;;  %vm173_vm15 = vcmp.eq.s32.totalorder %v4246_v12, %v4222_v4 }
   0xb   :  { %3527 = vmatpush.msk.msra.mxu0 %vm127_vm8, %v6477_v13  ;;  %3543 = vmatpush.msk.msra.mxu1 %vm175_vm9, %v6477_v13  ;;  %vm121_vm0 = vcmp.eq.s32.totalorder %v4265_v14, %v4219_v3  ;;  %vm169_vm1 = vcmp.eq.s32.totalorder %v4276_v15, %v4219_v3  ;;  %v4309_v18 = vadd.s32 72, %v4216_v2  ;;  %v4312_v19 = vadd.s32 200, %v4216_v2 }
   0xc   :  { %3559 = vmatpush.msk.msra.mxu2 %vm128_vm10, %v6477_v13  ;;  %3575 = vmatpush.msk.msra.mxu3 %vm176_vm11, %v6477_v13  ;;  %vm122_vm2 = vcmp.eq.s32.totalorder %v4265_v14, %v4222_v4  ;;  %vm170_vm3 = vcmp.eq.s32.totalorder %v4276_v15, %v4222_v4  ;;  %vm118_vm4 = vcmp.eq.s32.totalorder %v4291_v16, %v4219_v3  ;;  %v4327_v20 = vadd.s32 64, %v4216_v2 }
   0xd   :  { %3528 = vmatpush.msk.msra.mxu0 %vm124_vm12, %v6477_v13  ;;  %3544 = vmatpush.msk.msra.mxu1 %vm172_vm13, %v6477_v13  ;;  %vm166_vm5 = vcmp.eq.s32.totalorder %v4294_v17, %v4219_v3  ;;  %v4330_v21 = vadd.s32 192, %v4216_v2  ;;  %vm119_vm6 = vcmp.eq.s32.totalorder %v4291_v16, %v4222_v4  ;;  %vm167_vm7 = vcmp.eq.s32.totalorder %v4294_v17, %v4222_v4 }
   0xe   :  { %3560 = vmatpush.msk.msra.mxu2 %vm125_vm14, %v6477_v13  ;;  %3576 = vmatpush.msk.msra.mxu3 %vm173_vm15, %v6477_v13  ;;  %vm115_vm8 = vcmp.eq.s32.totalorder %v4309_v18, %v4219_v3  ;;  %vm163_vm9 = vcmp.eq.s32.totalorder %v4312_v19, %v4219_v3  ;;  %v4345_v22 = vadd.s32 56, %v4216_v2  ;;  %v4348_v23 = vadd.s32 184, %v4216_v2 }
   0xf   :  { %3529 = vmatpush.msk.msra.mxu0 %vm121_vm0, %v6477_v13  ;;  %3545 = vmatpush.msk.msra.mxu1 %vm169_vm1, %v6477_v13  ;;  %vm116_vm10 = vcmp.eq.s32.totalorder %v4309_v18, %v4222_v4  ;;  %vm164_vm11 = vcmp.eq.s32.totalorder %v4312_v19, %v4222_v4  ;;  %vm112_vm12 = vcmp.eq.s32.totalorder %v4327_v20, %v4219_v3  ;;  %v4363_v24 = vadd.s32 48, %v4216_v2 }
  0x10   :  { %3561 = vmatpush.msk.msra.mxu2 %vm122_vm2, %v6477_v13  ;;  %3577 = vmatpush.msk.msra.mxu3 %vm170_vm3, %v6477_v13  ;;  %vm160_vm13 = vcmp.eq.s32.totalorder %v4330_v21, %v4219_v3  ;;  %v4366_v25 = vadd.s32 176, %v4216_v2  ;;  %vm113_vm14 = vcmp.eq.s32.totalorder %v4327_v20, %v4222_v4  ;;  %vm161_vm15 = vcmp.eq.s32.totalorder %v4330_v21, %v4222_v4 }
  0x11   :  { %3530 = vmatpush.msk.msra.mxu0 %vm118_vm4, %v6477_v13  ;;  %3546 = vmatpush.msk.msra.mxu1 %vm166_vm5, %v6477_v13  ;;  %vm109_vm0 = vcmp.eq.s32.totalorder %v4345_v22, %v4219_v3  ;;  %vm157_vm1 = vcmp.eq.s32.totalorder %v4348_v23, %v4219_v3  ;;  %v4381_v26 = vadd.s32 40, %v4216_v2  ;;  %v4384_v27 = vadd.s32 168, %v4216_v2 }
  0x12   :  { %3562 = vmatpush.msk.msra.mxu2 %vm119_vm6, %v6477_v13  ;;  %3578 = vmatpush.msk.msra.mxu3 %vm167_vm7, %v6477_v13  ;;  %vm110_vm2 = vcmp.eq.s32.totalorder %v4345_v22, %v4222_v4  ;;  %vm158_vm3 = vcmp.eq.s32.totalorder %v4348_v23, %v4222_v4  ;;  %vm106_vm4 = vcmp.eq.s32.totalorder %v4363_v24, %v4219_v3  ;;  %v4399_v28 = vadd.s32 32, %v4216_v2 }
  0x13   :  { %3531 = vmatpush.msk.msra.mxu0 %vm115_vm8, %v6477_v13  ;;  %3547 = vmatpush.msk.msra.mxu1 %vm163_vm9, %v6477_v13  ;;  %vm154_vm5 = vcmp.eq.s32.totalorder %v4366_v25, %v4219_v3  ;;  %v4402_v29 = vadd.s32 160, %v4216_v2  ;;  %vm107_vm6 = vcmp.eq.s32.totalorder %v4363_v24, %v4222_v4  ;;  %vm155_vm7 = vcmp.eq.s32.totalorder %v4366_v25, %v4222_v4 }
  0x14   :  { %3563 = vmatpush.msk.msra.mxu2 %vm116_vm10, %v6477_v13  ;;  %3579 = vmatpush.msk.msra.mxu3 %vm164_vm11, %v6477_v13  ;;  %vm103_vm8 = vcmp.eq.s32.totalorder %v4381_v26, %v4219_v3  ;;  %vm151_vm9 = vcmp.eq.s32.totalorder %v4384_v27, %v4219_v3  ;;  %v4417_v30 = vadd.s32 24, %v4216_v2  ;;  %v4420_v31 = vadd.s32 152, %v4216_v2 }
  0x15   :  { %3532 = vmatpush.msk.msra.mxu0 %vm112_vm12, %v6477_v13  ;;  %3548 = vmatpush.msk.msra.mxu1 %vm160_vm13, %v6477_v13  ;;  %vm104_vm10 = vcmp.eq.s32.totalorder %v4381_v26, %v4222_v4  ;;  %vm152_vm11 = vcmp.eq.s32.totalorder %v4384_v27, %v4222_v4  ;;  %vm100_vm12 = vcmp.eq.s32.totalorder %v4399_v28, %v4219_v3  ;;  %v4435_v32 = vadd.s32 16, %v4216_v2 }
  0x16   :  { %3564 = vmatpush.msk.msra.mxu2 %vm113_vm14, %v6477_v13  ;;  %3580 = vmatpush.msk.msra.mxu3 %vm161_vm15, %v6477_v13  ;;  %vm148_vm13 = vcmp.eq.s32.totalorder %v4402_v29, %v4219_v3  ;;  %v4438_v33 = vadd.s32 144, %v4216_v2  ;;  %vm101_vm14 = vcmp.eq.s32.totalorder %v4399_v28, %v4222_v4  ;;  %vm149_vm15 = vcmp.eq.s32.totalorder %v4402_v29, %v4222_v4 }
  0x17   :  { %3533 = vmatpush.msk.msra.mxu0 %vm109_vm0, %v6477_v13  ;;  %3549 = vmatpush.msk.msra.mxu1 %vm157_vm1, %v6477_v13  ;;  %vm97_vm0 = vcmp.eq.s32.totalorder %v4417_v30, %v4219_v3  ;;  %vm145_vm1 = vcmp.eq.s32.totalorder %v4420_v31, %v4219_v3  ;;  %v4453_v34 = vadd.s32 8, %v4216_v2  ;;  %v4456_v35 = vadd.s32 136, %v4216_v2 }
  0x18   :  { %3565 = vmatpush.msk.msra.mxu2 %vm110_vm2, %v6477_v13  ;;  %3581 = vmatpush.msk.msra.mxu3 %vm158_vm3, %v6477_v13  ;;  %vm98_vm2 = vcmp.eq.s32.totalorder %v4417_v30, %v4222_v4  ;;  %vm146_vm3 = vcmp.eq.s32.totalorder %v4420_v31, %v4222_v4  ;;  %v4471_v36 = vadd.s32 128, %v4216_v2  ;;  %v5025_v1 = vadd.s32 328, %v4216_v2 }
  0x19   :  { %3534 = vmatpush.msk.msra.mxu0 %vm106_vm4, %v6477_v13  ;;  %3550 = vmatpush.msk.msra.mxu1 %vm154_vm5, %v6477_v13  ;;  %vm94_vm4 = vcmp.eq.s32.totalorder %v4435_v32, %v4219_v3  ;;  %vm142_vm5 = vcmp.eq.s32.totalorder %v4438_v33, %v4219_v3 }
  0x1a   :  { %3566 = vmatpush.msk.msra.mxu2 %vm107_vm6, %v6477_v13  ;;  %3582 = vmatpush.msk.msra.mxu3 %vm155_vm7, %v6477_v13  ;;  %vm95_vm6 = vcmp.eq.s32.totalorder %v4435_v32, %v4222_v4  ;;  %vm143_vm7 = vcmp.eq.s32.totalorder %v4438_v33, %v4222_v4 }
  0x1b   :  { %3535 = vmatpush.msk.msra.mxu0 %vm103_vm8, %v6477_v13  ;;  %3551 = vmatpush.msk.msra.mxu1 %vm151_vm9, %v6477_v13  ;;  %vm91_vm8 = vcmp.eq.s32.totalorder %v4453_v34, %v4219_v3  ;;  %vm139_vm9 = vcmp.eq.s32.totalorder %v4456_v35, %v4219_v3 }
  0x1c   :  { %3567 = vmatpush.msk.msra.mxu2 %vm104_vm10, %v6477_v13  ;;  %3583 = vmatpush.msk.msra.mxu3 %vm152_vm11, %v6477_v13  ;;  %vm92_vm10 = vcmp.eq.s32.totalorder %v4453_v34, %v4222_v4  ;;  %vm140_vm11 = vcmp.eq.s32.totalorder %v4456_v35, %v4222_v4 }
  0x1d   :  { %3536 = vmatpush.msk.msra.mxu0 %vm100_vm12, %v6477_v13  ;;  %3552 = vmatpush.msk.msra.mxu1 %vm148_vm13, %v6477_v13  ;;  %vm88_vm12 = vcmp.eq.s32.totalorder %v4216_v2, %v4219_v3  ;;  %vm136_vm13 = vcmp.eq.s32.totalorder %v4471_v36, %v4219_v3 }
  0x1e   :  { %3568 = vmatpush.msk.msra.mxu2 %vm101_vm14, %v6477_v13  ;;  %3584 = vmatpush.msk.msra.mxu3 %vm149_vm15, %v6477_v13  ;;  %vm89_vm14 = vcmp.eq.s32.totalorder %v4216_v2, %v4222_v4  ;;  %vm137_vm15 = vcmp.eq.s32.totalorder %v4471_v36, %v4222_v4 }
  0x1f   :  { %3537 = vmatpush.msk.msra.mxu0 %vm97_vm0, %v6477_v13  ;;  %3553 = vmatpush.msk.msra.mxu1 %vm145_vm1, %v6477_v13  ;;  %vm135_vm0 = vcmp.eq.s32.totalorder %v4225_v5, %v4492_v37  ;;  %vm183_vm1 = vcmp.eq.s32.totalorder %v4228_v6, %v4492_v37 }
  0x20   :  { %3569 = vmatpush.msk.msra.mxu2 %vm98_vm2, %v6477_v13  ;;  %3585 = vmatpush.msk.msra.mxu3 %vm146_vm3, %v6477_v13  ;;  %vm132_vm2 = vcmp.eq.s32.totalorder %v4231_v7, %v4492_v37  ;;  %vm180_vm3 = vcmp.eq.s32.totalorder %v4234_v8, %v4492_v37 }
  0x21   :  { %3538 = vmatpush.msk.msra.mxu0 %vm94_vm4, %v6477_v13  ;;  %3554 = vmatpush.msk.msra.mxu1 %vm142_vm5, %v6477_v13  ;;  %vm129_vm4 = vcmp.eq.s32.totalorder %v4237_v9, %v4492_v37  ;;  %vm177_vm5 = vcmp.eq.s32.totalorder %v4240_v10, %v4492_v37 }
  0x22   :  { %3570 = vmatpush.msk.msra.mxu2 %vm95_vm6, %v6477_v13  ;;  %3586 = vmatpush.msk.msra.mxu3 %vm143_vm7, %v6477_v13  ;;  %vm126_vm6 = vcmp.eq.s32.totalorder %v4243_v11, %v4492_v37  ;;  %vm174_vm7 = vcmp.eq.s32.totalorder %v4246_v12, %v4492_v37 }
  0x23   :  { %3539 = vmatpush.msk.msra.mxu0 %vm91_vm8, %v6477_v13  ;;  %3555 = vmatpush.msk.msra.mxu1 %vm139_vm9, %v6477_v13  ;;  %vm123_vm8 = vcmp.eq.s32.totalorder %v4265_v14, %v4492_v37  ;;  %vm171_vm9 = vcmp.eq.s32.totalorder %v4276_v15, %v4492_v37 }
  0x24   :  { %3571 = vmatpush.msk.msra.mxu2 %vm92_vm10, %v6477_v13  ;;  %3587 = vmatpush.msk.msra.mxu3 %vm140_vm11, %v6477_v13  ;;  %vm120_vm10 = vcmp.eq.s32.totalorder %v4291_v16, %v4492_v37  ;;  %vm168_vm11 = vcmp.eq.s32.totalorder %v4294_v17, %v4492_v37 }
  0x25   :  { %3540 = vmatpush.msk.msra.mxu0 %vm88_vm12, %v6477_v13  ;;  %3556 = vmatpush.msk.msra.mxu1 %vm136_vm13, %v6477_v13  ;;  %vm117_vm12 = vcmp.eq.s32.totalorder %v4309_v18, %v4492_v37  ;;  %vm165_vm13 = vcmp.eq.s32.totalorder %v4312_v19, %v4492_v37 }
  0x26   :  { %3572 = vmatpush.msk.msra.mxu2 %vm89_vm14, %v6477_v13  ;;  %3588 = vmatpush.msk.msra.mxu3 %vm137_vm15, %v6477_v13  ;;  %vm114_vm14 = vcmp.eq.s32.totalorder %v4327_v20, %v4492_v37  ;;  %vm162_vm15 = vcmp.eq.s32.totalorder %v4330_v21, %v4492_v37 }
  0x27   :  { %434 = vmatmul.f32.vlgmr.msra.gmra.mxu2 %v4511_v38  ;;  %454 = vmatmul.f32.vlgmr.msra.gmra.mxu3 %v4516_v39 }
  0x28   :  { %3589 = vmatpush.msk.msrb.mxu0 %vm135_vm0, %v6477_v13  ;;  %3605 = vmatpush.msk.msrb.mxu1 %vm183_vm1, %v6477_v13  ;;  %vm111_vm0 = vcmp.eq.s32.totalorder %v4345_v22, %v4492_v37  ;;  %vm159_vm1 = vcmp.eq.s32.totalorder %v4348_v23, %v4492_v37 }
  0x29   :  { %394 = vmatmul.f32.vlgmr.msra.gmra.mxu0 %v4511_v38  ;;  %414 = vmatmul.f32.vlgmr.msra.gmra.mxu1 %v4516_v39 }
  0x2a   :  { %3590 = vmatpush.msk.msrb.mxu0 %vm132_vm2, %v6477_v13  ;;  %3606 = vmatpush.msk.msrb.mxu1 %vm180_vm3, %v6477_v13  ;;  %vm108_vm2 = vcmp.eq.s32.totalorder %v4363_v24, %v4492_v37  ;;  %vm156_vm3 = vcmp.eq.s32.totalorder %v4366_v25, %v4492_v37 }
  0x2c   :  { %3591 = vmatpush.msk.msrb.mxu0 %vm129_vm4, %v6477_v13  ;;  %3607 = vmatpush.msk.msrb.mxu1 %vm177_vm5, %v6477_v13  ;;  %vm105_vm4 = vcmp.eq.s32.totalorder %v4381_v26, %v4492_v37  ;;  %vm153_vm5 = vcmp.eq.s32.totalorder %v4384_v27, %v4492_v37 }
  0x2e   :  { %3592 = vmatpush.msk.msrb.mxu0 %vm126_vm6, %v6477_v13  ;;  %3608 = vmatpush.msk.msrb.mxu1 %vm174_vm7, %v6477_v13  ;;  %vm102_vm6 = vcmp.eq.s32.totalorder %v4399_v28, %v4492_v37  ;;  %vm150_vm7 = vcmp.eq.s32.totalorder %v4402_v29, %v4492_v37 }
  0x30   :  { %3593 = vmatpush.msk.msrb.mxu0 %vm123_vm8, %v6477_v13  ;;  %3609 = vmatpush.msk.msrb.mxu1 %vm171_vm9, %v6477_v13  ;;  %vm99_vm8 = vcmp.eq.s32.totalorder %v4417_v30, %v4492_v37  ;;  %vm147_vm9 = vcmp.eq.s32.totalorder %v4420_v31, %v4492_v37 }
  0x32   :  { %3594 = vmatpush.msk.msrb.mxu0 %vm120_vm10, %v6477_v13  ;;  %3610 = vmatpush.msk.msrb.mxu1 %vm168_vm11, %v6477_v13  ;;  %vm96_vm10 = vcmp.eq.s32.totalorder %v4435_v32, %v4492_v37  ;;  %vm144_vm11 = vcmp.eq.s32.totalorder %v4438_v33, %v4492_v37 }
  0x34   :  { %3595 = vmatpush.msk.msrb.mxu0 %vm117_vm12, %v6477_v13  ;;  %3611 = vmatpush.msk.msrb.mxu1 %vm165_vm13, %v6477_v13  ;;  %vm93_vm12 = vcmp.eq.s32.totalorder %v4453_v34, %v4492_v37  ;;  %vm141_vm13 = vcmp.eq.s32.totalorder %v4456_v35, %v4492_v37 }
  0x36   :  { %3596 = vmatpush.msk.msrb.mxu0 %vm114_vm14, %v6477_v13  ;;  %3612 = vmatpush.msk.msrb.mxu1 %vm162_vm15, %v6477_v13  ;;  %vm90_vm14 = vcmp.eq.s32.totalorder %v4216_v2, %v4492_v37  ;;  %vm138_vm15 = vcmp.eq.s32.totalorder %v4471_v36, %v4492_v37 }
  0x38   :  { %3597 = vmatpush.msk.msrb.mxu0 %vm111_vm0, %v6477_v13  ;;  %3613 = vmatpush.msk.msrb.mxu1 %vm159_vm1, %v6477_v13  ;;  %vm6497_vm0 = vcmask 1043456   ;;  %vm505_vm1 = vcmask 551936  }
  0x3a   :  { %3598 = vmatpush.msk.msrb.mxu0 %vm108_vm2, %v6477_v13  ;;  %3614 = vmatpush.msk.msrb.mxu1 %vm156_vm3, %v6477_v13  ;;  %vm527_vm2 = vcmask 1044000   ;;  %vm528_vm3 = vcmask 1047556  }
  0x3c   :  { %3599 = vmatpush.msk.msrb.mxu0 %vm105_vm4, %v6477_v13  ;;  %3615 = vmatpush.msk.msrb.mxu1 %vm153_vm5, %v6477_v13  ;;  %vm521_vm4 = vcmask 556032   ;;  %vm529_vm5 = vmor %vm528_vm3, %vm527_vm2  ;;  %vm897_vm2 = vcmask 293888   ;;  %vm596_vm3 = vcmask 801796  }
  0x3e   :  { %3600 = vmatpush.msk.msrb.mxu0 %vm102_vm6, %v6477_v13  ;;  %3616 = vmatpush.msk.msrb.mxu1 %vm150_vm7, %v6477_v13  ;;  %vm531_vm6 = vcmask 64516  }
  0x3f   :  { %vm532_vm7 = vmor %vm531_vm6, %vm6497_vm0 }
  0x40   :  { %3601 = vmatpush.msk.msrb.mxu0 %vm99_vm8, %v6477_v13  ;;  %3617 = vmatpush.msk.msrb.mxu1 %vm147_vm9, %v6477_v13  ;;  %vm582_vm8 = vcmask 1039360   ;;  %vm763_vm9 = vcmask 752640  }
  0x42   :  { %3602 = vmatpush.msk.msrb.mxu0 %vm96_vm10, %v6477_v13  ;;  %3618 = vmatpush.msk.msrb.mxu1 %vm144_vm11, %v6477_v13  ;;  %vm618_vm10 = vcmask 1031168   ;;  %vm559_vm11 = vcmask 797696  }
  0x44   :  { %3603 = vmatpush.msk.msrb.mxu0 %vm93_vm12, %v6477_v13  ;;  %3619 = vmatpush.msk.msrb.mxu1 %vm141_vm13, %v6477_v13  ;;  %vm654_vm12 = vcmask 900096   ;;  %vm689_vm13 = vcmask 891904  }
  0x46   :  { %3604 = vmatpush.msk.msrb.mxu0 %vm90_vm14, %v6477_v13  ;;  %3620 = vmatpush.msk.msrb.mxu1 %vm138_vm15, %v6477_v13  ;;  %vm725_vm14 = vcmask 883712   ;;  %vm803_vm15 = vcmask 744448  }
  0x47   :  { %474 = vmatmul.f32.vlgmr.msrb.gmra.mxu0 %v4511_v38  ;;  %494 = vmatmul.f32.vlgmr.msrb.gmra.mxu1 %v4516_v39 }
  0xa6   :  { %v395_v40 = vpop.f32.mrf.mxu0  ;;  %v415_v41 = vpop.f32.mrf.mxu1 }
  0xa7   :  { %v416_v42 = vadd.f32 %v415_v41, %v395_v40 }
  0xa9   :  { %508 = vst.sshfl [vmem:[#allocation1] sm:$0xff pattern:$0x75316420] %v416_v42 }
  0xaa   :  { %v435_v43 = vpop.f32.mrf.mxu2  ;;  %v455_v44 = vpop.f32.mrf.mxu3 }
  0xab   :  { %v456_v45 = vadd.f32 %v455_v44, %v435_v43 }
  0xad   :  { %v500_v46 = vrot.slane %v456_v45, 4  ;;  %509 = vst.sshfl [vmem:[#allocation1 + $0x8] sm:$0xff pattern:$0x75316420] %v456_v45 }
  0xaf   :  { %v502_v47 = vsel %vm6497_vm0, %v416_v42, %v500_v46 }
  0xb0   :  { %540 = vst [vmem:[#allocation1] ss:$2 sm:$0xff] %v502_v47 }
  0xb4   :  { %v512_v48 = vld [vmem:[#allocation1 + $0x1] ss:$2 sm:$0xff] }
  0xb5   :  { %515 = vrot.lane.b32.xlu0 %v512_v48, %s4110_s0 }
  0xb7   :  { %v545_v49 = vld.sshfl [vmem:[#allocation1] sm:$0xff pattern:$0x75316420]  ;;  %v546_v50 = vld.sshfl [vmem:[#allocation1 + $0x8] sm:$0xff pattern:$0x75316420] }
  0xb8   :  { %562 = vst [vmem:[#allocation1 + $0x1] ss:$2 sm:$0xff] %v502_v47 }
  0xb9   :  { %555 = vst [vmem:[#allocation3] sm:$0xf] %v545_v49 }
  0xba   :  { %556 = vst [vmem:[#allocation3 + $0x8] sm:$0xf] %v546_v50 }
  0xbf   :  { %v567_v51 = vld.sshfl [vmem:[#allocation1] sm:$0xff pattern:$0x75316420]  ;;  %v568_v52 = vld.sshfl [vmem:[#allocation1 + $0x8] sm:$0xff pattern:$0x75316420] }
  0xc0   :  { %574 = vrot.lane.b32.xlu1 %v568_v52, %s4111_s23  ;;  %598 = vst [vmem:[#allocation1] ss:$2 sm:$0xff] %v502_v47 }
  0xc4   :  { %v475_v53 = vpop.f32.mrf.mxu0  ;;  %v495_v54 = vpop.f32.mrf.mxu1 }
  0xc5   :  { %v496_v55 = vadd.f32 %v495_v54, %v475_v53 }
  0xc7   :  { %506 = vst.msk [vmem:[#allocation2 + $0x8] sm:$0xf] %vm505_vm1, %v496_v55  ;;  %v604_v56 = vld.sshfl [vmem:[#allocation1 + $0x8] sm:$0xff pattern:$0x75316420]  ;;  %vm842_vm1 = vcmask 736256  }
  0xc8   :  { %510 = vst.sshfl [vmem:[#allocation1 + $0x10] sm:$0xff pattern:$0x75316420] %v496_v55  ;;  %610 = vrot.lane.b32.xlu1 %v604_v56, %s4112_s24  ;;  %v603_v57 = vld.sshfl [vmem:[#allocation1] sm:$0xff pattern:$0x75316420] }
  0xc9   :  { %634 = vst [vmem:[#allocation1 + $0x1] ss:$2 sm:$0xff] %v502_v47 }
  0xcf   :  { %v514_v58 = vld [vmem:[#allocation1 + $0x11] ss:$2 sm:$0xff] }
  0xd0   :  { %517 = vrot.lane.b32.xlu0 %v514_v58, %s4110_s0  ;;  %v639_v59 = vld.sshfl [vmem:[#allocation1] sm:$0xff pattern:$0x75316420]  ;;  %v640_v60 = vld.sshfl [vmem:[#allocation1 + $0x8] sm:$0xff pattern:$0x75316420] }
  0xd1   :  { %644 = vrot.lane.b32.xlu2 %v639_v59, %s4113_s25  ;;  %669 = vst [vmem:[#allocation1] ss:$2 sm:$0xff] %v502_v47  ;;  %s4122_s0 = smov 107  }
  0xd8   :  { %572 = vrot.lane.b32.xlu0 %v567_v51, %s4111_s23  ;;  %v674_v61 = vld.sshfl [vmem:[#allocation1] sm:$0xff pattern:$0x75316420]  ;;  %v675_v62 = vld.sshfl [vmem:[#allocation1 + $0x8] sm:$0xff pattern:$0x75316420] }
  0xd9   :  { %681 = vrot.lane.b32.xlu1 %v675_v62, %s4114_s26  ;;  %705 = vst [vmem:[#allocation1 + $0x1] ss:$2 sm:$0xff] %v502_v47 }
  0xe0   :  { %608 = vrot.lane.b32.xlu0 %v603_v57, %s4112_s24  ;;  %v711_v63 = vld.sshfl [vmem:[#allocation1 + $0x8] sm:$0xff pattern:$0x75316420]  ;;  %v710_v0 = vld.sshfl [vmem:[#allocation1] sm:$0xff pattern:$0x75316420] }
  0xe1   :  { %715 = vrot.lane.b32.xlu2 %v710_v0, %s4115_s27  ;;  %740 = vst [vmem:[#allocation1] ss:$2 sm:$0xff] %v502_v47 }
  0xe8   :  { %646 = vrot.lane.b32.xlu0 %v640_v60, %s4113_s25  ;;  %v745_v3 = vld.sshfl [vmem:[#allocation1] sm:$0xff pattern:$0x75316420]  ;;  %v746_v4 = vld.sshfl [vmem:[#allocation1 + $0x8] sm:$0xff pattern:$0x75316420] }
  0xe9   :  { %751 = vrot.lane.b32.xlu2 %v745_v3, %s4116_s28  ;;  %780 = vst [vmem:[#allocation1 + $0x1] ss:$2 sm:$0xff] %v502_v47 }
  0xf0   :  { %679 = vrot.lane.b32.xlu0 %v674_v61, %s4114_s26  ;;  %v786_v37 = vld.sshfl [vmem:[#allocation1 + $0x8] sm:$0xff pattern:$0x75316420]  ;;  %v785_v38 = vld.sshfl [vmem:[#allocation1] sm:$0xff pattern:$0x75316420] }
  0xf1   :  { %753 = vrot.lane.b32.xlu2 %v746_v4, %s4116_s28  ;;  %793 = vrot.lane.b32.xlu1 %v786_v37, %s4117_s29  ;;  %819 = vst [vmem:[#allocation1] ss:$2 sm:$0xff] %v502_v47 }
  0xf8   :  { %717 = vrot.lane.b32.xlu0 %v711_v63, %s4115_s27  ;;  %v824_v39 = vld.sshfl [vmem:[#allocation1] sm:$0xff pattern:$0x75316420]  ;;  %v825_v40 = vld.sshfl [vmem:[#allocation1 + $0x8] sm:$0xff pattern:$0x75316420] }
  0xf9   :  { %830 = vrot.lane.b32.xlu1 %v824_v39, %s4118_s30 }
 0x100   :  { %791 = vrot.lane.b32.xlu0 %v785_v38, %s4117_s29 }
 0x101   :  { %832 = vrot.lane.b32.xlu1 %v825_v40, %s4118_s30 }
 0x127   :  { %v516_v41 = vpop.permute.xlu0 %515 }
 0x128   :  { %v519_v42 = vrot.slane %v516_v41, 4 }
 0x12a   :  { %v522_v43 = vsel %vm521_vm4, %v519_v42, %v516_v41 }
 0x12b   :  { %530 = vst.msk [vmem:[#allocation2 + $0x8] sm:$0xff] %vm529_vm5, %v522_v43  ;;  %v645_v45 = vpop.permute.xlu2 %644 }
 0x132   :  { %v4642_v44 = vld [vmem:[#allocation2 + $0x8] sm:$0xff]  ;;  %v4655_v56 = vpop.permute.xlu1 %574 }
 0x133   :  { %542 = vst [vmem:[#allocation1 + $0x10] ss:$2 sm:$0xff] %v4642_v44 }
 0x13a   :  { %v547_v46 = vld.sshfl [vmem:[#allocation1 + $0x10] sm:$0xff pattern:$0x75316420]  ;;  %v548_v47 = vld.sshfl [vmem:[#allocation1 + $0x18] sm:$0xff pattern:$0x75316420]  ;;  %v4669_v0 = vpop.permute.xlu1 %610 }
 0x13b   :  { %564 = vst [vmem:[#allocation1 + $0x11] ss:$2 sm:$0xff] %v4642_v44  ;;  %v4646_v48 = vpop.permute.xlu2 %715 }
 0x13c   :  { %557 = vst [vmem:[#allocation3 + $0x10] sm:$0xf] %v547_v46 }
 0x13d   :  { %558 = vst [vmem:[#allocation3 + $0x18] sm:$0xf] %v548_v47 }
 0x142   :  { %v518_v49 = vpop.permute.xlu0 %517  ;;  %v569_v50 = vld.sshfl [vmem:[#allocation1 + $0x10] sm:$0xff pattern:$0x75316420]  ;;  %v4648_v51 = vld.sshfl [vmem:[#allocation1 + $0x18] sm:$0xff pattern:$0x75316420] }
 0x143   :  { %v520_v52 = vrot.slane %v518_v49, 4  ;;  %600 = vst [vmem:[#allocation1 + $0x10] ss:$2 sm:$0xff] %v4642_v44  ;;  %576 = vrot.lane.b32.xlu1 %v569_v50, %s4111_s23  ;;  %v752_v53 = vpop.permute.xlu2 %751 }
 0x145   :  { %v523_v54 = vsel %vm6497_vm0, %v519_v42, %v520_v52 }
 0x146   :  { %v524_v55 = vsel %vm521_vm4, %v523_v54, %v518_v49 }
 0x147   :  { %533 = vst.msk [vmem:[#allocation2 + $0x10] sm:$0xff] %vm532_vm7, %v524_v55 }
 0x14a   :  { %v573_v57 = vpop.permute.xlu0 %572  ;;  %v605_v58 = vld.sshfl [vmem:[#allocation1 + $0x10] sm:$0xff pattern:$0x75316420]  ;;  %v606_v59 = vld.sshfl [vmem:[#allocation1 + $0x18] sm:$0xff pattern:$0x75316420] }
 0x14b   :  { %v583_v60 = vsel %vm582_vm8, %v573_v57, %v4655_v56  ;;  %612 = vrot.lane.b32.xlu2 %v605_v58, %s4112_s24  ;;  %636 = vst [vmem:[#allocation1 + $0x11] ss:$2 sm:$0xff] %v4642_v44  ;;  %614 = vrot.lane.b32.xlu1 %v606_v59, %s4112_s24  ;;  %v4662_v61 = vpop.permute.xlu2 %753  ;;  %v4685_v46 = vpop.permute.xlu1 %681 }
 0x14c   :  { %592 = vst [vmem:[#allocation3] sm:$0xf0] %v583_v60  ;;  %v764_v62 = vsel %vm763_vm9, %v752_v53, %v4662_v61 }
 0x14d   :  { %774 = vst [vmem:[#allocation3 + $0x78] sm:$0xf] %v764_v62 }
 0x14e   :  { %v4666_v63 = vld [vmem:[#allocation2 + $0x10] sm:$0xff] }
 0x14f   :  { %544 = vst [vmem:[#allocation1 + $0x20] ss:$2 sm:$0xff] %v4666_v63 }
 0x152   :  { %v609_v3 = vpop.permute.xlu0 %608  ;;  %v642_v4 = vld.sshfl [vmem:[#allocation1 + $0x18] sm:$0xff pattern:$0x75316420]  ;;  %v641_v37 = vld.sshfl [vmem:[#allocation1 + $0x10] sm:$0xff pattern:$0x75316420] }
 0x153   :  { %v619_v38 = vsel %vm618_vm10, %v609_v3, %v4669_v0  ;;  %650 = vrot.lane.b32.xlu2 %v642_v4, %s4113_s25  ;;  %671 = vst [vmem:[#allocation1 + $0x10] ss:$2 sm:$0xff] %v4642_v44  ;;  %648 = vrot.lane.b32.xlu0 %v641_v37, %s4113_s25 }
 0x154   :  { %628 = vst [vmem:[#allocation3 + $0x28] sm:$0xf] %v619_v38 }
 0x156   :  { %v549_v39 = vld.sshfl [vmem:[#allocation1 + $0x20] sm:$0xff pattern:$0x75316420] }
 0x157   :  { %566 = vst [vmem:[#allocation1 + $0x21] ss:$2 sm:$0xff] %v4666_v63 }
 0x158   :  { %560 = vst.msk [vmem:[#allocation3 + $0x20] sm:$0xf] %vm559_vm11, %v549_v39 }
 0x15a   :  { %v4678_v40 = vpop.permute.xlu0 %646  ;;  %v677_v41 = vld.sshfl [vmem:[#allocation1 + $0x18] sm:$0xff pattern:$0x75316420]  ;;  %v676_v42 = vld.sshfl [vmem:[#allocation1 + $0x10] sm:$0xff pattern:$0x75316420] }
 0x15b   :  { %v655_v43 = vsel %vm654_vm12, %v645_v45, %v4678_v40  ;;  %685 = vrot.lane.b32.xlu0 %v677_v41, %s4114_s26  ;;  %683 = vrot.lane.b32.xlu1 %v676_v42, %s4114_s26  ;;  %707 = vst [vmem:[#allocation1 + $0x11] ss:$2 sm:$0xff] %v4642_v44 }
 0x15c   :  { %664 = vst [vmem:[#allocation3 + $0x28] sm:$0xf0] %v655_v43 }
 0x15e   :  { %v4687_v47 = vld.sshfl [vmem:[#allocation1 + $0x20] sm:$0xff pattern:$0x75316420] }
 0x15f   :  { %602 = vst [vmem:[#allocation1 + $0x20] ss:$2 sm:$0xff] %v4666_v63 }
 0x162   :  { %v680_v49 = vpop.permute.xlu0 %679  ;;  %v712_v50 = vld.sshfl [vmem:[#allocation1 + $0x10] sm:$0xff pattern:$0x75316420]  ;;  %v713_v52 = vld.sshfl [vmem:[#allocation1 + $0x18] sm:$0xff pattern:$0x75316420] }
 0x163   :  { %v690_v45 = vsel %vm689_vm13, %v680_v49, %v4685_v46  ;;  %719 = vrot.lane.b32.xlu2 %v712_v50, %s4115_s27  ;;  %721 = vrot.lane.b32.xlu1 %v713_v52, %s4115_s27  ;;  %742 = vst [vmem:[#allocation1 + $0x10] ss:$2 sm:$0xff] %v4642_v44  ;;  %v4695_v53 = vpop.permute.xlu1 %793  ;;  %v865_v49 = vld [vmem:[#allocation3 + $0x28] sm:$0xff]  ;;  %v860_v50 = vld [vmem:[#allocation3] sm:$0xff] }
 0x164   :  { %699 = vst [vmem:[#allocation3 + $0x50] sm:$0xf] %v690_v45 }
 0x166   :  { %v607_v54 = vld.sshfl [vmem:[#allocation1 + $0x20] sm:$0xff pattern:$0x75316420] }
 0x167   :  { %638 = vst [vmem:[#allocation1 + $0x21] ss:$2 sm:$0xff] %v4666_v63 }
 0x16a   :  { %v4698_v55 = vpop.permute.xlu0 %717  ;;  %v747_v57 = vld.sshfl [vmem:[#allocation1 + $0x10] sm:$0xff pattern:$0x75316420]  ;;  %v748_v58 = vld.sshfl [vmem:[#allocation1 + $0x18] sm:$0xff pattern:$0x75316420] }
 0x16b   :  { %v726_v59 = vsel %vm725_vm14, %v4646_v48, %v4698_v55  ;;  %578 = vrot.lane.b32.xlu2 %v4648_v51, %s4111_s23  ;;  %755 = vrot.lane.b32.xlu1 %v747_v57, %s4116_s28  ;;  %782 = vst [vmem:[#allocation1 + $0x11] ss:$2 sm:$0xff] %v4642_v44  ;;  %v831_v60 = vpop.permute.xlu1 %830 }
 0x16c   :  { %735 = vst [vmem:[#allocation3 + $0x50] sm:$0xf0] %v726_v59 }
 0x16e   :  { %v643_v62 = vld.sshfl [vmem:[#allocation1 + $0x20] sm:$0xff pattern:$0x75316420] }
 0x16f   :  { %673 = vst [vmem:[#allocation1 + $0x20] ss:$2 sm:$0xff] %v4666_v63 }
 0x172   :  { %v792_v3 = vpop.permute.xlu0 %791  ;;  %v788_v4 = vld.sshfl [vmem:[#allocation1 + $0x18] sm:$0xff pattern:$0x75316420]  ;;  %v787_v37 = vld.sshfl [vmem:[#allocation1 + $0x10] sm:$0xff pattern:$0x75316420] }
 0x173   :  { %v804_v48 = vsel %vm803_vm15, %v792_v3, %v4695_v53  ;;  %821 = vst [vmem:[#allocation1 + $0x10] ss:$2 sm:$0xff] %v4642_v44  ;;  %v4711_v51 = vpop.permute.xlu1 %832  ;;  %v870_v43 = vld [vmem:[#allocation3 + $0x50] sm:$0xff] }
 0x174   :  { %814 = vst [vmem:[#allocation3 + $0x78] sm:$0xf0] %v804_v48  ;;  %v843_v38 = vsel %vm842_vm1, %v831_v60, %v4711_v51 }
 0x175   :  { %853 = vst [vmem:[#allocation3 + $0xa0] sm:$0xf] %v843_v38 }
 0x176   :  { %v678_v39 = vld.sshfl [vmem:[#allocation1 + $0x20] sm:$0xff pattern:$0x75316420] }
 0x177   :  { %709 = vst [vmem:[#allocation1 + $0x21] ss:$2 sm:$0xff] %v4666_v63  ;;  %687 = vrot.lane.b32.xlu0 %v678_v39, %s4114_s26  ;;  %s4124_s26 = smov 118  }
 0x17a   :  { %v826_v59 = vld.sshfl [vmem:[#allocation1 + $0x10] sm:$0xff pattern:$0x75316420]  ;;  %v827_v60 = vld.sshfl [vmem:[#allocation1 + $0x18] sm:$0xff pattern:$0x75316420] }
 0x17b   :  { %v875_v44 = vld [vmem:[#allocation3 + $0x78] sm:$0xff] }
 0x17c   :  { %v880_v41 = vld [vmem:[#allocation3 + $0xa0] sm:$0xf] }
 0x17d   :  { %3621 = vmatpush.msk.msrb.mxu2 %vm6497_vm0, %v880_v41 }
 0x17e   :  { %v714_v42 = vld.sshfl [vmem:[#allocation1 + $0x20] sm:$0xff pattern:$0x75316420] }
 0x17f   :  { %757 = vrot.lane.b32.xlu0 %v748_v58, %s4116_s28  ;;  %744 = vst [vmem:[#allocation1 + $0x20] ss:$2 sm:$0xff] %v4666_v63  ;;  %723 = vrot.lane.b32.xlu1 %v714_v42, %s4115_s27 }
 0x180   :  { %931 = vmatpush.msrb.mxu2 %v875_v44 }
 0x182   :  { %932 = vmatpush.msrb.mxu2 %v870_v43 }
 0x184   :  { %933 = vmatpush.msrb.mxu2 %v865_v49 }
 0x186   :  { %v750_v52 = vld.sshfl [vmem:[#allocation1 + $0x28] sm:$0xff pattern:$0x75316420]  ;;  %v749_v45 = vld.sshfl [vmem:[#allocation1 + $0x20] sm:$0xff pattern:$0x75316420]  ;;  %934 = vmatpush.msrb.mxu2 %v860_v50 }
 0x187   :  { %784 = vst [vmem:[#allocation1 + $0x21] ss:$2 sm:$0xff] %v4666_v63  ;;  %759 = vrot.lane.b32.xlu2 %v749_v45, %s4116_s28  ;;  %797 = vrot.lane.b32.xlu1 %v788_v4, %s4117_s29 }
 0x18e   :  { %v790_v57 = vld.sshfl [vmem:[#allocation1 + $0x28] sm:$0xff pattern:$0x75316420]  ;;  %v789_v58 = vld.sshfl [vmem:[#allocation1 + $0x20] sm:$0xff pattern:$0x75316420] }
 0x18f   :  { %795 = vrot.lane.b32.xlu2 %v787_v37, %s4117_s29  ;;  %799 = vrot.lane.b32.xlu0 %v789_v58, %s4117_s29  ;;  %823 = vst [vmem:[#allocation1 + $0x20] ss:$2 sm:$0xff] %v4666_v63 }
 0x190   :  { %652 = vrot.lane.b32.xlu1 %v643_v62, %s4113_s25 }
 0x196   :  { %v829_v3 = vld.sshfl [vmem:[#allocation1 + $0x28] sm:$0xff pattern:$0x75316420]  ;;  %v828_v37 = vld.sshfl [vmem:[#allocation1 + $0x20] sm:$0xff pattern:$0x75316420] }
 0x197   :  { %834 = vrot.lane.b32.xlu2 %v826_v59, %s4118_s30  ;;  %616 = vrot.lane.b32.xlu0 %v607_v54, %s4112_s24 }
 0x198   :  { %761 = vrot.lane.b32.xlu1 %v750_v52, %s4116_s28 }
 0x19f   :  { %836 = vrot.lane.b32.xlu2 %v827_v60, %s4118_s30  ;;  %840 = vrot.lane.b32.xlu0 %v829_v3, %s4118_s30  ;;  %v4768_v60 = vld [vmem:[%s6460_s2] sm:$0xff] }
 0x1a0   :  { %3622 = vmatmul.msk.f32.vlgmr.msrb.gmra.mxu2 %vm897_vm2, %v4768_v60 }
 0x1a5   :  { %v613_v4 = vpop.permute.xlu2 %612 }
 0x1a6   :  { %v620_v63 = vsel %vm618_vm10, %v4669_v0, %v613_v4 }
 0x1a7   :  { %838 = vrot.lane.b32.xlu2 %v828_v37, %s4118_s30  ;;  %629 = vst [vmem:[#allocation3 + $0x30] sm:$0xf] %v620_v63  ;;  %s4128_s30 = smov 64  }
 0x1ad   :  { %v4738_v54 = vpop.permute.xlu2 %650 }
 0x1af   :  { %580 = vrot.lane.b32.xlu2 %v4687_v47, %s4111_s23 }
 0x1b5   :  { %v577_v62 = vpop.permute.xlu1 %576 }
 0x1b6   :  { %v584_v48 = vsel %vm582_vm8, %v4655_v56, %v577_v62 }
 0x1b7   :  { %801 = vrot.lane.b32.xlu2 %v790_v57, %s4117_s29  ;;  %593 = vst [vmem:[#allocation3 + $0x8] sm:$0xf0] %v584_v48  ;;  %s4127_s29 = smov 96  }
 0x1bd   :  { %v720_v38 = vpop.permute.xlu2 %719  ;;  %v4743_v39 = vpop.permute.xlu1 %614 }
 0x1be   :  { %v727_v0 = vsel %vm725_vm14, %v4698_v55, %v720_v38  ;;  %v621_v41 = vsel %vm618_vm10, %v613_v4, %v4743_v39 }
 0x1bf   :  { %736 = vst [vmem:[#allocation3 + $0x58] sm:$0xf0] %v727_v0 }
 0x1c0   :  { %630 = vst [vmem:[#allocation3 + $0x38] sm:$0xf] %v621_v41 }
 0x1c5   :  { %v4749_v47 = vpop.permute.xlu2 %578  ;;  %v649_v42 = vpop.permute.xlu0 %648 }
 0x1c6   :  { %v585_v56 = vsel %vm582_vm8, %v577_v62, %v4749_v47  ;;  %v656_v44 = vsel %vm654_vm12, %v4678_v40, %v649_v42  ;;  %v657_v43 = vsel %vm654_vm12, %v649_v42, %v4738_v54  ;;  %v885_v42 = vld [vmem:[%s6461_s3] sm:$0xff] }
 0x1c7   :  { %594 = vst [vmem:[#allocation3 + $0x10] sm:$0xf0] %v585_v56  ;;  %v4119_v56 = vmov 0  }
 0x1c8   :  { %665 = vst [vmem:[#allocation3 + $0x30] sm:$0xf0] %v656_v44  ;;  %4033 = vset.pattern.permute.xlu0 %v4119_v56  ;;  %4034 = vset.pattern.permute.xlu1 %v4119_v56 }
 0x1c9   :  { %666 = vst [vmem:[#allocation3 + $0x38] sm:$0xf0] %v657_v43  ;;  %889 = vperm.xlu0 %4033, %v885_v42   ;;  %4070 = vset.pattern.permute.xlu2 %v4119_v56 }
 0x1cd   :  { %v686_v55 = vpop.permute.xlu0 %685  ;;  %v684_v49 = vpop.permute.xlu1 %683 }
 0x1ce   :  { %v691_v50 = vsel %vm689_vm13, %v4685_v46, %v684_v49  ;;  %v692_v52 = vsel %vm689_vm13, %v684_v49, %v686_v55 }
 0x1cf   :  { %700 = vst [vmem:[#allocation3 + $0x58] sm:$0xf] %v691_v50 }
 0x1d0   :  { %701 = vst [vmem:[#allocation3 + $0x60] sm:$0xf] %v692_v52  ;;  %v886_v52 = vld [vmem:[%s6461_s3 + $0x8] sm:$0xff] }
 0x1d1   :  { %894 = vperm.xlu1 %4034, %v886_v52  }
 0x1d5   :  { %v722_v45 = vpop.permute.xlu1 %721 }
 0x1d6   :  { %v728_v57 = vsel %vm725_vm14, %v720_v38, %v722_v45 }
 0x1d7   :  { %737 = vst [vmem:[#allocation3 + $0x60] sm:$0xf0] %v728_v57  ;;  %v866_v57 = vld [vmem:[#allocation3 + $0x30] sm:$0xff] }
 0x1dd   :  { %v756_v40 = vpop.permute.xlu1 %755 }
 0x1de   :  { %v765_v58 = vsel %vm763_vm9, %v4662_v61, %v756_v40  ;;  %v4779_v61 = vld [vmem:[%s6460_s2 + $0x8] sm:$0xff] }
 0x1df   :  { %775 = vst [vmem:[#allocation3 + $0x80] sm:$0xf] %v765_v58  ;;  %3623 = vmatmul.msk.f32.gmra.mxu2 %vm897_vm2, %v4779_v61 }
 0x1e1   :  { %v4763_v59 = vpop.permute.xlu2 %759 }
 0x1e9   :  { %v796_v46 = vpop.permute.xlu2 %795  ;;  %v688_v3 = vpop.permute.xlu0 %687 }
 0x1ea   :  { %v805_v4 = vsel %vm803_vm15, %v4695_v53, %v796_v46  ;;  %v693_v37 = vsel %vm689_vm13, %v686_v55, %v688_v3  ;;  %703 = vst.msk [vmem:[#allocation3 + $0x70] sm:$0xf] %vm559_vm11, %v688_v3 }
 0x1eb   :  { %815 = vst [vmem:[#allocation3 + $0x80] sm:$0xf0] %v805_v4 }
 0x1ec   :  { %702 = vst [vmem:[#allocation3 + $0x68] sm:$0xf] %v693_v37  ;;  %v861_v37 = vld [vmem:[#allocation3 + $0x8] sm:$0xff] }
 0x1f1   :  { %v835_v63 = vpop.permute.xlu2 %834  ;;  %v758_v62 = vpop.permute.xlu0 %757 }
 0x1f2   :  { %v844_v48 = vsel %vm842_vm1, %v4711_v51, %v835_v63  ;;  %v766_v53 = vsel %vm763_vm9, %v756_v40, %v758_v62  ;;  %v767_v38 = vsel %vm763_vm9, %v758_v62, %v4763_v59  ;;  %v724_v0 = vpop.permute.xlu1 %723  ;;  %v876_v50 = vld [vmem:[#allocation3 + $0x80] sm:$0xff] }
 0x1f3   :  { %854 = vst [vmem:[#allocation3 + $0xa8] sm:$0xf] %v844_v48  ;;  %v729_v41 = vsel %vm725_vm14, %v722_v45, %v724_v0  ;;  %v871_v45 = vld [vmem:[#allocation3 + $0x58] sm:$0xff] }
 0x1f4   :  { %776 = vst [vmem:[#allocation3 + $0x88] sm:$0xf] %v766_v53  ;;  %v872_v53 = vld [vmem:[#allocation3 + $0x60] sm:$0xff] }
 0x1f5   :  { %777 = vst [vmem:[#allocation3 + $0x90] sm:$0xf] %v767_v38  ;;  %v867_v38 = vld [vmem:[#allocation3 + $0x38] sm:$0xff] }
 0x1f6   :  { %738 = vst [vmem:[#allocation3 + $0x68] sm:$0xf0] %v729_v41 }
 0x1f7   :  { %739 = vst.msk [vmem:[#allocation3 + $0x70] sm:$0xf0] %vm596_vm3, %v724_v0 }
 0x1f9   :  { %v837_v51 = vpop.permute.xlu2 %836 }
 0x1fa   :  { %v845_v44 = vsel %vm842_vm1, %v835_v63, %v837_v51  ;;  %v798_v43 = vpop.permute.xlu1 %797  ;;  %v881_v55 = vld [vmem:[#allocation3 + $0xa8] sm:$0xf] }
 0x1fb   :  { %855 = vst [vmem:[#allocation3 + $0xb0] sm:$0xf] %v845_v44  ;;  %v806_v49 = vsel %vm803_vm15, %v796_v46, %v798_v43  ;;  %3624 = vmatpush.msk.msrb.mxu3 %vm6497_vm0, %v881_v55 }
 0x1fc   :  { %816 = vst [vmem:[#allocation3 + $0x88] sm:$0xf0] %v806_v49 }
 0x1fd   :  { %954 = vmatpush.msrb.mxu3 %v876_v50 }
 0x1ff   :  { %955 = vmatpush.msrb.mxu3 %v871_v45 }
 0x201   :  { %v839_v40 = vpop.permute.xlu2 %838  ;;  %v800_v58 = vpop.permute.xlu0 %799  ;;  %956 = vmatpush.msrb.mxu3 %v866_v57 }
 0x202   :  { %v846_v3 = vsel %vm842_vm1, %v837_v51, %v839_v40  ;;  %v807_v46 = vsel %vm803_vm15, %v798_v43, %v800_v58  ;;  %v653_v4 = vpop.permute.xlu1 %652  ;;  %v882_v63 = vld [vmem:[#allocation3 + $0xb0] sm:$0xf] }
 0x203   :  { %856 = vst [vmem:[#allocation3 + $0xb8] sm:$0xf] %v846_v3  ;;  %v658_v62 = vsel %vm654_vm12, %v4738_v54, %v653_v4  ;;  %957 = vmatpush.msrb.mxu3 %v861_v37  ;;  %3627 = vmatpush.msk.msra.mxu2 %vm6497_vm0, %v882_v63  ;;  %v877_v48 = vld [vmem:[#allocation3 + $0x88] sm:$0xff]  ;;  %v862_v51 = vld [vmem:[#allocation3 + $0x10] sm:$0xff] }
 0x204   :  { %817 = vst [vmem:[#allocation3 + $0x90] sm:$0xf0] %v807_v46  ;;  %3625 = vmatmul.msk.f32.vlgmr.msrb.gmra.mxu3 %vm897_vm2, %v4768_v60 }
 0x205   :  { %667 = vst [vmem:[#allocation3 + $0x40] sm:$0xf0] %v658_v62  ;;  %977 = vmatpush.msra.mxu2 %v877_v48 }
 0x206   :  { %668 = vst.msk [vmem:[#allocation3 + $0x48] sm:$0xf0] %vm596_vm3, %v653_v4 }
 0x207   :  { %978 = vmatpush.msra.mxu2 %v872_v53 }
 0x209   :  { %v581_v0 = vpop.permute.xlu2 %580  ;;  %v617_v41 = vpop.permute.xlu0 %616  ;;  %979 = vmatpush.msra.mxu2 %v867_v38 }
 0x20a   :  { %v586_v54 = vsel %vm582_vm8, %v4749_v47, %v581_v0  ;;  %597 = vst.msk [vmem:[#allocation3 + $0x20] sm:$0xf0] %vm596_vm3, %v581_v0  ;;  %v622_v42 = vsel %vm618_vm10, %v4743_v39, %v617_v41  ;;  %v762_v56 = vpop.permute.xlu1 %761  ;;  %v883_v44 = vld [vmem:[#allocation3 + $0xb8] sm:$0xf]  ;;  %v873_v39 = vld [vmem:[#allocation3 + $0x68] sm:$0xff] }
 0x20b   :  { %595 = vst [vmem:[#allocation3 + $0x18] sm:$0xf0] %v586_v54  ;;  %v768_v43 = vsel %vm763_vm9, %v4763_v59, %v762_v56  ;;  %980 = vmatpush.msra.mxu2 %v862_v51  ;;  %3630 = vmatpush.msk.msra.mxu3 %vm6497_vm0, %v883_v44  ;;  %v878_v47 = vld [vmem:[#allocation3 + $0x90] sm:$0xff] }
 0x20c   :  { %631 = vst [vmem:[#allocation3 + $0x40] sm:$0xf] %v622_v42  ;;  %3626 = vmatmul.msk.f32.gmra.mxu3 %vm897_vm2, %v4779_v61  ;;  %3628 = vmatmul.msk.f32.vlgmr.msra.gmra.mxu2 %vm897_vm2, %v4768_v60 }
 0x20d   :  { %632 = vst.msk [vmem:[#allocation3 + $0x48] sm:$0xf] %vm559_vm11, %v617_v41  ;;  %1000 = vmatpush.msra.mxu3 %v878_v47 }
 0x20e   :  { %778 = vst.msk [vmem:[#allocation3 + $0x98] sm:$0xf] %vm559_vm11, %v768_v43 }
 0x20f   :  { %1001 = vmatpush.msra.mxu3 %v873_v39 }
 0x211   :  { %v802_v55 = vpop.permute.xlu2 %801  ;;  %v841_v59 = vpop.permute.xlu0 %840  ;;  %v864_v46 = vld [vmem:[#allocation3 + $0x20] sm:$0xff] }
 0x212   :  { %v808_v49 = vsel %vm803_vm15, %v800_v58, %v802_v55  ;;  %v847_v50 = vsel %vm842_vm1, %v839_v40, %v841_v59  ;;  %v863_v45 = vld [vmem:[#allocation3 + $0x18] sm:$0xff]  ;;  %v874_v40 = vld [vmem:[#allocation3 + $0x70] sm:$0xff] }
 0x213   :  { %818 = vst.msk [vmem:[#allocation3 + $0x98] sm:$0xf0] %vm596_vm3, %v808_v49  ;;  %v868_v52 = vld [vmem:[#allocation3 + $0x40] sm:$0xff] }
 0x214   :  { %857 = vst.msk [vmem:[#allocation3 + $0xc0] sm:$0xf] %vm559_vm11, %v847_v50  ;;  %1002 = vmatpush.msra.mxu3 %v868_v52  ;;  %3629 = vmatmul.msk.f32.gmra.mxu2 %vm897_vm2, %v4779_v61  ;;  %v869_v3 = vld [vmem:[#allocation3 + $0x48] sm:$0xff] }
 0x216   :  { %1003 = vmatpush.msra.mxu3 %v863_v45 }
 0x217   :  { %3631 = vmatmul.msk.f32.vlgmr.msra.gmra.mxu3 %vm897_vm2, %v4768_v60 }
 0x21a   :  { %v879_v58 = vld [vmem:[#allocation3 + $0x98] sm:$0xff] }
 0x21b   :  { %v884_v57 = vld [vmem:[#allocation3 + $0xc0] sm:$0xf] }
 0x21c   :  { %3633 = vmatpush.msk.msrb.mxu2 %vm6497_vm0, %v884_v57 }
 0x21e   :  { %1023 = vmatpush.msrb.mxu2 %v879_v58 }
 0x21f   :  { %3632 = vmatmul.msk.f32.gmra.mxu3 %vm897_vm2, %v4779_v61 }
 0x220   :  { %1024 = vmatpush.msrb.mxu2 %v874_v40 }
 0x222   :  { %1025 = vmatpush.msrb.mxu2 %v869_v3 }
 0x223   :  { %v936_v4 = vpop.f32.mrf.mxu2 }
 0x224   :  { %1026 = vmatpush.msrb.mxu2 %v864_v46 }
 0x225   :  { %3634 = vmatmul.msk.f32.vlgmr.msrb.gmra.mxu2 %vm897_vm2, %v4768_v60 }
 0x22d   :  { %3635 = vmatmul.msk.f32.gmra.mxu2 %vm897_vm2, %v4779_v61 }
 0x23b   :  { %v890_v37 = vpop.permute.xlu0 %889 }
 0x23c   :  { %v937_v63 = vadd.f32 %v936_v4, %v890_v37 }
 0x23e   :  { %v1044_v62 = vmul.f32 0.01, %v937_v63  ;;  %vm1034_vm4 = vcmp.ge.f32.partialorder %v937_v63, 0.0 }
 0x240   :  { %v4836_v42 = vsel %vm1034_vm4, %v937_v63, %v1044_v62 }
 0x243   :  { %v895_v48 = vpop.permute.xlu1 %894 }
 0x262   :  { %v939_v38 = vpop.f32.mrf.mxu2 }
 0x263   :  { %v940_v54 = vadd.f32 %v939_v38, %v895_v48 }
 0x265   :  { %v1049_v61 = vmul.f32 0.01, %v940_v54  ;;  %vm1039_vm6 = vcmp.ge.f32.partialorder %v940_v54, 0.0 }
 0x267   :  { %v1059_v39 = vsel %vm1039_vm6, %v940_v54, %v1049_v61 }
 0x287   :  { %v959_v53 = vpop.f32.mrf.mxu3 }
 0x288   :  { %v960_v0 = vadd.f32 %v959_v53, %v890_v37 }
 0x28a   :  { %vm1035_vm5 = vcmp.ge.f32.partialorder %v960_v0, 0.0  ;;  %v1045_v41 = vmul.f32 0.01, %v960_v0 }
 0x28c   :  { %v4838_v56 = vsel %vm1035_vm5, %v960_v0, %v1045_v41 }
 0x28d   :  { %v4035_v60 = vpack.i.bf16 %v4838_v56, %v4836_v42 }
 0x28f   :  { %v962_v51 = vpop.f32.mrf.mxu3  ;;  %4036 = vrot.lane.b32.xlu2 %v4035_v60, %s4113_s25  ;;  %v982_v43 = vpop.f32.mrf.mxu2 }
 0x290   :  { %v963_v44 = vadd.f32 %v962_v51, %v895_v48  ;;  %v983_v49 = vadd.f32 %v982_v43, %v890_v37 }
 0x292   :  { %vm1040_vm7 = vcmp.ge.f32.partialorder %v963_v44, 0.0  ;;  %v1050_v47 = vmul.f32 0.01, %v963_v44  ;;  %v1046_v52 = vmul.f32 0.01, %v983_v49  ;;  %vm1036_vm9 = vcmp.ge.f32.partialorder %v983_v49, 0.0 }
 0x294   :  { %v4843_v55 = vsel %vm1040_vm7, %v963_v44, %v1050_v47  ;;  %v4847_v3 = vsel %vm1036_vm9, %v983_v49, %v1046_v52 }
 0x295   :  { %v4045_v59 = vpack.i.bf16 %v4843_v55, %v1059_v39 }
 0x297   :  { %4046 = vrot.lane.b32.xlu2 %v4045_v59, %s4113_s25  ;;  %v985_v57 = vpop.f32.mrf.mxu2 }
 0x298   :  { %v986_v40 = vadd.f32 %v985_v57, %v895_v48 }
 0x29a   :  { %v1005_v50 = vpop.f32.mrf.mxu3  ;;  %v1051_v63 = vmul.f32 0.01, %v986_v40  ;;  %vm1041_vm13 = vcmp.ge.f32.partialorder %v986_v40, 0.0 }
 0x29b   :  { %v1006_v45 = vadd.f32 %v1005_v50, %v890_v37 }
 0x29c   :  { %v4854_v0 = vsel %vm1041_vm13, %v986_v40, %v1051_v63 }
 0x29d   :  { %vm1037_vm11 = vcmp.ge.f32.partialorder %v1006_v45, 0.0  ;;  %v1047_v58 = vmul.f32 0.01, %v1006_v45 }
 0x29f   :  { %v4849_v46 = vsel %vm1037_vm11, %v1006_v45, %v1047_v58 }
 0x2a0   :  { %v4040_v4 = vpack.i.bf16 %v4849_v46, %v4847_v3 }
 0x2a2   :  { %v1008_v62 = vpop.f32.mrf.mxu3  ;;  %4041 = vrot.lane.b32.xlu1 %v4040_v4, %s4113_s25 }
 0x2a3   :  { %v1009_v53 = vadd.f32 %v1008_v62, %v895_v48  ;;  %v4886_v62 = vadd.s32 376, %v4216_v2 }
 0x2a5   :  { %vm1042_vm15 = vcmp.ge.f32.partialorder %v1009_v53, 0.0  ;;  %v1052_v38 = vmul.f32 0.01, %v1009_v53 }
 0x2a7   :  { %v4856_v41 = vsel %vm1042_vm15, %v1009_v53, %v1052_v38  ;;  %v4889_v53 = vadd.s32 504, %v4216_v2  ;;  %v4892_v38 = vadd.s32 368, %v4216_v2 }
 0x2a8   :  { %v1028_v54 = vpop.f32.mrf.mxu2  ;;  %v4050_v60 = vpack.i.bf16 %v4856_v41, %v4854_v0 }
 0x2a9   :  { %v1029_v61 = vadd.f32 %v1028_v54, %v890_v37  ;;  %v4895_v54 = vadd.s32 496, %v4216_v2 }
 0x2aa   :  { %4051 = vrot.lane.b32.xlu0 %v4050_v60, %s4113_s25 }
 0x2ab   :  { %v1048_v51 = vmul.f32 0.01, %v1029_v61  ;;  %vm1038_vm1 = vcmp.ge.f32.partialorder %v1029_v61, 0.0 }
 0x2ad   :  { %v4861_v44 = vsel %vm1038_vm1, %v1029_v61, %v1048_v51  ;;  %v4917_v51 = vadd.s32 360, %v4216_v2 }
 0x2ae   :  { %1082 = vrot.lane.b32.xlu1 %v4861_v44, %s4113_s25 }
 0x2b0   :  { %v1031_v43 = vpop.f32.mrf.mxu2 }
 0x2b1   :  { %v1032_v47 = vadd.f32 %v1031_v43, %v895_v48  ;;  %v4876_v48 = vld [vmem:[%s6462_s4] sm:$0x3]  ;;  %v4920_v43 = vadd.s32 488, %v4216_v2  ;;  %s4121_s4 = smov 116  }
 0x2b2   :  { %v4883_v63 = vperm.slane %v4876_v48, 0 }
 0x2b3   :  { %v1053_v59 = vmul.f32 0.01, %v1032_v47  ;;  %vm1043_vm2 = vcmp.ge.f32.partialorder %v1032_v47, 0.0 }
 0x2b4   :  { %vm1255_vm3 = vcmp.eq.s32.totalorder %v4225_v5, %v4883_v63  ;;  %vm1287_vm4 = vcmp.eq.s32.totalorder %v4228_v6, %v4883_v63  ;;  %vm1253_vm5 = vcmp.eq.s32.totalorder %v4231_v7, %v4883_v63  ;;  %vm1285_vm6 = vcmp.eq.s32.totalorder %v4234_v8, %v4883_v63 }
 0x2b5   :  { %v4865_v49 = vsel %vm1043_vm2, %v1032_v47, %v1053_v59  ;;  %3784 = vmatpush.msk.msra.mxu2 %vm1255_vm3, %v6477_v13  ;;  %3800 = vmatpush.msk.msrb.mxu3 %vm1287_vm4, %v6477_v13  ;;  %vm1251_vm7 = vcmp.eq.s32.totalorder %v4237_v9, %v4883_v63  ;;  %vm1283_vm9 = vcmp.eq.s32.totalorder %v4240_v10, %v4883_v63  ;;  %v4944_v47 = vadd.s32 480, %v4216_v2 }
 0x2b6   :  { %1092 = vrot.lane.b32.xlu2 %v4865_v49, %s4113_s25  ;;  %vm1249_vm11 = vcmp.eq.s32.totalorder %v4243_v11, %v4883_v63  ;;  %vm1319_vm13 = vcmp.eq.s32.totalorder %v4886_v62, %v4883_v63  ;;  %vm1351_vm15 = vcmp.eq.s32.totalorder %v4889_v53, %v4883_v63  ;;  %vm1281_vm1 = vcmp.eq.s32.totalorder %v4246_v12, %v4883_v63  ;;  %s4123_s25 = smov 117  }
 0x2b7   :  { %3785 = vmatpush.msk.msra.mxu2 %vm1253_vm5, %v6477_v13  ;;  %3801 = vmatpush.msk.msrb.mxu3 %vm1285_vm6, %v6477_v13  ;;  %vm1317_vm2 = vcmp.eq.s32.totalorder %v4892_v38, %v4883_v63  ;;  %vm1349_vm3 = vcmp.eq.s32.totalorder %v4895_v54, %v4883_v63  ;;  %6500 = vst [vmem:[#allocation10_spill] sm:$0xff] %v4944_v47 }
 0x2b8   :  { %3816 = vmatpush.msk.msra.mxu1 %vm1319_vm13, %v6477_v13  ;;  %3832 = vmatpush.msk.msra.mxu0 %vm1351_vm15, %v6477_v13  ;;  %vm1247_vm4 = vcmp.eq.s32.totalorder %v4265_v14, %v4883_v63  ;;  %vm1279_vm5 = vcmp.eq.s32.totalorder %v4276_v15, %v4883_v63  ;;  %vm1245_vm6 = vcmp.eq.s32.totalorder %v4291_v16, %v4883_v63 }
 0x2b9   :  { %3786 = vmatpush.msk.msra.mxu2 %vm1251_vm7, %v6477_v13  ;;  %3802 = vmatpush.msk.msrb.mxu3 %vm1283_vm9, %v6477_v13  ;;  %vm1315_vm7 = vcmp.eq.s32.totalorder %v4917_v51, %v4883_v63  ;;  %vm1347_vm13 = vcmp.eq.s32.totalorder %v4920_v43, %v4883_v63  ;;  %vm1277_vm9 = vcmp.eq.s32.totalorder %v4294_v17, %v4883_v63 }
 0x2ba   :  { %3817 = vmatpush.msk.msra.mxu1 %vm1317_vm2, %v6477_v13  ;;  %3833 = vmatpush.msk.msra.mxu0 %vm1349_vm3, %v6477_v13  ;;  %vm1243_vm15 = vcmp.eq.s32.totalorder %v4309_v18, %v4883_v63  ;;  %vm1275_vm2 = vcmp.eq.s32.totalorder %v4312_v19, %v4883_v63 }
 0x2bb   :  { %3787 = vmatpush.msk.msra.mxu2 %vm1249_vm11, %v6477_v13  ;;  %3803 = vmatpush.msk.msrb.mxu3 %vm1281_vm1, %v6477_v13  ;;  %vm1345_vm1 = vcmp.eq.s32.totalorder %v4944_v47, %v4883_v63  ;;  %v6505_v47 = vmov 1.0  }
 0x2bc   :  { %3818 = vmatpush.msk.msra.mxu1 %vm1315_vm7, %v6477_v13  ;;  %3834 = vmatpush.msk.msra.mxu0 %vm1347_vm13, %v6477_v13  ;;  %vm1239_vm7 = vcmp.eq.s32.totalorder %v4345_v22, %v4883_v63 }
 0x2bd   :  { %3788 = vmatpush.msk.msra.mxu2 %vm1247_vm4, %v6477_v13  ;;  %3804 = vmatpush.msk.msrb.mxu3 %vm1279_vm5, %v6477_v13  ;;  %vm1241_vm5 = vcmp.eq.s32.totalorder %v4327_v20, %v4883_v63 }
 0x2be   :  { %3835 = vmatpush.msk.msra.mxu0 %vm1345_vm1, %v6477_v13  ;;  %vm1307_vm1 = vcmp.eq.s32.totalorder %v5025_v1, %v4883_v63 }
 0x2bf   :  { %3789 = vmatpush.msk.msra.mxu2 %vm1245_vm6, %v6477_v13  ;;  %3805 = vmatpush.msk.msrb.mxu3 %vm1277_vm9, %v6477_v13  ;;  %vm1273_vm6 = vcmp.eq.s32.totalorder %v4330_v21, %v4883_v63 }
 0x2c1   :  { %3790 = vmatpush.msk.msra.mxu2 %vm1243_vm15, %v6505_v47  ;;  %3806 = vmatpush.msk.msrb.mxu3 %vm1275_vm2, %v6505_v47  ;;  %vm1237_vm15 = vcmp.eq.s32.totalorder %v4363_v24, %v4883_v63 }
 0x2c3   :  { %3791 = vmatpush.msk.msra.mxu2 %vm1241_vm5, %v6505_v47  ;;  %3807 = vmatpush.msk.msrb.mxu3 %vm1273_vm6, %v6505_v47  ;;  %vm1267_vm5 = vcmp.eq.s32.totalorder %v4384_v27, %v4883_v63 }
 0x2c5   :  { %3792 = vmatpush.msk.msra.mxu2 %vm1239_vm7, %v6505_v47  ;;  %vm1233_vm7 = vcmp.eq.s32.totalorder %v4399_v28, %v4883_v63 }
 0x2c7   :  { %3793 = vmatpush.msk.msra.mxu2 %vm1237_vm15, %v6505_v47  ;;  %vm1231_vm15 = vcmp.eq.s32.totalorder %v4417_v30, %v4883_v63 }
 0x2e9   :  { %v4037_v50 = vpop.permute.xlu2 %4036 }
 0x2ea   :  { %v4039_v52 = vunpack.i.h.bf16 %v4037_v50  ;;  %v4038_v45 = vunpack.i.l.bf16 %v4037_v50 }
 0x2ec   :  { %v1094_v40 = vsel %vm654_vm12, %v4038_v45, %v4039_v52  ;;  %v4969_v45 = vadd.s32 344, %v4216_v2 }
 0x2ed   :  { %v4908_v61 = vmax.f32 %v4836_v42, %v1094_v40  ;;  %v4931_v42 = vadd.s32 352, %v4216_v2 }
 0x2ee   :  { %vm1311_vm3 = vcmp.eq.s32.totalorder %v4969_v45, %v4883_v63 }
 0x2ef   :  { %vm1313_vm11 = vcmp.eq.s32.totalorder %v4931_v42, %v4883_v63 }
 0x2f0   :  { %3819 = vmatpush.msk.msra.mxu1 %vm1313_vm11, %v6477_v13  ;;  %vm1271_vm11 = vcmp.eq.s32.totalorder %v4348_v23, %v4883_v63 }
 0x2f1   :  { %v4869_v37 = vpop.permute.xlu2 %4046  ;;  %3808 = vmatpush.msk.msrb.mxu3 %vm1271_vm11, %v6505_v47 }
 0x2f2   :  { %v6476_v57 = vunpack.i.h.bf16 %v4869_v37  ;;  %v4048_v58 = vunpack.i.l.bf16 %v4869_v37  ;;  %3820 = vmatpush.msk.msra.mxu1 %vm1311_vm3, %v6505_v47  ;;  %vm1269_vm3 = vcmp.eq.s32.totalorder %v4366_v25, %v4883_v63 }
 0x2f3   :  { %3809 = vmatpush.msk.msrb.mxu3 %vm1269_vm3, %v6505_v47 }
 0x2f4   :  { %v1098_v4 = vsel %vm654_vm12, %v4048_v58, %v6476_v57 }
 0x2f5   :  { %v4905_v60 = vmax.f32 %v1059_v39, %v1098_v4  ;;  %v4986_v4 = vadd.s32 472, %v4216_v2  ;;  %3810 = vmatpush.msk.msrb.mxu3 %vm1267_vm5, %v6505_v47 }
 0x2f7   :  { %6499 = vst [vmem:[#allocation9_spill] sm:$0xff] %v4905_v60  ;;  %vm1343_vm4 = vcmp.eq.s32.totalorder %v4986_v4, %v4883_v63 }
 0x2f8   :  { %6501 = vst [vmem:[#allocation11_spill] sm:$0xff] %v4986_v4  ;;  %3836 = vmatpush.msk.msra.mxu0 %vm1343_vm4, %v6505_v47  ;;  %v5095_v4 = vadd.s32 320, %v4216_v2  ;;  %vm1235_vm4 = vcmp.eq.s32.totalorder %v4381_v26, %v4883_v63 }
 0x2f9   :  { %3794 = vmatpush.msk.msra.mxu2 %vm1235_vm4, %v6505_v47  ;;  %vm1229_vm4 = vcmp.eq.s32.totalorder %v4435_v32, %v4883_v63 }
 0x2fa   :  { %vm1305_vm6 = vcmp.eq.s32.totalorder %v5095_v4, %v4883_v63 }
 0x2fb   :  { %3795 = vmatpush.msk.msra.mxu2 %vm1233_vm7, %v6505_v47  ;;  %vm1259_vm7 = vcmp.eq.s32.totalorder %v4456_v35, %v4883_v63 }
 0x2fd   :  { %3796 = vmatpush.msk.msra.mxu2 %vm1231_vm15, %v6505_v47 }
 0x2ff   :  { %3797 = vmatpush.msk.msra.mxu2 %vm1229_vm4, %v6505_v47 }
 0x314   :  { %v4933_v39 = vpop.permute.xlu1 %4041 }
 0x315   :  { %v6475_v59 = vunpack.i.h.bf16 %v4933_v39  ;;  %v4043_v50 = vunpack.i.l.bf16 %v4933_v39 }
 0x317   :  { %v1095_v58 = vsel %vm654_vm12, %v4039_v52, %v4043_v50  ;;  %v1096_v40 = vsel %vm654_vm12, %v4043_v50, %v6475_v59  ;;  %v5040_v59 = vadd.s32 456, %v4216_v2 }
 0x318   :  { %v4989_v52 = vmax.f32 %v4847_v3, %v1096_v40  ;;  %v4992_v50 = vmax.f32 %v4838_v56, %v1095_v58  ;;  %v5011_v56 = vadd.s32 336, %v4216_v2  ;;  %v5014_v3 = vadd.s32 464, %v4216_v2 }
 0x319   :  { %6504 = vst [vmem:[#allocation14_spill] sm:$0xff] %v5040_v59  ;;  %vm1339_vm2 = vcmp.eq.s32.totalorder %v5040_v59, %v4883_v63  ;;  %v5280_v59 = vadd.s32 272, %v4216_v2 }
 0x31a   :  { %6502 = vst [vmem:[#allocation12_spill] sm:$0xff] %v4989_v52  ;;  %v4060_v58 = vpack.i.bf16 %v4905_v60, %v4989_v52  ;;  %v4055_v40 = vpack.i.bf16 %v4992_v50, %v4908_v61  ;;  %vm1309_vm13 = vcmp.eq.s32.totalorder %v5011_v56, %v4883_v63  ;;  %vm1341_vm9 = vcmp.eq.s32.totalorder %v5014_v3, %v4883_v63 }
 0x31b   :  { %6503 = vst [vmem:[#allocation13_spill] sm:$0xff] %v5014_v3  ;;  %3821 = vmatpush.msk.msra.mxu1 %vm1309_vm13, %v6505_v47  ;;  %3837 = vmatpush.msk.msra.mxu0 %vm1341_vm9, %v6505_v47  ;;  %v5114_v52 = vadd.s32 448, %v4216_v2  ;;  %vm1265_vm9 = vcmp.eq.s32.totalorder %v4402_v29, %v4883_v63  ;;  %v5313_v3 = vadd.s32 560, %v4216_v2 }
 0x31c   :  { %v5042_v57 = vpop.permute.xlu0 %4051  ;;  %4061 = vrot.lane.b32.xlu1 %v4060_v58, %s4111_s23  ;;  %4056 = vrot.lane.b32.xlu0 %v4055_v40, %s4111_s23 }
 0x31d   :  { %v4054_v13 = vunpack.i.h.bf16 %v5042_v57  ;;  %v4053_v60 = vunpack.i.l.bf16 %v5042_v57  ;;  %v6506_v57 = vunpack.i.h.bf16 %v4869_v37  ;;  %6509 = vst [vmem:[#allocation17_spill] sm:$0xff] %v5114_v52  ;;  %3822 = vmatpush.msk.msra.mxu1 %vm1307_vm1, %v6505_v47  ;;  %3838 = vmatpush.msk.msra.mxu0 %vm1339_vm2, %v6505_v47  ;;  %vm1337_vm13 = vcmp.eq.s32.totalorder %v5114_v52, %v4883_v63 }
 0x31e   :  { %vm1263_vm2 = vcmp.eq.s32.totalorder %v4420_v31, %v4883_v63  ;;  %3811 = vmatpush.msk.msrb.mxu3 %vm1265_vm9, %v6505_v47  ;;  %vm1257_vm9 = vcmp.eq.s32.totalorder %v4471_v36, %v4883_v63  ;;  %v5267_v52 = vadd.s32 408, %v4216_v2 }
 0x31f   :  { %v1099_v58 = vsel %vm654_vm12, %v6506_v57, %v4053_v60  ;;  %v1100_v40 = vsel %vm654_vm12, %v4053_v60, %v4054_v13  ;;  %3823 = vmatpush.msk.msra.mxu1 %vm1305_vm6, %v6505_v47  ;;  %3839 = vmatpush.msk.msra.mxu0 %vm1337_vm13, %v6505_v47  ;;  %vm1261_vm6 = vcmp.eq.s32.totalorder %v4438_v33, %v4883_v63 }
 0x320   :  { %v1083_v37 = vpop.permute.xlu1 %1082  ;;  %v5098_v57 = vmax.f32 %v4843_v55, %v1099_v58  ;;  %v5101_v60 = vmax.f32 %v4854_v0, %v1100_v40  ;;  %v6510_v55 = vunpack.i.h.bf16 %v4933_v39  ;;  %v5131_v40 = vadd.s32 312, %v4216_v2  ;;  %3812 = vmatpush.msk.msrb.mxu3 %vm1263_vm2, %v6505_v47 }
 0x321   :  { %v5120_v58 = vmax.f32 %v4861_v44, %v1083_v37  ;;  %vm1225_vm13 = vcmp.eq.s32.totalorder %v4216_v2, %v4883_v63 }
 0x322   :  { %6507 = vst [vmem:[#allocation15_spill] sm:$0xff] %v5098_v57  ;;  %v1097_v0 = vsel %vm654_vm12, %v6510_v55, %v1083_v37  ;;  %v4065_v44 = vpack.i.bf16 %v5101_v60, %v5098_v57  ;;  %v5149_v37 = vadd.s32 440, %v4216_v2  ;;  %v5174_v55 = vadd.s32 432, %v4216_v2  ;;  %3813 = vmatpush.msk.msrb.mxu3 %vm1261_vm6, %v6505_v47 }
 0x323   :  { %6508 = vst [vmem:[#allocation16_spill] sm:$0xff] %v5101_v60  ;;  %v5134_v39 = vmax.f32 %v4849_v46, %v1097_v0  ;;  %v5164_v46 = vadd.s32 304, %v4216_v2  ;;  %vm1303_vm11 = vcmp.eq.s32.totalorder %v5131_v40, %v4883_v63  ;;  %v1093_v0 = vpop.permute.xlu2 %1092  ;;  %v5325_v57 = vadd.s32 384, %v4216_v2 }
 0x324   :  { %6511 = vst [vmem:[#allocation18_spill] sm:$0xff] %v5120_v58  ;;  %4066 = vrot.lane.b32.xlu2 %v4065_v44, %s4111_s23  ;;  %1140 = vrot.lane.b32.xlu0 %v5120_v58, %s4111_s23  ;;  %vm1335_vm1 = vcmp.eq.s32.totalorder %v5149_v37, %v4883_v63  ;;  %v1101_v44 = vsel %vm654_vm12, %v4054_v13, %v1093_v0  ;;  %v5264_v58 = vadd.s32 280, %v4216_v2 }
 0x325   :  { %6512 = vst [vmem:[#allocation19_spill] sm:$0xff] %v5134_v39  ;;  %1138 = vrot.lane.b32.xlu1 %v5134_v39, %s4111_s23  ;;  %vm1301_vm3 = vcmp.eq.s32.totalorder %v5164_v46, %v4883_v63  ;;  %3824 = vmatpush.msk.msra.mxu1 %vm1303_vm11, %v6505_v47  ;;  %vm1333_vm5 = vcmp.eq.s32.totalorder %v5174_v55, %v4883_v63  ;;  %v5336_v39 = vadd.s32 552, %v4216_v2 }
 0x326   :  { %6513 = vst [vmem:[#allocation20_spill] sm:$0xff] %v5149_v37  ;;  %3840 = vmatpush.msk.msra.mxu0 %vm1335_vm1, %v6505_v47  ;;  %v5207_v37 = vmax.f32 %v4865_v49, %v1093_v0  ;;  %v5212_v13 = vmax.f32 %v4856_v41, %v1101_v44  ;;  %vm1227_vm12 = vcmp.eq.s32.totalorder %v4453_v34, %v4883_v63  ;;  %v5226_v41 = vadd.s32 296, %v4216_v2 }
 0x327   :  { %6514 = vst [vmem:[#allocation21_spill] sm:$0xff] %v5174_v55  ;;  %3825 = vmatpush.msk.msra.mxu1 %vm1301_vm3, %v6505_v47  ;;  %v5229_v49 = vadd.s32 424, %v4216_v2  ;;  %3798 = vmatpush.msk.msra.mxu2 %vm1227_vm12, %v6505_v47  ;;  %v5238_v0 = vadd.s32 288, %v4216_v2  ;;  %v5241_v44 = vadd.s32 416, %v4216_v2  ;;  %vm6498_vm3 = vcmask 1046528  }
 0x328   :  { %6515 = vst [vmem:[#allocation22_spill] sm:$0xff] %v5207_v37  ;;  %3841 = vmatpush.msk.msra.mxu0 %vm1333_vm5, %v6505_v47  ;;  %3814 = vmatpush.msk.msrb.mxu3 %vm1259_vm7, %v6505_v47  ;;  %vm1299_vm11 = vcmp.eq.s32.totalorder %v5226_v41, %v4883_v63  ;;  %v5257_v55 = vperm.slane %v4876_v48, 1  ;;  %v6491_v48 = vmov 0.0   ;;  %vm1295_vm12 = vcmp.eq.s32.totalorder %v5264_v58, %v4883_v63 }
 0x329   :  { %6516 = vst [vmem:[#allocation23_spill] sm:$0xff] %v5212_v13  ;;  %vm1331_vm15 = vcmp.eq.s32.totalorder %v5229_v49, %v4883_v63  ;;  %3826 = vmatpush.msk.msra.mxu1 %vm1299_vm11, %v6505_v47  ;;  %vm1297_vm1 = vcmp.eq.s32.totalorder %v5238_v0, %v4883_v63  ;;  %vm1329_vm2 = vcmp.eq.s32.totalorder %v5241_v44, %v4883_v63 }
 0x32a   :  { %3842 = vmatpush.msk.msra.mxu0 %vm1331_vm15, %v6505_v47  ;;  %3799 = vmatpush.msk.msra.mxu2 %vm1225_vm13, %v6505_v47  ;;  %vm1256_vm5 = vcmp.eq.s32.totalorder %v4225_v5, %v5257_v55  ;;  %vm1254_vm6 = vcmp.eq.s32.totalorder %v4231_v7, %v5257_v55  ;;  %vm1327_vm7 = vcmp.eq.s32.totalorder %v5267_v52, %v4883_v63  ;;  %v5291_v5 = vadd.s32 400, %v4216_v2 }
 0x32b   :  { %3815 = vmatpush.msk.msrb.mxu3 %vm1257_vm9, %v6505_v47  ;;  %3827 = vmatpush.msk.msra.mxu1 %vm1297_vm1, %v6505_v47  ;;  %vm1293_vm9 = vcmp.eq.s32.totalorder %v5280_v59, %v4883_v63  ;;  %v5298_v7 = vadd.s32 568, %v4216_v2  ;;  %vm1252_vm11 = vcmp.eq.s32.totalorder %v4237_v9, %v5257_v55  ;;  %v5322_v9 = vadd.s32 256, %v4216_v2 }
 0x32c   :  { %1150 = vrot.lane.b32.xlu2 %v5207_v37, %s4111_s23  ;;  %1148 = vrot.lane.b32.xlu0 %v5212_v13, %s4111_s23  ;;  %v5248_v37 = vadd.s32 584, %v4216_v2  ;;  %v5270_v13 = vadd.s32 576, %v4216_v2  ;;  %vm1325_vm15 = vcmp.eq.s32.totalorder %v5291_v5, %v4883_v63 }
 0x32d   :  { %3843 = vmatpush.msk.msra.mxu0 %vm1329_vm2, %v6505_v47  ;;  %3860 = vmatpush.msk.msra.mxu3 %vm1256_vm5, %v6505_v47  ;;  %6517 = vst [vmem:[#allocation24_spill] sm:$0xff] %v5298_v7  ;;  %vm1367_vm1 = vcmp.eq.s32.totalorder %v5298_v7, %v4883_v63  ;;  %vm1250_vm2 = vcmp.eq.s32.totalorder %v4243_v11, %v5257_v55  ;;  %v5347_v7 = vadd.s32 544, %v4216_v2 }
 0x32e   :  { %vm1371_vm4 = vcmp.eq.s32.totalorder %v5248_v37, %v4883_v63  ;;  %vm1369_vm13 = vcmp.eq.s32.totalorder %v5270_v13, %v4883_v63  ;;  %3828 = vmatpush.msk.msra.mxu1 %vm1295_vm12, %v6505_v47  ;;  %vm1289_vm12 = vcmp.eq.s32.totalorder %v5322_v9, %v4883_v63 }
 0x32f   :  { %v3782_v60 = vsel %vm1371_vm4, 1.0, %v6491_v48  ;;  %3844 = vmatpush.msk.msra.mxu0 %vm1327_vm7, %v6505_v47  ;;  %3861 = vmatpush.msk.msra.mxu3 %vm1254_vm6, %v6505_v47  ;;  %v5310_v48 = vadd.s32 392, %v4216_v2  ;;  %vm1365_vm6 = vcmp.eq.s32.totalorder %v5313_v3, %v4883_v63  ;;  %vm1321_vm7 = vcmp.eq.s32.totalorder %v5325_v57, %v4883_v63 }
 0x330   :  { %3848 = vmatpush.msk.msrb.mxu2 %vm6498_vm3, %v3782_v60  ;;  %v5307_v60 = vadd.s32 264, %v4216_v2  ;;  %3829 = vmatpush.msk.msra.mxu1 %vm1293_vm9, %v6505_v47  ;;  %vm1363_vm9 = vcmp.eq.s32.totalorder %v5336_v39, %v4883_v63 }
 0x331   :  { %3845 = vmatpush.msk.msra.mxu0 %vm1325_vm15, %v6505_v47  ;;  %3862 = vmatpush.msk.msra.mxu3 %vm1252_vm11, %v6505_v47  ;;  %vm1323_vm5 = vcmp.eq.s32.totalorder %v5310_v48, %v4883_v63  ;;  %vm1288_vm11 = vcmp.eq.s32.totalorder %v4228_v6, %v5257_v55  ;;  %vm1320_vm15 = vcmp.eq.s32.totalorder %v4886_v62, %v5257_v55  ;;  %v5388_v6 = vadd.s32 528, %v4216_v2  ;;  %v6523_v62 = vld [vmem:[#allocation9_spill] sm:$0xff] }
 0x332   :  { %3849 = vmatpush.msk.msrb.mxu2 %vm1369_vm13, %v6505_v47  ;;  %vm1291_vm4 = vcmp.eq.s32.totalorder %v5307_v60, %v4883_v63  ;;  %vm1248_vm13 = vcmp.eq.s32.totalorder %v4265_v14, %v5257_v55  ;;  %v5361_v14 = vadd.s32 536, %v4216_v2 }
 0x333   :  { %3830 = vmatpush.msk.msra.mxu1 %vm1291_vm4, %v6505_v47  ;;  %3846 = vmatpush.msk.msra.mxu0 %vm1323_vm5, %v6505_v47  ;;  %vm1286_vm4 = vcmp.eq.s32.totalorder %v4234_v8, %v5257_v55  ;;  %vm1318_vm5 = vcmp.eq.s32.totalorder %v4892_v38, %v5257_v55  ;;  %v5405_v8 = vadd.s32 520, %v4216_v2  ;;  %v6524_v38 = vld [vmem:[#allocation15_spill] sm:$0xff] }
 0x334   :  { %3850 = vmatpush.msk.msrb.mxu2 %vm1367_vm1, %v6505_v47  ;;  %3863 = vmatpush.msk.msra.mxu3 %vm1250_vm2, %v6505_v47  ;;  %vm1361_vm1 = vcmp.eq.s32.totalorder %v5347_v7, %v4883_v63  ;;  %vm1246_vm2 = vcmp.eq.s32.totalorder %v4291_v16, %v5257_v55 }
 0x335   :  { %3831 = vmatpush.msk.msra.mxu1 %vm1289_vm12, %v6505_v47  ;;  %3847 = vmatpush.msk.msra.mxu0 %vm1321_vm7, %v6505_v47  ;;  %vm1244_vm12 = vcmp.eq.s32.totalorder %v4309_v18, %v5257_v55  ;;  %vm1284_vm7 = vcmp.eq.s32.totalorder %v4240_v10, %v5257_v55  ;;  %v5416_v10 = vadd.s32 512, %v4216_v2 }
 0x336   :  { %3851 = vmatpush.msk.msrb.mxu2 %vm1365_vm6, %v6505_v47  ;;  %3864 = vmatpush.msk.msra.mxu3 %vm1248_vm13, %v6505_v47  ;;  %vm1359_vm6 = vcmp.eq.s32.totalorder %v5361_v14, %v4883_v63  ;;  %vm1316_vm13 = vcmp.eq.s32.totalorder %v4917_v51, %v5257_v55  ;;  %v6526_v51 = vld [vmem:[#allocation13_spill] sm:$0xff] }
 0x337   :  { %3876 = vmatpush.msk.msrb.mxu1 %vm1288_vm11, %v6505_v47  ;;  %3892 = vmatpush.msk.msrb.mxu0 %vm1320_vm15, %v6505_v47  ;;  %vm1282_vm11 = vcmp.eq.s32.totalorder %v4246_v12, %v5257_v55  ;;  %vm1357_vm15 = vcmp.eq.s32.totalorder %v5388_v6, %v4883_v63 }
 0x338   :  { %3852 = vmatpush.msk.msrb.mxu2 %vm1363_vm9, %v6505_v47  ;;  %3865 = vmatpush.msk.msra.mxu3 %vm1246_vm2, %v6505_v47  ;;  %vm1242_vm9 = vcmp.eq.s32.totalorder %v4327_v20, %v5257_v55  ;;  %vm1240_vm2 = vcmp.eq.s32.totalorder %v4345_v22, %v5257_v55 }
 0x339   :  { %3877 = vmatpush.msk.msrb.mxu1 %vm1286_vm4, %v6505_v47  ;;  %3893 = vmatpush.msk.msrb.mxu0 %vm1318_vm5, %v6505_v47  ;;  %vm1280_vm4 = vcmp.eq.s32.totalorder %v4276_v15, %v5257_v55  ;;  %vm1312_vm5 = vcmp.eq.s32.totalorder %v4969_v45, %v5257_v55 }
 0x33a   :  { %3853 = vmatpush.msk.msrb.mxu2 %vm1361_vm1, %v6505_v47  ;;  %3866 = vmatpush.msk.msra.mxu3 %vm1244_vm12, %v6505_v47  ;;  %vm1314_vm1 = vcmp.eq.s32.totalorder %v4931_v42, %v5257_v55  ;;  %vm1238_vm12 = vcmp.eq.s32.totalorder %v4363_v24, %v5257_v55 }
 0x33b   :  { %3878 = vmatpush.msk.msrb.mxu1 %vm1284_vm7, %v6505_v47  ;;  %3894 = vmatpush.msk.msrb.mxu0 %vm1316_vm13, %v6505_v47  ;;  %vm1353_vm7 = vcmp.eq.s32.totalorder %v5416_v10, %v4883_v63  ;;  %vm1278_vm13 = vcmp.eq.s32.totalorder %v4294_v17, %v5257_v55 }
 0x33c   :  { %3854 = vmatpush.msk.msrb.mxu2 %vm1359_vm6, %v6505_v47  ;;  %3867 = vmatpush.msk.msra.mxu3 %vm1242_vm9, %v6505_v47  ;;  %vm1355_vm6 = vcmp.eq.s32.totalorder %v5405_v8, %v4883_v63  ;;  %vm1310_vm9 = vcmp.eq.s32.totalorder %v5011_v56, %v5257_v55 }
 0x33d   :  { %3879 = vmatpush.msk.msrb.mxu1 %vm1282_vm11, %v6505_v47  ;;  %3895 = vmatpush.msk.msrb.mxu0 %vm1314_vm1, %v6505_v47  ;;  %vm1236_vm11 = vcmp.eq.s32.totalorder %v4381_v26, %v5257_v55  ;;  %vm1308_vm1 = vcmp.eq.s32.totalorder %v5025_v1, %v5257_v55 }
 0x33e   :  { %3855 = vmatpush.msk.msrb.mxu2 %vm1357_vm15, %v6505_v47  ;;  %3868 = vmatpush.msk.msra.mxu3 %vm1240_vm2, %v6505_v47  ;;  %vm1276_vm15 = vcmp.eq.s32.totalorder %v4312_v19, %v5257_v55  ;;  %vm1234_vm2 = vcmp.eq.s32.totalorder %v4399_v28, %v5257_v55 }
 0x33f   :  { %3880 = vmatpush.msk.msrb.mxu1 %vm1280_vm4, %v6505_v47  ;;  %3896 = vmatpush.msk.msrb.mxu0 %vm1312_vm5, %v6505_v47  ;;  %vm1274_vm4 = vcmp.eq.s32.totalorder %v4330_v21, %v5257_v55  ;;  %vm1306_vm5 = vcmp.eq.s32.totalorder %v5095_v4, %v5257_v55  ;;  %v6518_v21 = vmov 0.0  }
 0x340   :  { %3856 = vmatpush.msk.msrb.mxu2 %vm1355_vm6, %v6505_v47  ;;  %3869 = vmatpush.msk.msra.mxu3 %vm1238_vm12, %v6505_v47  ;;  %vm1232_vm6 = vcmp.eq.s32.totalorder %v4417_v30, %v5257_v55  ;;  %vm1272_vm12 = vcmp.eq.s32.totalorder %v4348_v23, %v5257_v55 }
 0x341   :  { %3881 = vmatpush.msk.msrb.mxu1 %vm1278_vm13, %v6505_v47  ;;  %3897 = vmatpush.msk.msrb.mxu0 %vm1310_vm9, %v6505_v47  ;;  %vm1230_vm13 = vcmp.eq.s32.totalorder %v4435_v32, %v5257_v55  ;;  %vm1270_vm9 = vcmp.eq.s32.totalorder %v4366_v25, %v5257_v55  ;;  %v6520_v32 = vld [vmem:[#allocation12_spill] sm:$0xff] }
 0x342   :  { %3857 = vmatpush.msk.msrb.mxu2 %vm1353_vm7, %v6505_v47  ;;  %3870 = vmatpush.msk.msra.mxu3 %vm1236_vm11, %v6505_v47  ;;  %vm1304_vm7 = vcmp.eq.s32.totalorder %v5131_v40, %v5257_v55  ;;  %vm1302_vm11 = vcmp.eq.s32.totalorder %v5164_v46, %v5257_v55  ;;  %v6530_v40 = vld [vmem:[#allocation17_spill] sm:$0xff]  ;;  %v6532_v46 = vld [vmem:[#allocation20_spill] sm:$0xff] }
 0x343   :  { %3882 = vmatpush.msk.msrb.mxu1 %vm1276_vm15, %v6505_v47  ;;  %3898 = vmatpush.msk.msrb.mxu0 %vm1308_vm1, %v6505_v47  ;;  %vm1228_vm15 = vcmp.eq.s32.totalorder %v4453_v34, %v5257_v55  ;;  %vm1268_vm1 = vcmp.eq.s32.totalorder %v4384_v27, %v5257_v55  ;;  %v6519_v27 = vld [vmem:[#allocation24_spill] sm:$0xff] }
 0x344   :  { %3871 = vmatpush.msk.msra.mxu3 %vm1234_vm2, %v6505_v47  ;;  %vm1300_vm2 = vcmp.eq.s32.totalorder %v5226_v41, %v5257_v55  ;;  %v6534_v41 = vld [vmem:[#allocation22_spill] sm:$0xff] }
 0x345   :  { %3883 = vmatpush.msk.msrb.mxu1 %vm1274_vm4, %v6505_v47  ;;  %3899 = vmatpush.msk.msrb.mxu0 %vm1306_vm5, %v6505_v47  ;;  %vm1226_vm4 = vcmp.eq.s32.totalorder %v4216_v2, %v5257_v55  ;;  %vm1266_vm5 = vcmp.eq.s32.totalorder %v4402_v29, %v5257_v55 }
 0x346   :  { %3872 = vmatpush.msk.msra.mxu3 %vm1232_vm6, %v6505_v47  ;;  %vm1298_vm6 = vcmp.eq.s32.totalorder %v5238_v0, %v5257_v55 }
 0x347   :  { %3884 = vmatpush.msk.msrb.mxu1 %vm1272_vm12, %v6505_v47  ;;  %3900 = vmatpush.msk.msrb.mxu0 %vm1304_vm7, %v6505_v47  ;;  %vm1264_vm12 = vcmp.eq.s32.totalorder %v4420_v31, %v5257_v55  ;;  %vm1296_vm7 = vcmp.eq.s32.totalorder %v5264_v58, %v5257_v55 }
 0x348   :  { %3873 = vmatpush.msk.msra.mxu3 %vm1230_vm13, %v6505_v47  ;;  %vm1262_vm13 = vcmp.eq.s32.totalorder %v4438_v33, %v5257_v55 }
 0x349   :  { %3885 = vmatpush.msk.msrb.mxu1 %vm1270_vm9, %v6505_v47  ;;  %3901 = vmatpush.msk.msrb.mxu0 %vm1302_vm11, %v6505_v47  ;;  %vm1294_vm9 = vcmp.eq.s32.totalorder %v5280_v59, %v5257_v55  ;;  %vm1260_vm11 = vcmp.eq.s32.totalorder %v4456_v35, %v5257_v55  ;;  %v6521_v35 = vld [vmem:[#allocation10_spill] sm:$0xff] }
 0x34a   :  { %3874 = vmatpush.msk.msra.mxu3 %vm1228_vm15, %v6505_v47  ;;  %vm1292_vm15 = vcmp.eq.s32.totalorder %v5307_v60, %v5257_v55 }
 0x34b   :  { %3886 = vmatpush.msk.msrb.mxu1 %vm1268_vm1, %v6505_v47  ;;  %3902 = vmatpush.msk.msrb.mxu0 %vm1300_vm2, %v6505_v47  ;;  %vm1332_vm1 = vcmp.eq.s32.totalorder %v5229_v49, %v5257_v55  ;;  %vm1258_vm2 = vcmp.eq.s32.totalorder %v4471_v36, %v5257_v55  ;;  %v6522_v36 = vld [vmem:[#allocation19_spill] sm:$0xff] }
 0x34c   :  { %3875 = vmatpush.msk.msra.mxu3 %vm1226_vm4, %v6505_v47  ;;  %vm1290_vm4 = vcmp.eq.s32.totalorder %v5322_v9, %v5257_v55 }
 0x34d   :  { %3887 = vmatpush.msk.msrb.mxu1 %vm1266_vm5, %v6505_v47  ;;  %3903 = vmatpush.msk.msrb.mxu0 %vm1298_vm6, %v6505_v47  ;;  %vm1330_vm5 = vcmp.eq.s32.totalorder %v5241_v44, %v5257_v55  ;;  %vm1328_vm6 = vcmp.eq.s32.totalorder %v5267_v52, %v5257_v55 }
 0x34f   :  { %3888 = vmatpush.msk.msrb.mxu1 %vm1264_vm12, %v6505_v47  ;;  %3904 = vmatpush.msk.msrb.mxu0 %vm1296_vm7, %v6505_v47  ;;  %vm1326_vm12 = vcmp.eq.s32.totalorder %v5291_v5, %v5257_v55  ;;  %vm1372_vm7 = vcmp.eq.s32.totalorder %v5248_v37, %v5257_v55 }
 0x350   :  { %v3783_v22 = vsel %vm1372_vm7, 1.0, %v6518_v21  ;;  %vm1368_vm7 = vcmp.eq.s32.totalorder %v6519_v27, %v5257_v55 }
 0x351   :  { %3889 = vmatpush.msk.msrb.mxu1 %vm1262_vm13, %v6505_v47  ;;  %3905 = vmatpush.msk.msrb.mxu0 %vm1294_vm9, %v6505_v47  ;;  %vm1324_vm13 = vcmp.eq.s32.totalorder %v5310_v48, %v5257_v55  ;;  %vm1352_vm9 = vcmp.eq.s32.totalorder %v4889_v53, %v5257_v55 }
 0x353   :  { %3890 = vmatpush.msk.msrb.mxu1 %vm1260_vm11, %v6505_v47  ;;  %3906 = vmatpush.msk.msrb.mxu0 %vm1292_vm15, %v6505_v47  ;;  %vm1322_vm11 = vcmp.eq.s32.totalorder %v5325_v57, %v5257_v55  ;;  %vm1350_vm15 = vcmp.eq.s32.totalorder %v4895_v54, %v5257_v55 }
 0x355   :  { %3891 = vmatpush.msk.msrb.mxu1 %vm1258_vm2, %v6505_v47  ;;  %3907 = vmatpush.msk.msrb.mxu0 %vm1290_vm4, %v6505_v47  ;;  %vm1370_vm2 = vcmp.eq.s32.totalorder %v5270_v13, %v5257_v55  ;;  %vm1348_vm4 = vcmp.eq.s32.totalorder %v4920_v43, %v5257_v55  ;;  %v6527_v43 = vld [vmem:[#allocation14_spill] sm:$0xff]  ;;  %v6533_v13 = vld [vmem:[#allocation21_spill] sm:$0xff] }
 0x356   :  { %vm1340_vm0 = vcmp.eq.s32.totalorder %v6527_v43, %v5257_v55 }
 0x37e   :  { %v4067_v16 = vpop.permute.xlu2 %4066 }
 0x37f   :  { %v4069_v23 = vunpack.i.h.bf16 %v4067_v16  ;;  %v4068_v24 = vunpack.i.l.bf16 %v4067_v16 }
 0x381   :  { %v1157_v31 = vsel %vm582_vm8, %v4068_v24, %v4069_v23 }
 0x382   :  { %v1176_v54 = vmax.f32 %v6524_v38, %v1157_v31 }
 0x386   :  { %v1151_v42 = vpop.permute.xlu2 %1150 }
 0x387   :  { %v1179_v0 = vmax.f32 %v6534_v41, %v1151_v42 }
 0x38e   :  { %v4062_v1 = vpop.permute.xlu1 %4061  ;;  %v4057_v2 = vpop.permute.xlu0 %4056 }
 0x38f   :  { %v4063_v11 = vunpack.i.l.bf16 %v4062_v1  ;;  %v4059_v12 = vunpack.i.h.bf16 %v4057_v2  ;;  %v4058_v15 = vunpack.i.l.bf16 %v4057_v2  ;;  %v4064_v25 = vunpack.i.h.bf16 %v4062_v1 }
 0x391   :  { %v1153_v17 = vsel %vm582_vm8, %v4059_v12, %v4063_v11  ;;  %v1152_v18 = vsel %vm582_vm8, %v4058_v15, %v4059_v12  ;;  %v1156_v30 = vsel %vm582_vm8, %v4064_v25, %v4068_v24 }
 0x392   :  { %v5531_v19 = vmax.f32 %v4992_v50, %v1153_v17  ;;  %v1170_v20 = vmax.f32 %v4908_v61, %v1152_v18  ;;  %v1175_v53 = vmax.f32 %v6523_v62, %v1156_v30  ;;  %v6525_v61 = vld [vmem:[#allocation11_spill] sm:$0xff]  ;;  %v6528_v50 = vld [vmem:[#allocation16_spill] sm:$0xff] }
 0x394   :  { %1699 = vmatmul.f32.vlgmr.msra.gmra.mxu2 %v1170_v20  ;;  %1722 = vmatmul.f32.vlgmr.msrb.gmra.mxu3 %v5531_v19 }
 0x395   :  { %3908 = vmatpush.msk.msra.mxu2 %vm1352_vm9, %v6505_v47  ;;  %3924 = vmatpush.msk.msrb.mxu3 %vm6498_vm3, %v3783_v22  ;;  %vm1346_vm9 = vcmp.eq.s32.totalorder %v6521_v35, %v5257_v55  ;;  %vm1362_vm3 = vcmp.eq.s32.totalorder %v5347_v7, %v5257_v55  ;;  %v2115_v35 = vld [vmem:[%s6464_s6] sm:$0xff] }
 0x396   :  { %v1141_v29 = vpop.permute.xlu0 %1140 }
 0x397   :  { %v1139_v26 = vpop.permute.xlu1 %1138  ;;  %3909 = vmatpush.msk.msra.mxu2 %vm1350_vm15, %v6505_v47  ;;  %3925 = vmatpush.msk.msrb.mxu3 %vm1370_vm2, %v6505_v47  ;;  %vm1344_vm15 = vcmp.eq.s32.totalorder %v6525_v61, %v5257_v55  ;;  %vm1366_vm2 = vcmp.eq.s32.totalorder %v5313_v3, %v5257_v55  ;;  %v6529_v3 = vld [vmem:[#allocation23_spill] sm:$0xff] }
 0x398   :  { %v1154_v28 = vsel %vm582_vm8, %v4063_v11, %v1139_v26  ;;  %v1155_v34 = vsel %vm582_vm8, %v1139_v26, %v1141_v29 }
 0x399   :  { %v1172_v33 = vmax.f32 %v6520_v32, %v1154_v28  ;;  %v1173_v63 = vmax.f32 %v6522_v36, %v1155_v34  ;;  %3910 = vmatpush.msk.msra.mxu2 %vm1348_vm4, %v6505_v47  ;;  %3926 = vmatpush.msk.msrb.mxu3 %vm1368_vm7, %v6505_v47  ;;  %vm1342_vm4 = vcmp.eq.s32.totalorder %v6526_v51, %v5257_v55  ;;  %v2118_v34 = vld [vmem:[%s6464_s6 + $0x18] sm:$0xff]  ;;  %v2117_v36 = vld [vmem:[%s6464_s6 + $0x10] sm:$0xff] }
 0x39a   :  { %vm1364_vm7 = vcmp.eq.s32.totalorder %v5336_v39, %v5257_v55  ;;  %v6531_v39 = vld [vmem:[#allocation18_spill] sm:$0xff] }
 0x39b   :  { %1745 = vmatmul.f32.vlgmr.msra.gmra.mxu1 %v1172_v33  ;;  %1768 = vmatmul.f32.vlgmr.msra.gmra.mxu0 %v1173_v63  ;;  %v1174_v37 = vmax.f32 %v6531_v39, %v1141_v29 }
 0x39c   :  { %3911 = vmatpush.msk.msra.mxu2 %vm1346_vm9, %v6505_v47  ;;  %1725 = vmatmul.f32.gmra.mxu3 %v1176_v54  ;;  %vm1338_vm9 = vcmp.eq.s32.totalorder %v6530_v40, %v5257_v55 }
 0x39d   :  { %1702 = vmatmul.f32.gmra.mxu2 %v1175_v53  ;;  %3927 = vmatpush.msk.msrb.mxu3 %vm1366_vm2, %v6505_v47  ;;  %vm1360_vm2 = vcmp.eq.s32.totalorder %v5361_v14, %v5257_v55 }
 0x39e   :  { %3912 = vmatpush.msk.msra.mxu2 %vm1344_vm15, %v6505_v47  ;;  %v1149_v59 = vpop.permute.xlu0 %1148  ;;  %vm1669_vm15 = vcmask 646144  }
 0x39f   :  { %3928 = vmatpush.msk.msrb.mxu3 %vm1364_vm7, %v6505_v47  ;;  %v1158_v45 = vsel %vm582_vm8, %v4069_v23, %v1149_v59  ;;  %v1159_v4 = vsel %vm582_vm8, %v1149_v59, %v1151_v42  ;;  %vm1356_vm7 = vcmp.eq.s32.totalorder %v5405_v8, %v5257_v55 }
 0x3a0   :  { %3913 = vmatpush.msk.msra.mxu2 %vm1342_vm4, %v6505_v47  ;;  %v1177_v56 = vmax.f32 %v6528_v50, %v1158_v45  ;;  %v1178_v58 = vmax.f32 %v6529_v3, %v1159_v4  ;;  %vm1358_vm4 = vcmp.eq.s32.totalorder %v5388_v6, %v5257_v55 }
 0x3a1   :  { %3929 = vmatpush.msk.msrb.mxu3 %vm1362_vm3, %v6505_v47  ;;  %vm1334_vm3 = vcmp.eq.s32.totalorder %v6533_v13, %v5257_v55 }
 0x3a2   :  { %3914 = vmatpush.msk.msra.mxu2 %vm1340_vm0, %v6505_v47  ;;  %vm1336_vm0 = vcmp.eq.s32.totalorder %v6532_v46, %v5257_v55 }
 0x3a3   :  { %1748 = vmatmul.f32.gmra.mxu1 %v1177_v56  ;;  %1771 = vmatmul.f32.gmra.mxu0 %v1178_v58 }
 0x3a4   :  { %3915 = vmatpush.msk.msra.mxu2 %vm1338_vm9, %v6505_v47  ;;  %1814 = vmatmul.f32.vlgmr.msra.gmra.mxu3 %v1170_v20  ;;  %vm1354_vm9 = vcmp.eq.s32.totalorder %v5416_v10, %v5257_v55 }
 0x3a5   :  { %3858 = vmatmul.msk.f32.vlgmr.msrb.gmra.mxu2 %vm1669_vm15, %v1174_v37  ;;  %3930 = vmatpush.msk.msrb.mxu3 %vm1360_vm2, %v6505_v47 }
 0x3a6   :  { %3916 = vmatpush.msk.msra.mxu2 %vm1336_vm0, %v6505_v47 }
 0x3a7   :  { %3931 = vmatpush.msk.msrb.mxu3 %vm1358_vm4, %v6505_v47 }
 0x3a8   :  { %3917 = vmatpush.msk.msra.mxu2 %vm1334_vm3, %v6505_v47 }
 0x3a9   :  { %3932 = vmatpush.msk.msrb.mxu3 %vm1356_vm7, %v6505_v47 }
 0x3aa   :  { %3918 = vmatpush.msk.msra.mxu2 %vm1332_vm1, %v6505_v47  ;;  %vm1914_vm1 = vcmask 408576  }
 0x3ab   :  { %1837 = vmatmul.f32.vlgmr.msrb.gmra.mxu1 %v5531_v19  ;;  %1860 = vmatmul.f32.vlgmr.msrb.gmra.mxu0 %v1172_v33 }
 0x3ac   :  { %3919 = vmatpush.msk.msra.mxu2 %vm1330_vm5, %v6505_v47  ;;  %1817 = vmatmul.f32.gmra.mxu3 %v1175_v53  ;;  %vm2041_vm5 = vcmask 875520  }
 0x3ad   :  { %3859 = vmatmul.msk.f32.gmra.mxu2 %vm1669_vm15, %v1179_v0  ;;  %3933 = vmatpush.msk.msrb.mxu3 %vm1354_vm9, %v6505_v47 }
 0x3ae   :  { %3920 = vmatpush.msk.msra.mxu2 %vm1328_vm6, %v6505_v47  ;;  %vm1985_vm6 = vcmask 957440  }
 0x3b0   :  { %3921 = vmatpush.msk.msra.mxu2 %vm1326_vm12, %v6505_v47  ;;  %vm2004_vm12 = vcmask 949248  }
 0x3b2   :  { %3922 = vmatpush.msk.msra.mxu2 %vm1324_vm13, %v6505_v47  ;;  %vm1966_vm13 = vcmask 965632  }
 0x3b3   :  { %1840 = vmatmul.f32.gmra.mxu1 %v1176_v54  ;;  %1863 = vmatmul.f32.gmra.mxu0 %v1177_v56 }
 0x3b4   :  { %3923 = vmatpush.msk.msra.mxu2 %vm1322_vm11, %v6505_v47  ;;  %3934 = vmatmul.msk.f32.vlgmr.msrb.gmra.mxu3 %vm1669_vm15, %v1174_v37 }
 0x3b5   :  { %1883 = vmatmul.f32.vlgmr.msra.gmra.mxu2 %v1173_v63 }
 0x3bc   :  { %3935 = vmatmul.msk.f32.gmra.mxu3 %vm1669_vm15, %v1179_v0 }
 0x3bd   :  { %1886 = vmatmul.f32.gmra.mxu2 %v1178_v58 }
 0x417   :  { %v1700_v52 = vpop.f32.mrf.mxu2  ;;  %v1723_v49 = vpop.f32.mrf.mxu3 }
 0x418   :  { %v1746_v44 = vpop.f32.mrf.mxu1  ;;  %v1724_v5 = vadd.f32 %v1723_v49, %v1700_v52  ;;  %v1769_v60 = vpop.f32.mrf.mxu0 }
 0x41a   :  { %v1747_v9 = vadd.f32 %v1746_v44, %v1724_v5 }
 0x41c   :  { %v1770_v6 = vadd.f32 %v1769_v60, %v1747_v9 }
 0x41f   :  { %v1726_v48 = vpop.f32.mrf.mxu3 }
 0x420   :  { %v1703_v7 = vpop.f32.mrf.mxu2  ;;  %v1749_v14 = vpop.f32.mrf.mxu1 }
 0x421   :  { %v1727_v8 = vadd.f32 %v1726_v48, %v1703_v7  ;;  %v1772_v1 = vpop.f32.mrf.mxu0 }
 0x423   :  { %v1750_v2 = vadd.f32 %v1749_v14, %v1727_v8 }
 0x425   :  { %v1773_v12 = vadd.f32 %v1772_v1, %v1750_v2 }
 0x427   :  { %v1815_v10 = vpop.f32.mrf.mxu3 }
 0x428   :  { %v1792_v57 = vpop.f32.mrf.mxu2  ;;  %v1838_v11 = vpop.f32.mrf.mxu1 }
 0x429   :  { %v5639_v55 = vadd.f32 %v1792_v57, %v1770_v6  ;;  %v1839_v18 = vadd.f32 %v1838_v11, %v1815_v10  ;;  %v1861_v19 = vpop.f32.mrf.mxu0 }
 0x42b   :  { %1996 = vrot.lane.b32.xlu1 %v5639_v55, %s4121_s4  ;;  %2015 = vrot.lane.b32.xlu0 %v5639_v55, %s4115_s27  ;;  %v1862_v20 = vadd.f32 %v1861_v19, %v1839_v18 }
 0x42c   :  { %2033 = vrot.lane.b32.xlu2 %v5639_v55, %s4122_s0 }
 0x42f   :  { %v1818_v15 = vpop.f32.mrf.mxu3 }
 0x430   :  { %v1795_v16 = vpop.f32.mrf.mxu2  ;;  %v1841_v22 = vpop.f32.mrf.mxu1 }
 0x431   :  { %v5647_v17 = vadd.f32 %v1795_v16, %v1773_v12  ;;  %v1842_v26 = vadd.f32 %v1841_v22, %v1818_v15  ;;  %v1864_v28 = vpop.f32.mrf.mxu0 }
 0x433   :  { %2019 = vrot.lane.b32.xlu1 %v5647_v17, %s4115_s27  ;;  %2037 = vrot.lane.b32.xlu0 %v5647_v17, %s4122_s0  ;;  %v1865_v29 = vadd.f32 %v1864_v28, %v1842_v26 }
 0x434   :  { %1977 = vrot.lane.b32.xlu2 %v5639_v55, %s4123_s25 }
 0x437   :  { %v1907_v24 = vpop.f32.mrf.mxu3 }
 0x438   :  { %v1884_v23 = vpop.f32.mrf.mxu2 }
 0x439   :  { %v1885_v25 = vadd.f32 %v1884_v23, %v1862_v20 }
 0x43b   :  { %v1908_v27 = vadd.f32 %v1907_v24, %v1885_v25  ;;  %1981 = vrot.lane.b32.xlu0 %v5647_v17, %s4123_s25 }
 0x43c   :  { %2000 = vrot.lane.b32.xlu2 %v5647_v17, %s4121_s4 }
 0x43d   :  { %2017 = vrot.lane.b32.xlu1 %v1908_v27, %s4115_s27  ;;  %1915 = vst.msk [vmem:[#allocation4 + $0x8] sm:$0xff] %vm1914_vm1, %v1908_v27 }
 0x43f   :  { %v1910_v32 = vpop.f32.mrf.mxu3 }
 0x440   :  { %v1887_v30 = vpop.f32.mrf.mxu2 }
 0x441   :  { %v1888_v31 = vadd.f32 %v1887_v30, %v1865_v29 }
 0x443   :  { %v1911_v33 = vadd.f32 %v1910_v32, %v1888_v31  ;;  %1960 = vrot.lane.b32.xlu0 %v1908_v27, %s4124_s26 }
 0x444   :  { %2035 = vrot.lane.b32.xlu2 %v1908_v27, %s4122_s0 }
 0x445   :  { %1998 = vrot.lane.b32.xlu1 %v1908_v27, %s4121_s4  ;;  %1917 = vst.msk [vmem:[#allocation4 + $0x18] sm:$0xff] %vm1914_vm1, %v1911_v33 }
 0x44b   :  { %2021 = vrot.lane.b32.xlu0 %v1911_v33, %s4115_s27  ;;  %s4125_s27 = smov 106  }
 0x44c   :  { %1979 = vrot.lane.b32.xlu2 %v1908_v27, %s4123_s25 }
 0x44d   :  { %1942 = vrot.lane.b32.xlu1 %v1908_v27, %s4112_s24 }
 0x453   :  { %1958 = vrot.lane.b32.xlu0 %v5639_v55, %s4124_s26 }
 0x454   :  { %2002 = vrot.lane.b32.xlu2 %v1911_v33, %s4121_s4  ;;  %s3420_s4 = sshll.u32 %s6473_s15, 4  ;;  %s3421_s4 = int_to_ptr.hbm [resolvable:$true] %s3420_s4 }
 0x455   :  { %2039 = vrot.lane.b32.xlu1 %v1911_v33, %s4122_s0 }
 0x45b   :  { %1983 = vrot.lane.b32.xlu0 %v1911_v33, %s4123_s25 }
 0x45c   :  { %1924 = vrot.lane.b32.xlu2 %v1908_v27, %s4111_s23 }
 0x45d   :  { %1962 = vrot.lane.b32.xlu1 %v5647_v17, %s4124_s26 }
 0x463   :  { %1928 = vrot.lane.b32.xlu0 %v1911_v33, %s4111_s23 }
 0x464   :  { %1946 = vrot.lane.b32.xlu2 %v1911_v33, %s4112_s24 }
 0x465   :  { %1964 = vrot.lane.b32.xlu1 %v1911_v33, %s4124_s26 }
 0x46b   :  { %1940 = vrot.lane.b32.xlu0 %v5639_v55, %s4112_s24 }
 0x46c   :  { %2058 = vrot.lane.b32.xlu2 %v1911_v33, %s4125_s27 }
 0x46d   :  { %1944 = vrot.lane.b32.xlu1 %v5647_v17, %s4112_s24 }
 0x473   :  { %1922 = vrot.lane.b32.xlu0 %v5639_v55, %s4111_s23 }
 0x474   :  { %1926 = vrot.lane.b32.xlu2 %v5647_v17, %s4111_s23 }
 0x475   :  { %2054 = vrot.lane.b32.xlu1 %v1908_v27, %s4125_s27 }
 0x47b   :  { %2136 = vperm.xlu0 %4033, %v2118_v34  }
 0x47c   :  { %2052 = vrot.lane.b32.xlu2 %v5639_v55, %s4125_s27 }
 0x47d   :  { %2056 = vrot.lane.b32.xlu1 %v5647_v17, %s4125_s27 }
 0x483   :  { %2121 = vperm.xlu0 %4033, %v2115_v35  }
 0x485   :  { %2131 = vperm.xlu1 %4034, %v2117_v36  }
 0x486   :  { %v2034_v63 = vpop.permute.xlu2 %2033 }
 0x48e   :  { %v1978_v62 = vpop.permute.xlu2 %1977 }
 0x496   :  { %v2001_v53 = vpop.permute.xlu2 %2000 }
 0x49d   :  { %v1997_v38 = vpop.permute.xlu1 %1996  ;;  %v2016_v54 = vpop.permute.xlu0 %2015 }
 0x49e   :  { %v2036_v61 = vpop.permute.xlu2 %2035 }
 0x49f   :  { %v2042_v51 = vsel %vm2041_vm5, %v2034_v63, %v2036_v61  ;;  %2049 = vst.msk [vmem:[#allocation4 + $0xe8] sm:$0xff] %vm1914_vm1, %v2036_v61  ;;  %v2071_v63 = vld [vmem:[%s6463_s5] sm:$0xff]  ;;  %v2080_v61 = vld [vmem:[#allocation4 + $0x8] sm:$0xff] }
 0x4a5   :  { %v2038_v43 = vpop.permute.xlu0 %2037  ;;  %v2020_v45 = vpop.permute.xlu1 %2019 }
 0x4a6   :  { %v1980_v42 = vpop.permute.xlu2 %1979  ;;  %v2108_v10 = vld [vmem:[#allocation4 + $0xe8] sm:$0xff] }
 0x4a7   :  { %v1986_v59 = vsel %vm1985_vm6, %v1978_v62, %v1980_v42  ;;  %1993 = vst.msk [vmem:[#allocation4 + $0x88] sm:$0xff] %vm1914_vm1, %v1980_v42  ;;  %v2074_v42 = vld [vmem:[%s6463_s5 + $0x18] sm:$0xff] }
 0x4ad   :  { %v1982_v4 = vpop.permute.xlu0 %1981 }
 0x4ae   :  { %v2003_v50 = vpop.permute.xlu2 %2002  ;;  %v2096_v24 = vld [vmem:[#allocation4 + $0x88] sm:$0xff] }
 0x4af   :  { %v2006_v56 = vsel %vm2004_vm12, %v2001_v53, %v2003_v50  ;;  %2014 = vst.msk [vmem:[#allocation4 + $0xb8] sm:$0xff] %vm1914_vm1, %v2003_v50  ;;  %v2018_v3 = vpop.permute.xlu1 %2017  ;;  %v2082_v53 = vld [vmem:[#allocation4 + $0x18] sm:$0xff]  ;;  %v2078_v50 = vld [vmem:[%s6463_s5 + $0x38] sm:$0xff] }
 0x4b0   :  { %v2023_v58 = vsel %vm725_vm14, %v2016_v54, %v2018_v3  ;;  %2030 = vst.msk [vmem:[#allocation4 + $0xc8] sm:$0xff] %vm1914_vm1, %v2018_v3  ;;  %v2072_v54 = vld [vmem:[%s6463_s5 + $0x8] sm:$0xff] }
 0x4b5   :  { %v1961_v40 = vpop.permute.xlu0 %1960 }
 0x4b6   :  { %v5705_v39 = vpop.permute.xlu2 %1924  ;;  %1974 = vst.msk [vmem:[#allocation4 + $0x68] sm:$0xff] %vm1914_vm1, %v1961_v40  ;;  %v2102_v18 = vld [vmem:[#allocation4 + $0xb8] sm:$0xff] }
 0x4b7   :  { %1937 = vst.msk [vmem:[#allocation4 + $0x28] sm:$0xff] %vm1914_vm1, %v5705_v39  ;;  %v1999_v37 = vpop.permute.xlu1 %1998  ;;  %v2104_v12 = vld [vmem:[#allocation4 + $0xc8] sm:$0xff] }
 0x4b8   :  { %v2005_v46 = vsel %vm2004_vm12, %v1997_v38, %v1999_v37  ;;  %2012 = vst.msk [vmem:[#allocation4 + $0xa8] sm:$0xff] %vm1914_vm1, %v1999_v37  ;;  %v2116_v38 = vld [vmem:[%s6464_s6 + $0x8] sm:$0xff] }
 0x4b9   :  { %2126 = vperm.xlu2 %4070, %v2116_v38  }
 0x4bd   :  { %v2022_v13 = vpop.permute.xlu0 %2021  ;;  %v2092_v28 = vld [vmem:[#allocation4 + $0x68] sm:$0xff] }
 0x4be   :  { %v1947_v41 = vpop.permute.xlu2 %1946  ;;  %v2024_v0 = vsel %vm725_vm14, %v2020_v45, %v2022_v13  ;;  %2032 = vst.msk [vmem:[#allocation4 + $0xd8] sm:$0xff] %vm1914_vm1, %v2022_v13  ;;  %vm2060_vm14 = vcmask 867328   ;;  %v2084_v62 = vld [vmem:[#allocation4 + $0x28] sm:$0xff]  ;;  %v2076_v45 = vld [vmem:[%s6463_s5 + $0x28] sm:$0xff] }
 0x4bf   :  { %1957 = vst.msk [vmem:[#allocation4 + $0x58] sm:$0xff] %vm1914_vm1, %v1947_v41  ;;  %v1943_v52 = vpop.permute.xlu1 %1942  ;;  %v2100_v19 = vld [vmem:[#allocation4 + $0xa8] sm:$0xff] }
 0x4c0   :  { %1955 = vst.msk [vmem:[#allocation4 + $0x48] sm:$0xff] %vm1914_vm1, %v1943_v52 }
 0x4c5   :  { %v1959_v49 = vpop.permute.xlu0 %1958  ;;  %v2106_v1 = vld [vmem:[#allocation4 + $0xd8] sm:$0xff] }
 0x4c6   :  { %v5715_v44 = vpop.permute.xlu2 %2058  ;;  %v1967_v5 = vsel %vm1966_vm13, %v1959_v49, %v1961_v40  ;;  %v2090_v29 = vld [vmem:[#allocation4 + $0x58] sm:$0xff] }
 0x4c7   :  { %2070 = vst.msk [vmem:[#allocation4 + $0x118] sm:$0xff] %vm1914_vm1, %v5715_v44  ;;  %v2040_v7 = vpop.permute.xlu1 %2039  ;;  %v2088_v33 = vld [vmem:[#allocation4 + $0x48] sm:$0xff] }
 0x4c8   :  { %v2043_v48 = vsel %vm2041_vm5, %v2038_v43, %v2040_v7  ;;  %2051 = vst.msk [vmem:[#allocation4 + $0xf8] sm:$0xff] %vm1914_vm1, %v2040_v7  ;;  %v2073_v43 = vld [vmem:[%s6463_s5 + $0x10] sm:$0xff] }
 0x4c9   :  { %2152 = vmatpush.msra.mxu1 %v2043_v48 }
 0x4cb   :  { %2153 = vmatpush.msra.mxu1 %v2042_v51 }
 0x4cd   :  { %v1984_v60 = vpop.permute.xlu0 %1983  ;;  %2154 = vmatpush.msra.mxu1 %v2024_v0 }
 0x4ce   :  { %v1987_v9 = vsel %vm1985_vm6, %v1982_v4, %v1984_v60  ;;  %1995 = vst.msk [vmem:[#allocation4 + $0x98] sm:$0xff] %vm1914_vm1, %v1984_v60  ;;  %v2114_v14 = vld [vmem:[#allocation4 + $0x118] sm:$0xff]  ;;  %v1927_v57 = vpop.permute.xlu2 %1926  ;;  %v2077_v4 = vld [vmem:[%s6463_s5 + $0x30] sm:$0xff] }
 0x4cf   :  { %2253 = vmatpush.msra.mxu3 %v2114_v14  ;;  %v1963_v6 = vpop.permute.xlu1 %1962  ;;  %2155 = vmatpush.msra.mxu1 %v2023_v58  ;;  %v2110_v8 = vld [vmem:[#allocation4 + $0xf8] sm:$0xff] }
 0x4d0   :  { %2210 = vmatpush.msrb.mxu2 %v2110_v8 }
 0x4d1   :  { %2156 = vmatpush.msra.mxu1 %v2006_v56 }
 0x4d2   :  { %2211 = vmatpush.msrb.mxu2 %v2108_v10 }
 0x4d3   :  { %2157 = vmatpush.msra.mxu1 %v2005_v46 }
 0x4d4   :  { %2212 = vmatpush.msrb.mxu2 %v2106_v1 }
 0x4d5   :  { %v1929_v2 = vpop.permute.xlu0 %1928  ;;  %2158 = vmatpush.msra.mxu1 %v1987_v9  ;;  %v2098_v20 = vld [vmem:[#allocation4 + $0x98] sm:$0xff] }
 0x4d6   :  { %v1931_v11 = vsel %vm582_vm8, %v1927_v57, %v1929_v2  ;;  %1939 = vst.msk [vmem:[#allocation4 + $0x38] sm:$0xff] %vm1914_vm1, %v1929_v2  ;;  %2213 = vmatpush.msrb.mxu2 %v2104_v12  ;;  %v2053_v32 = vpop.permute.xlu2 %2052 }
 0x4d7   :  { %v1965_v15 = vpop.permute.xlu1 %1964  ;;  %2159 = vmatpush.msra.mxu1 %v1986_v59  ;;  %v2075_v59 = vld [vmem:[%s6463_s5 + $0x20] sm:$0xff] }
 0x4d8   :  { %v1968_v16 = vsel %vm1966_vm13, %v1963_v6, %v1965_v15  ;;  %1976 = vst.msk [vmem:[#allocation4 + $0x78] sm:$0xff] %vm1914_vm1, %v1965_v15  ;;  %2214 = vmatpush.msrb.mxu2 %v2102_v18 }
 0x4d9   :  { %2160 = vmatpush.msra.mxu1 %v1968_v16 }
 0x4da   :  { %2215 = vmatpush.msrb.mxu2 %v2100_v19 }
 0x4db   :  { %2161 = vmatpush.msra.mxu1 %v1967_v5 }
 0x4dc   :  { %2216 = vmatpush.msrb.mxu2 %v2098_v20 }
 0x4dd   :  { %v1941_v22 = vpop.permute.xlu0 %1940  ;;  %v2086_v36 = vld [vmem:[#allocation4 + $0x38] sm:$0xff] }
 0x4de   :  { %v1948_v23 = vsel %vm618_vm10, %v1941_v22, %v1943_v52  ;;  %2217 = vmatpush.msrb.mxu2 %v2096_v24 }
 0x4df   :  { %v1945_v25 = vpop.permute.xlu1 %1944  ;;  %v2094_v26 = vld [vmem:[#allocation4 + $0x78] sm:$0xff] }
 0x4e0   :  { %v1949_v27 = vsel %vm618_vm10, %v1945_v25, %v1947_v41  ;;  %2218 = vmatpush.msrb.mxu2 %v2094_v26  ;;  %vm2139_vm10 = vcmask 130048  }
 0x4e1   :  { %2162 = vmatpush.msra.mxu1 %v1949_v27 }
 0x4e2   :  { %2219 = vmatpush.msrb.mxu2 %v2092_v28 }
 0x4e3   :  { %2163 = vmatpush.msra.mxu1 %v1948_v23 }
 0x4e4   :  { %2220 = vmatpush.msrb.mxu2 %v2090_v29 }
 0x4e5   :  { %v1923_v30 = vpop.permute.xlu0 %1922  ;;  %2164 = vmatpush.msra.mxu1 %v1931_v11 }
 0x4e6   :  { %v1930_v31 = vsel %vm582_vm8, %v1923_v30, %v5705_v39  ;;  %2221 = vmatpush.msrb.mxu2 %v2088_v33 }
 0x4e7   :  { %v2055_v34 = vpop.permute.xlu1 %2054  ;;  %2165 = vmatpush.msra.mxu1 %v1930_v31 }
 0x4e8   :  { %v2061_v35 = vsel %vm2060_vm14, %v2053_v32, %v2055_v34  ;;  %2068 = vst.msk [vmem:[#allocation4 + $0x108] sm:$0xff] %vm1914_vm1, %v2055_v34  ;;  %2222 = vmatpush.msrb.mxu2 %v2086_v36  ;;  %vm2473_vm1 = vcmask 318464  }
 0x4e9   :  { %2166 = vmatpush.msra.mxu1 %v5647_v17 }
 0x4ea   :  { %2223 = vmatpush.msrb.mxu2 %v2084_v62 }
 0x4eb   :  { %2167 = vmatpush.msra.mxu1 %v5639_v55 }
 0x4ec   :  { %2168 = vmatmul.f32.vlgmr.msra.gmra.mxu1 %v2071_v63  ;;  %2224 = vmatpush.msrb.mxu2 %v2082_v53 }
 0x4ed   :  { %v2137_v46 = vpop.permute.xlu0 %2136 }
 0x4ee   :  { %2225 = vmatpush.msrb.mxu2 %v2080_v61 }
 0x4ef   :  { %v2057_v17 = vpop.permute.xlu1 %2056  ;;  %v2112_v51 = vld [vmem:[#allocation4 + $0x108] sm:$0xff]  ;;  %2226 = vmatmul.f32.vlgmr.msrb.gmra.mxu2 %v2071_v63 }
 0x4f0   :  { %v2062_v55 = vsel %vm2060_vm14, %v2057_v17, %v5715_v44  ;;  %2254 = vmatpush.msra.mxu3 %v2112_v51 }
 0x4f1   :  { %3940 = vmatmul.msk.f32.vlgmr.msra.gmra.mxu3 %vm2139_vm10, %v2072_v54  ;;  %2195 = vmatpush.msra.mxu0 %v2062_v55 }
 0x4f3   :  { %2196 = vmatpush.msra.mxu0 %v2061_v35 }
 0x4f4   :  { %2171 = vmatmul.f32.gmra.mxu1 %v2073_v43  ;;  %3936 = vmatmul.msk.f32.vlgmr.msra.gmra.mxu0 %vm2139_vm10, %v2072_v54 }
 0x4f5   :  { %v2122_v7 = vpop.permute.xlu0 %2121 }
 0x4f7   :  { %2229 = vmatmul.f32.gmra.mxu2 %v2073_v43  ;;  %v2132_v49 = vpop.permute.xlu1 %2131 }
 0x4f9   :  { %3941 = vmatmul.msk.f32.gmra.mxu3 %vm2139_vm10, %v2074_v42 }
 0x4fc   :  { %2174 = vmatmul.f32.gmra.mxu1 %v2075_v59  ;;  %3937 = vmatmul.msk.f32.gmra.mxu0 %vm2139_vm10, %v2074_v42 }
 0x4ff   :  { %2232 = vmatmul.f32.gmra.mxu2 %v2075_v59 }
 0x501   :  { %3942 = vmatmul.msk.f32.gmra.mxu3 %vm2139_vm10, %v2076_v45 }
 0x504   :  { %2177 = vmatmul.f32.gmra.mxu1 %v2077_v4  ;;  %3938 = vmatmul.msk.f32.gmra.mxu0 %vm2139_vm10, %v2076_v45 }
 0x507   :  { %2235 = vmatmul.f32.gmra.mxu2 %v2077_v4 }
 0x509   :  { %3943 = vmatmul.msk.f32.gmra.mxu3 %vm2139_vm10, %v2078_v50 }
 0x50c   :  { %3939 = vmatmul.msk.f32.gmra.mxu0 %vm2139_vm10, %v2078_v50 }
 0x513   :  { %v2127_v2 = vpop.permute.xlu2 %2126 }
 0x569   :  { %v2169_v56 = vpop.f32.mrf.mxu1 }
 0x56a   :  { %v2170_v63 = vadd.f32 %v2169_v56, %v2122_v7 }
 0x571   :  { %v2172_v3 = vpop.f32.mrf.mxu1  ;;  %v2198_v58 = vpop.f32.mrf.mxu0 }
 0x572   :  { %v2227_v40 = vpop.f32.mrf.mxu2  ;;  %v2173_v20 = vadd.f32 %v2172_v3, %v2127_v2  ;;  %v2199_v53 = vadd.f32 %v2198_v58, %v2170_v63 }
 0x573   :  { %v2228_v9 = vadd.f32 %v2227_v40, %v2122_v7  ;;  %v2381_v7 = vld [vmem:[%s6465_s7 + $0x8] sm:$0xff] }
 0x574   :  { %v2256_v39 = vpop.f32.mrf.mxu3  ;;  %v2276_v54 = vmul.f32 0.01, %v2199_v53  ;;  %vm2268_vm9 = vcmp.ge.f32.partialorder %v2199_v53, 0.0 }
 0x575   :  { %v2257_v1 = vadd.f32 %v2256_v39, %v2228_v9  ;;  %v2384_v9 = vld [vmem:[%s6465_s7 + $0x20] sm:$0xff] }
 0x576   :  { %v2284_v61 = vsel %vm2268_vm9, %v2199_v53, %v2276_v54 }
 0x577   :  { %v2277_v24 = vmul.f32 0.01, %v2257_v1  ;;  %vm2269_vm0 = vcmp.ge.f32.partialorder %v2257_v1, 0.0 }
 0x579   :  { %v2201_v37 = vpop.f32.mrf.mxu0  ;;  %v2175_v13 = vpop.f32.mrf.mxu1  ;;  %v2285_v34 = vsel %vm2269_vm0, %v2257_v1, %v2277_v24 }
 0x57a   :  { %v2230_v41 = vpop.f32.mrf.mxu2  ;;  %v2176_v48 = vadd.f32 %v2175_v13, %v2132_v49  ;;  %v2202_v30 = vadd.f32 %v2201_v37, %v2173_v20 }
 0x57b   :  { %v2231_v25 = vadd.f32 %v2230_v41, %v2127_v2 }
 0x57c   :  { %v2259_v0 = vpop.f32.mrf.mxu3  ;;  %v2278_v35 = vmul.f32 0.01, %v2202_v30  ;;  %vm2270_vm3 = vcmp.ge.f32.partialorder %v2202_v30, 0.0 }
 0x57d   :  { %v2260_v32 = vadd.f32 %v2259_v0, %v2231_v25 }
 0x57e   :  { %v2286_v62 = vsel %vm2270_vm3, %v2202_v30, %v2278_v35 }
 0x57f   :  { %v2279_v36 = vmul.f32 0.01, %v2260_v32  ;;  %vm2271_vm7 = vcmp.ge.f32.partialorder %v2260_v32, 0.0 }
 0x581   :  { %v2204_v52 = vpop.f32.mrf.mxu0  ;;  %v2178_v14 = vpop.f32.mrf.mxu1  ;;  %v2287_v38 = vsel %vm2271_vm7, %v2260_v32, %v2279_v36 }
 0x582   :  { %v2233_v44 = vpop.f32.mrf.mxu2  ;;  %v2205_v8 = vadd.f32 %v2204_v52, %v2176_v48  ;;  %v2179_v57 = vadd.f32 %v2178_v14, %v2137_v46  ;;  %v2382_v48 = vld [vmem:[%s6465_s7 + $0x10] sm:$0xff]  ;;  %v2385_v14 = vld [vmem:[%s6465_s7 + $0x28] sm:$0xff] }
 0x583   :  { %v2234_v60 = vadd.f32 %v2233_v44, %v2132_v49  ;;  %v2380_v49 = vld [vmem:[%s6465_s7] sm:$0xff] }
 0x584   :  { %v2262_v5 = vpop.f32.mrf.mxu3  ;;  %v2280_v12 = vmul.f32 0.01, %v2205_v8  ;;  %vm2272_vm15 = vcmp.ge.f32.partialorder %v2205_v8, 0.0 }
 0x585   :  { %v2263_v6 = vadd.f32 %v2262_v5, %v2234_v60  ;;  %v2383_v60 = vld [vmem:[%s6465_s7 + $0x18] sm:$0xff] }
 0x586   :  { %v2288_v27 = vsel %vm2272_vm15, %v2205_v8, %v2280_v12  ;;  %v2387_v8 = vld [vmem:[%s6465_s7 + $0x38] sm:$0xff] }
 0x587   :  { %v2281_v10 = vmul.f32 0.01, %v2263_v6  ;;  %vm2273_vm11 = vcmp.ge.f32.partialorder %v2263_v6, 0.0 }
 0x589   :  { %v2207_v11 = vpop.f32.mrf.mxu0  ;;  %v2289_v15 = vsel %vm2273_vm11, %v2263_v6, %v2281_v10  ;;  %v2386_v6 = vld [vmem:[%s6465_s7 + $0x30] sm:$0xff]  ;;  %v2388_v10 = vld [vmem:[%s6465_s7 + $0x40] sm:$0xff]  ;;  %s4126_s7 = smov 32  }
 0x58a   :  { %v2208_v16 = vadd.f32 %v2207_v11, %v2179_v57  ;;  %v2236_v18 = vpop.f32.mrf.mxu2  ;;  %2310 = vrot.lane.b32.xlu2 %v2289_v15, %s4124_s26 }
 0x58b   :  { %v2237_v22 = vadd.f32 %v2236_v18, %v2137_v46 }
 0x58c   :  { %v2265_v19 = vpop.f32.mrf.mxu3  ;;  %vm2274_vm2 = vcmp.ge.f32.partialorder %v2208_v16, 0.0  ;;  %v2282_v23 = vmul.f32 0.01, %v2208_v16 }
 0x58d   :  { %v2266_v26 = vadd.f32 %v2265_v19, %v2237_v22 }
 0x58e   :  { %v2290_v28 = vsel %vm2274_vm2, %v2208_v16, %v2282_v23  ;;  %v6535_v16 = vlaneseq }
 0x58f   :  { %v4071_v29 = vpack.i.bf16 %v2288_v27, %v2290_v28  ;;  %v2283_v31 = vmul.f32 0.01, %v2266_v26  ;;  %vm2275_vm4 = vcmp.ge.f32.partialorder %v2266_v26, 0.0 }
 0x590   :  { %v5824_v18 = vand.u32 127, %v6535_v16 }
 0x591   :  { %4072 = vrot.lane.b32.xlu0 %v4071_v29, %s4124_s26  ;;  %v2291_v33 = vsel %vm2275_vm4, %v2266_v26, %v2283_v31 }
 0x592   :  { %2314 = vrot.lane.b32.xlu1 %v2291_v33, %s4124_s26  ;;  %2302 = vrot.lane.b32.xlu2 %v2285_v34, %s4124_s26  ;;  %v5828_v22 = vadd.s32 128, %v5824_v18 }
 0x599   :  { %2304 = vrot.lane.b32.xlu0 %v2286_v62, %s4124_s26 }
 0x59a   :  { %2306 = vrot.lane.b32.xlu1 %v2287_v38, %s4124_s26 }
 0x5a2   :  { %2300 = vrot.lane.b32.xlu1 %v2284_v61, %s4124_s26 }
 0x5e4   :  { %v2311_v17 = vpop.permute.xlu2 %2310 }
 0x5e5   :  { %v2333_v51 = vmax.f32 %v2289_v15, %v2311_v17 }
 0x5e7   :  { %2354 = vrot.lane.b32.xlu0 %v2333_v51, %s4111_s23 }
 0x5ec   :  { %v2303_v55 = vpop.permute.xlu2 %2302 }
 0x5ed   :  { %v2329_v43 = vmax.f32 %v2285_v34, %v2303_v55 }
 0x5ef   :  { %2346 = vrot.lane.b32.xlu0 %v2329_v43, %s4111_s23 }
 0x603   :  { %v4073_v42 = vpop.permute.xlu0 %4072 }
 0x604   :  { %v4075_v59 = vunpack.i.h.bf16 %v4073_v42  ;;  %v4074_v45 = vunpack.i.l.bf16 %v4073_v42  ;;  %v2315_v4 = vpop.permute.xlu1 %2314 }
 0x605   :  { %v2335_v50 = vmax.f32 %v2291_v33, %v2315_v4 }
 0x606   :  { %v2318_v56 = vsel %vm1966_vm13, %v4075_v59, %v2311_v17  ;;  %v2319_v3 = vsel %vm1966_vm13, %v4074_v45, %v2315_v4 }
 0x607   :  { %v5784_v58 = vmax.f32 %v2288_v27, %v2318_v56  ;;  %v2334_v40 = vmax.f32 %v2290_v28, %v2319_v3  ;;  %2358 = vrot.lane.b32.xlu2 %v2335_v50, %s4111_s23 }
 0x609   :  { %v4076_v39 = vpack.i.bf16 %v5784_v58, %v2334_v40 }
 0x60b   :  { %v2305_v37 = vpop.permute.xlu0 %2304  ;;  %4077 = vrot.lane.b32.xlu1 %v4076_v39, %s4111_s23 }
 0x60c   :  { %v2307_v46 = vpop.permute.xlu1 %2306 }
 0x60d   :  { %v2331_v13 = vmax.f32 %v2287_v38, %v2307_v46  ;;  %v2317_v41 = vsel %vm1966_vm13, %v2305_v37, %v2307_v46 }
 0x60e   :  { %v2330_v0 = vmax.f32 %v2286_v62, %v2317_v41 }
 0x60f   :  { %2350 = vrot.lane.b32.xlu2 %v2331_v13, %s4111_s23 }
 0x613   :  { %2348 = vrot.lane.b32.xlu1 %v2330_v0, %s4111_s23 }
 0x614   :  { %v2301_v52 = vpop.permute.xlu1 %2300 }
 0x615   :  { %v2316_v44 = vsel %vm1966_vm13, %v2301_v52, %v2303_v55 }
 0x616   :  { %v2328_v5 = vmax.f32 %v2284_v61, %v2316_v44 }
 0x617   :  { %2393 = vperm.xlu2 %4070, %v2380_v49  }
 0x618   :  { %2344 = vrot.lane.b32.xlu0 %v2328_v5, %s4111_s23 }
 0x61b   :  { %2396 = vperm.xlu1 %4034, %v2381_v7  }
 0x61f   :  { %2399 = vperm.xlu2 %4070, %v2382_v48  }
 0x620   :  { %2402 = vperm.xlu0 %4033, %v2383_v60  }
 0x623   :  { %2405 = vperm.xlu1 %4034, %v2384_v9  }
 0x627   :  { %2408 = vperm.xlu2 %4070, %v2385_v14  }
 0x628   :  { %2411 = vperm.xlu0 %4033, %v2386_v6  }
 0x62b   :  { %2414 = vperm.xlu1 %4034, %v2387_v8  }
 0x62f   :  { %2417 = vperm.xlu2 %4070, %v2388_v10  }
 0x659   :  { %v2355_v57 = vpop.permute.xlu0 %2354 }
 0x65a   :  { %v2377_v11 = vmax.f32 %v2333_v51, %v2355_v57 }
 0x661   :  { %v2359_v1 = vpop.permute.xlu2 %2358  ;;  %v2347_v19 = vpop.permute.xlu0 %2346 }
 0x662   :  { %v2379_v2 = vmax.f32 %v2335_v50, %v2359_v1  ;;  %v2373_v20 = vmax.f32 %v2329_v43, %v2347_v19 }
 0x664   :  { %3971 = vmatpush.xpose.msk.msrb.mxu3 %vm2473_vm1, %v2379_v2 }
 0x668   :  { %3972 = vmatpush.xpose.msk.msrb.mxu3 %vm2473_vm1, %v2377_v11 }
 0x669   :  { %v2351_v12 = vpop.permute.xlu2 %2350 }
 0x66a   :  { %v2375_v15 = vmax.f32 %v2331_v13, %v2351_v12 }
 0x66c   :  { %3973 = vmatpush.xpose.msk.msrb.mxu3 %vm2473_vm1, %v2375_v15 }
 0x670   :  { %3974 = vmatpush.xpose.msk.msrb.mxu3 %vm2473_vm1, %v2373_v20 }
 0x671   :  { %v2394_v23 = vpop.permute.xlu2 %2393 }
 0x672   :  { %vm2420_vm5 = vcmp.eq.s32.totalorder %v5828_v22, %v2394_v23  ;;  %vm2419_vm12 = vcmp.eq.s32.totalorder %v5824_v18, %v2394_v23 }
 0x673   :  { %v3945_v24 = vsel %vm2420_vm5, 1.0, %v6518_v21 }
 0x674   :  { %3975 = vmatmul.msk.f32.vlgmr.msrb.gmra.mxu3 %vm2473_vm1, %v3945_v24 }
 0x679   :  { %v2400_v38 = vpop.permute.xlu2 %2399 }
 0x67a   :  { %vm2424_vm13 = vcmp.eq.s32.totalorder %v5828_v22, %v2400_v38  ;;  %vm2423_vm10 = vcmp.eq.s32.totalorder %v5824_v18, %v2400_v38 }
 0x67b   :  { %v3949_v54 = vsel %vm2424_vm13, 1.0, %v6518_v21  ;;  %vm2601_vm13 = vcmask 261120  }
 0x67d   :  { %v4078_v25 = vpop.permute.xlu1 %4077 }
 0x67e   :  { %v4080_v26 = vunpack.i.h.bf16 %v4078_v25  ;;  %v4079_v27 = vunpack.i.l.bf16 %v4078_v25 }
 0x680   :  { %v2363_v28 = vsel %vm582_vm8, %v4079_v27, %v2359_v1  ;;  %v2362_v30 = vsel %vm582_vm8, %v4080_v26, %v2355_v57 }
 0x681   :  { %v2378_v29 = vmax.f32 %v2334_v40, %v2363_v28  ;;  %v2376_v32 = vmax.f32 %v5784_v58, %v2362_v30  ;;  %v2409_v43 = vpop.permute.xlu2 %2408 }
 0x682   :  { %vm2430_vm2 = vcmp.eq.s32.totalorder %v5828_v22, %v2409_v43  ;;  %vm2429_vm3 = vcmp.eq.s32.totalorder %v5824_v18, %v2409_v43 }
 0x683   :  { %2525 = vmatpush.xpose.msrb.mxu0 %v2378_v29  ;;  %v3955_v42 = vsel %vm2430_vm2, 1.0, %v6518_v21  ;;  %vm6538_vm2 = vcmask 1043456  }
 0x685   :  { %v2349_v31 = vpop.permute.xlu1 %2348 }
 0x686   :  { %v2361_v33 = vsel %vm582_vm8, %v2349_v31, %v2351_v12 }
 0x687   :  { %2526 = vmatpush.xpose.msrb.mxu0 %v2376_v32  ;;  %v2374_v34 = vmax.f32 %v2330_v0, %v2361_v33 }
 0x689   :  { %v2418_v56 = vpop.permute.xlu2 %2417 }
 0x68a   :  { %v2345_v35 = vpop.permute.xlu0 %2344  ;;  %vm2436_vm5 = vcmp.eq.s32.totalorder %v5828_v22, %v2418_v56 }
 0x68b   :  { %2527 = vmatpush.xpose.msrb.mxu0 %v2374_v34  ;;  %v2360_v36 = vsel %vm582_vm8, %v2345_v35, %v2347_v19  ;;  %v3961_v3 = vsel %vm2436_vm5, 1.0, %v6518_v21 }
 0x68c   :  { %v2372_v63 = vmax.f32 %v2328_v5, %v2360_v36 }
 0x68d   :  { %v2397_v62 = vpop.permute.xlu1 %2396 }
 0x68e   :  { %vm2422_vm6 = vcmp.eq.s32.totalorder %v5828_v22, %v2397_v62  ;;  %vm2421_vm8 = vcmp.eq.s32.totalorder %v5824_v18, %v2397_v62 }
 0x68f   :  { %2528 = vmatpush.xpose.msrb.mxu0 %v2372_v63  ;;  %v3947_v53 = vsel %vm2422_vm6, 1.0, %v6518_v21 }
 0x690   :  { %3976 = vmatmul.msk.f32.gmra.mxu3 %vm2473_vm1, %v3947_v53 }
 0x692   :  { %3962 = vmatmul.msk.f32.vlgmr.msrb.gmra.mxu0 %vm2419_vm12, %v6505_v47  ;;  %v2403_v61 = vpop.permute.xlu0 %2402  ;;  %vm2435_vm12 = vcmp.eq.s32.totalorder %v5824_v18, %v2418_v56 }
 0x693   :  { %vm2426_vm14 = vcmp.eq.s32.totalorder %v5828_v22, %v2403_v61  ;;  %vm2425_vm15 = vcmp.eq.s32.totalorder %v5824_v18, %v2403_v61 }
 0x694   :  { %v3951_v17 = vsel %vm2426_vm14, 1.0, %v6518_v21  ;;  %vm6536_vm14 = vcmask 1046528  }
 0x695   :  { %v2406_v51 = vpop.permute.xlu1 %2405 }
 0x696   :  { %vm2428_vm11 = vcmp.eq.s32.totalorder %v5828_v22, %v2406_v51  ;;  %vm2427_vm0 = vcmp.eq.s32.totalorder %v5824_v18, %v2406_v51 }
 0x697   :  { %v3953_v55 = vsel %vm2428_vm11, 1.0, %v6518_v21  ;;  %vm2882_vm11 = vcmask 1042432  }
 0x698   :  { %3977 = vmatmul.msk.f32.gmra.mxu3 %vm2473_vm1, %v3949_v54 }
 0x69a   :  { %3963 = vmatmul.msk.f32.gmra.mxu0 %vm2421_vm8, %v6505_v47  ;;  %v2412_v59 = vpop.permute.xlu0 %2411  ;;  %vm2718_vm8 = vcmask 1041408  }
 0x69b   :  { %vm2432_vm4 = vcmp.eq.s32.totalorder %v5828_v22, %v2412_v59  ;;  %vm2431_vm9 = vcmp.eq.s32.totalorder %v5824_v18, %v2412_v59 }
 0x69c   :  { %v3957_v45 = vsel %vm2432_vm4, 1.0, %v6518_v21  ;;  %vm6540_vm4 = vmmov %vm6536_vm14 }
 0x69d   :  { %v2415_v4 = vpop.permute.xlu1 %2414 }
 0x69e   :  { %vm2434_vm7 = vcmp.eq.s32.totalorder %v5828_v22, %v2415_v4  ;;  %vm2433_vm6 = vcmp.eq.s32.totalorder %v5824_v18, %v2415_v4 }
 0x69f   :  { %v3959_v50 = vsel %vm2434_vm7, 1.0, %v6518_v21 }
 0x6a0   :  { %3978 = vmatmul.msk.f32.gmra.mxu3 %vm2473_vm1, %v3951_v17 }
 0x6a2   :  { %3964 = vmatmul.msk.f32.gmra.mxu0 %vm2423_vm10, %v6505_v47  ;;  %vm2668_vm10 = vcmask 1045504  }
 0x6a8   :  { %3979 = vmatmul.msk.f32.gmra.mxu3 %vm2473_vm1, %v3953_v55 }
 0x6aa   :  { %3965 = vmatmul.msk.f32.gmra.mxu0 %vm2425_vm15, %v6505_v47  ;;  %vm6537_vm15 = vmmov %vm6536_vm14 }
 0x6b0   :  { %3980 = vmatmul.msk.f32.gmra.mxu3 %vm2473_vm1, %v3955_v42 }
 0x6b2   :  { %3966 = vmatmul.msk.f32.gmra.mxu0 %vm2427_vm0, %v6505_v47  ;;  %vm6539_vm0 = vmmov %vm6538_vm2 }
 0x6b3   :  { %vm6541_vm7 = vmmov %vm6539_vm0 }
 0x6b4   :  { %vm6543_vm5 = vmmov %vm6539_vm0 }
 0x6b8   :  { %3981 = vmatmul.msk.f32.gmra.mxu3 %vm2473_vm1, %v3957_v45 }
 0x6ba   :  { %3967 = vmatmul.msk.f32.gmra.mxu0 %vm2429_vm3, %v6505_v47  ;;  %vm2609_vm3 = vcmask 254976  }
 0x6c0   :  { %3982 = vmatmul.msk.f32.gmra.mxu3 %vm2473_vm1, %v3959_v50 }
 0x6c2   :  { %3968 = vmatmul.msk.f32.gmra.mxu0 %vm2431_vm9, %v6505_v47  ;;  %vm6542_vm9 = vmmov %vm6540_vm4 }
 0x6c8   :  { %3983 = vmatmul.msk.f32.gmra.mxu3 %vm2473_vm1, %v3961_v3  ;;  %vm2769_vm1 = vcmask 1040384  }
 0x6ca   :  { %3969 = vmatmul.msk.f32.gmra.mxu0 %vm2433_vm6, %v6505_v47  ;;  %vm6544_vm6 = vmmov %vm6540_vm4 }
 0x6d2   :  { %3970 = vmatmul.msk.f32.gmra.mxu0 %vm2435_vm12, %v6505_v47  ;;  %vm6545_vm12 = vmmov %vm6539_vm0 }
 0x6f7   :  { %v2574_v58 = vpop.f32.mrf.mxu3 }
 0x70f   :  { %v2530_v40 = vpop.f32.mrf.mxu0 }
 0x710   :  { %v2575_v39 = vadd.f32 %v2574_v58, %v2530_v40 }
 0x712   :  { %2602 = vst.msk [vmem:[#allocation5] sm:$0xff] %vm2601_vm13, %v2575_v39  ;;  %v2719_v41 = vrot.slane %v2575_v39, 6  ;;  %v2619_v47 = vrot.slane %v2575_v39, 1  ;;  %v2770_v44 = vrot.slane %v2575_v39, 7  ;;  %v2669_v6 = vrot.slane %v2575_v39, 2 }
 0x713   :  { %v2577_v37 = vpop.f32.mrf.mxu3 }
 0x717   :  { %v2533_v46 = vpop.f32.mrf.mxu0 }
 0x718   :  { %v5882_v13 = vadd.f32 %v2577_v37, %v2533_v46 }
 0x71a   :  { %2803 = vrot.lane.b32.xlu1 %v5882_v13, %s4126_s7  ;;  %v2720_v0 = vrot.slane %v5882_v13, 6  ;;  %v2620_v52 = vrot.slane %v5882_v13, 1  ;;  %2603 = vst.msk [vmem:[#allocation5 + $0x18] sm:$0xff] %vm2601_vm13, %v5882_v13  ;;  %v2771_v5 = vrot.slane %v5882_v13, 7  ;;  %v2670_v60 = vrot.slane %v5882_v13, 2 }
 0x71b   :  { %v2580_v49 = vpop.f32.mrf.mxu3  ;;  %v2883_v24 = vrot.slane %v5882_v13, 5  ;;  %v2835_v63 = vrot.slane %v5882_v13, 4 }
 0x71c   :  { %v2721_v7 = vsel %vm2718_vm8, %v2719_v41, %v2720_v0  ;;  %v2621_v48 = vsel %vm6536_vm14, %v2619_v47, %v2620_v52  ;;  %v2772_v9 = vsel %vm2769_vm1, %v2770_v44, %v2771_v5  ;;  %v2671_v10 = vsel %vm2668_vm10, %v2669_v6, %v2670_v60  ;;  %vm6547_vm14 = vmmov %vm6540_vm4 }
 0x71d   :  { %2734 = vrot.lane.b32.xlu2 %v2721_v7, %s4127_s29  ;;  %2634 = vrot.lane.b32.xlu0 %v2621_v48, %s4126_s7  ;;  %2795 = vst.msk [vmem:[#allocation5 + $0x8] sm:$0xff] %vm2601_vm13, %v2772_v9 }
 0x71f   :  { %v2536_v14 = vpop.f32.mrf.mxu0 }
 0x720   :  { %v5898_v8 = vadd.f32 %v2580_v49, %v2536_v14 }
 0x722   :  { %2684 = vrot.lane.b32.xlu1 %v2671_v10, %s4128_s30  ;;  %v2722_v57 = vrot.slane %v5898_v8, 6  ;;  %2604 = vst.msk [vmem:[#allocation5 + $0x30] sm:$0xff] %vm2601_vm13, %v5898_v8  ;;  %v2773_v2 = vrot.slane %v5898_v8, 7  ;;  %v2672_v12 = vrot.slane %v5898_v8, 2  ;;  %v2884_v20 = vrot.slane %v5898_v8, 5 }
 0x723   :  { %v2583_v1 = vpop.f32.mrf.mxu3  ;;  %v2622_v22 = vrot.slane %v5898_v8, 1  ;;  %v2836_v35 = vrot.slane %v5898_v8, 4 }
 0x724   :  { %v2723_v11 = vsel %vm2718_vm8, %v2720_v0, %v2722_v57  ;;  %v2774_v15 = vsel %vm2769_vm1, %v2771_v5, %v2773_v2  ;;  %v2673_v23 = vsel %vm2668_vm10, %v2670_v60, %v2672_v12  ;;  %v2885_v28 = vsel %vm2882_vm11, %v2883_v24, %v2884_v20 }
 0x725   :  { %2805 = vrot.lane.b32.xlu0 %v5898_v8, %s4126_s7  ;;  %2736 = vrot.lane.b32.xlu2 %v2723_v11, %s4127_s29  ;;  %2940 = vst.msk [vmem:[#allocation5 + $0x10] sm:$0xff] %vm2601_vm13, %v2723_v11  ;;  %v2623_v29 = vsel %vm6537_vm15, %v2620_v52, %v2622_v22  ;;  %v2837_v54 = vsel %vm6538_vm2, %v2835_v63, %v2836_v35  ;;  %v2984_v63 = vld [vmem:[%s6466_s8 + $0x60] sm:$0xff]  ;;  %vm6548_vm15 = vmmov %vm6540_vm4  ;;  %vm2658_vm2 = vcmask 523520  }
 0x726   :  { %2796 = vst.msk [vmem:[#allocation5 + $0x20] sm:$0xff] %vm2601_vm13, %v2774_v15 }
 0x727   :  { %v2539_v16 = vpop.f32.mrf.mxu0 }
 0x728   :  { %v5914_v19 = vadd.f32 %v2583_v1, %v2539_v16 }
 0x72a   :  { %2605 = vst.msk [vmem:[#allocation5 + $0x48] sm:$0xff] %vm2601_vm13, %v5914_v19  ;;  %2686 = vrot.lane.b32.xlu1 %v2673_v23, %s4128_s30  ;;  %v2724_v25 = vrot.slane %v5914_v19, 6  ;;  %v2775_v27 = vrot.slane %v5914_v19, 7  ;;  %v2674_v31 = vrot.slane %v5914_v19, 2  ;;  %v2838_v17 = vrot.slane %v5914_v19, 4 }
 0x72b   :  { %v2586_v26 = vpop.f32.mrf.mxu3  ;;  %v2886_v42 = vrot.slane %v5914_v19, 5  ;;  %v2624_v46 = vrot.slane %v5914_v19, 1 }
 0x72c   :  { %v2725_v30 = vsel %vm2718_vm8, %v2722_v57, %v2724_v25  ;;  %v2776_v32 = vsel %vm2769_vm1, %v2773_v2, %v2775_v27  ;;  %v2675_v36 = vsel %vm2668_vm10, %v2672_v12, %v2674_v31  ;;  %v2839_v59 = vsel %vm6539_vm0, %v2836_v35, %v2838_v17 }
 0x72d   :  { %2898 = vrot.lane.b32.xlu2 %v2885_v28, %s4127_s29  ;;  %2636 = vrot.lane.b32.xlu0 %v2623_v29, %s4126_s7  ;;  %2941 = vst.msk [vmem:[#allocation5 + $0x28] sm:$0xff] %vm2601_vm13, %v2725_v30  ;;  %v2887_v56 = vsel %vm2882_vm11, %v2884_v20, %v2886_v42  ;;  %v2625_v47 = vsel %vm6540_vm4, %v2622_v22, %v2624_v46  ;;  %vm2758_vm4 = vcmask 1048320  }
 0x72e   :  { %2797 = vst.msk [vmem:[#allocation5 + $0x38] sm:$0xff] %vm2601_vm13, %v2776_v32  ;;  %v2987_v32 = vld [vmem:[%s6466_s8 + $0x78] sm:$0xff] }
 0x72f   :  { %v2542_v33 = vpop.f32.mrf.mxu0  ;;  %3036 = vmatpush.msrb.mxu1 %v2987_v32  ;;  %3996 = vmatpush.msra.mxu3 %v2987_v32 }
 0x730   :  { %v5934_v34 = vadd.f32 %v2586_v26, %v2542_v33  ;;  %v2986_v33 = vld [vmem:[%s6466_s8 + $0x70] sm:$0xff] }
 0x731   :  { %3037 = vmatpush.msrb.mxu1 %v2986_v33  ;;  %3997 = vmatpush.msra.mxu3 %v2986_v33 }
 0x732   :  { %2606 = vst.msk [vmem:[#allocation5 + $0x60] sm:$0xff] %vm2601_vm13, %v5934_v34  ;;  %2688 = vrot.lane.b32.xlu1 %v2675_v36, %s4128_s30  ;;  %v2726_v62 = vrot.slane %v5934_v34, 6  ;;  %v2777_v38 = vrot.slane %v5934_v34, 7  ;;  %v2676_v58 = vrot.slane %v5934_v34, 2  ;;  %v2840_v44 = vrot.slane %v5934_v34, 4  ;;  %v2985_v36 = vld [vmem:[%s6466_s8 + $0x68] sm:$0xff] }
 0x733   :  { %v2589_v53 = vpop.f32.mrf.mxu3  ;;  %v2888_v60 = vrot.slane %v5934_v34, 5  ;;  %v2626_v12 = vrot.slane %v5934_v34, 1  ;;  %3038 = vmatpush.msrb.mxu1 %v2985_v36  ;;  %3998 = vmatpush.msra.mxu3 %v2985_v36 }
 0x734   :  { %v2727_v61 = vsel %vm2718_vm8, %v2724_v25, %v2726_v62  ;;  %v2778_v51 = vsel %vm2769_vm1, %v2775_v27, %v2777_v38  ;;  %v2677_v13 = vsel %vm2668_vm10, %v2674_v31, %v2676_v58  ;;  %v2841_v9 = vsel %vm6541_vm7, %v2838_v17, %v2840_v44  ;;  %v2981_v17 = vld [vmem:[%s6466_s8 + $0x48] sm:$0xff] }
 0x735   :  { %2850 = vrot.lane.b32.xlu0 %v2837_v54, %s4128_s30  ;;  %2738 = vrot.lane.b32.xlu2 %v2725_v30, %s4127_s29  ;;  %2942 = vst.msk [vmem:[#allocation5 + $0x40] sm:$0xff] %vm2601_vm13, %v2727_v61  ;;  %v2889_v8 = vsel %vm2882_vm11, %v2886_v42, %v2888_v60  ;;  %v2627_v20 = vsel %vm6542_vm9, %v2624_v46, %v2626_v12  ;;  %v2982_v54 = vld [vmem:[%s6466_s8 + $0x50] sm:$0xff]  ;;  %v3001_v46 = vld [vmem:[%s6466_s8 + $0xe8] sm:$0xff]  ;;  %vm2716_vm7 = vcmask 779776   ;;  %vm2766_vm9 = vcmask 1042176  }
 0x736   :  { %2798 = vst.msk [vmem:[#allocation5 + $0x50] sm:$0xff] %vm2601_vm13, %v2778_v51  ;;  %3039 = vmatpush.msrb.mxu1 %v2984_v63  ;;  %3999 = vmatpush.msra.mxu3 %v2984_v63 }
 0x737   :  { %v2545_v55 = vpop.f32.mrf.mxu0 }
 0x738   :  { %v5952_v43 = vadd.f32 %v2589_v53, %v2545_v55  ;;  %v2980_v55 = vld [vmem:[%s6466_s8 + $0x40] sm:$0xff] }
 0x73a   :  { %2607 = vst.msk [vmem:[#allocation5 + $0x78] sm:$0xff] %vm2601_vm13, %v5952_v43  ;;  %2852 = vrot.lane.b32.xlu1 %v2839_v59, %s4128_s30  ;;  %v2728_v45 = vrot.slane %v5952_v43, 6  ;;  %v2779_v50 = vrot.slane %v5952_v43, 7  ;;  %v2678_v15 = vrot.slane %v5952_v43, 2  ;;  %v2842_v25 = vrot.slane %v5952_v43, 4 }
 0x73b   :  { %v2592_v4 = vpop.f32.mrf.mxu3  ;;  %v2890_v26 = vrot.slane %v5952_v43, 5  ;;  %v2628_v27 = vrot.slane %v5952_v43, 1 }
 0x73c   :  { %v2729_v3 = vsel %vm2718_vm8, %v2726_v62, %v2728_v45  ;;  %v2780_v40 = vsel %vm2769_vm1, %v2777_v38, %v2779_v50  ;;  %v2679_v22 = vsel %vm2668_vm10, %v2676_v58, %v2678_v15  ;;  %v2843_v28 = vsel %vm6543_vm5, %v2840_v44, %v2842_v25  ;;  %v2983_v38 = vld [vmem:[%s6466_s8 + $0x58] sm:$0xff]  ;;  %v2973_v44 = vld [vmem:[%s6466_s8 + $0x8] sm:$0xff] }
 0x73d   :  { %2807 = vrot.lane.b32.xlu0 %v5914_v19, %s4126_s7  ;;  %2900 = vrot.lane.b32.xlu2 %v2887_v56, %s4127_s29  ;;  %2943 = vst.msk [vmem:[#allocation5 + $0x58] sm:$0xff] %vm2601_vm13, %v2729_v3  ;;  %v2891_v29 = vsel %vm2882_vm11, %v2888_v60, %v2890_v26  ;;  %v2629_v30 = vsel %vm6544_vm6, %v2626_v12, %v2628_v27  ;;  %v2977_v56 = vld [vmem:[%s6466_s8 + $0x28] sm:$0xff] }
 0x73e   :  { %2799 = vst.msk [vmem:[#allocation5 + $0x68] sm:$0xff] %vm2601_vm13, %v2780_v40  ;;  %3040 = vmatpush.msrb.mxu1 %v2983_v38  ;;  %4000 = vmatpush.msra.mxu3 %v2983_v38  ;;  %v2997_v60 = vld [vmem:[%s6466_s8 + $0xc8] sm:$0xff] }
 0x73f   :  { %v2548_v39 = vpop.f32.mrf.mxu0  ;;  %v2993_v12 = vld [vmem:[%s6466_s8 + $0xa8] sm:$0xff] }
 0x740   :  { %v5970_v37 = vadd.f32 %v2592_v4, %v2548_v39  ;;  %3041 = vmatpush.msrb.mxu1 %v2982_v54  ;;  %4001 = vmatpush.msra.mxu3 %v2982_v54  ;;  %v3003_v4 = vld [vmem:[%s6466_s8 + $0xf8] sm:$0xff]  ;;  %v2976_v39 = vld [vmem:[%s6466_s8 + $0x20] sm:$0xff] }
 0x741   :  { %3077 = vmatpush.msra.mxu2 %v3003_v4 }
 0x742   :  { %2608 = vst.msk [vmem:[#allocation5 + $0x90] sm:$0xff] %vm2601_vm13, %v5970_v37  ;;  %2690 = vrot.lane.b32.xlu1 %v2677_v13, %s4128_s30  ;;  %v2730_v41 = vrot.slane %v5970_v37, 6  ;;  %v2781_v0 = vrot.slane %v5970_v37, 7  ;;  %v2844_v31 = vrot.slane %v5970_v37, 4  ;;  %v2680_v53 = vrot.slane %v5970_v37, 2  ;;  %3042 = vmatpush.msrb.mxu1 %v2981_v17  ;;  %v2975_v13 = vld [vmem:[%s6466_s8 + $0x18] sm:$0xff] }
 0x743   :  { %v2595_v49 = vpop.f32.mrf.mxu3  ;;  %4002 = vmatpush.msra.mxu3 %v2981_v17  ;;  %v2630_v42 = vrot.slane %v5970_v37, 1 }
 0x744   :  { %v5981_v52 = vsel %vm2718_vm8, %v2728_v45, %v2730_v41  ;;  %v2782_v5 = vsel %vm2769_vm1, %v2779_v50, %v2781_v0  ;;  %v2845_v35 = vsel %vm6545_vm12, %v2842_v25, %v2844_v31  ;;  %3043 = vmatpush.msrb.mxu1 %v2980_v55  ;;  %v2978_v45 = vld [vmem:[%s6466_s8 + $0x30] sm:$0xff]  ;;  %v2989_v25 = vld [vmem:[%s6466_s8 + $0x88] sm:$0xff] }
 0x745   :  { %2638 = vrot.lane.b32.xlu0 %v2625_v47, %s4126_s7  ;;  %2740 = vrot.lane.b32.xlu2 %v2727_v61, %s4127_s29  ;;  %2944 = vst.msk [vmem:[#allocation5 + $0x70] sm:$0xff] %vm2601_vm13, %v5981_v52  ;;  %v2681_v61 = vsel %vm2668_vm10, %v2678_v15, %v2680_v53  ;;  %v2631_v58 = vsel %vm6547_vm14, %v2628_v27, %v2630_v42  ;;  %v3000_v47 = vld [vmem:[%s6466_s8 + $0xe0] sm:$0xff] }
 0x746   :  { %2800 = vst.msk [vmem:[#allocation5 + $0x80] sm:$0xff] %vm2601_vm13, %v2782_v5  ;;  %4003 = vmatpush.msra.mxu3 %v2980_v55  ;;  %v2998_v5 = vld [vmem:[%s6466_s8 + $0xd0] sm:$0xff] }
 0x747   :  { %v2551_v7 = vpop.f32.mrf.mxu0 }
 0x748   :  { %v5990_v48 = vadd.f32 %v2595_v49, %v2551_v7  ;;  %v2999_v49 = vld [vmem:[%s6466_s8 + $0xd8] sm:$0xff]  ;;  %v2972_v7 = vld [vmem:[%s6466_s8] sm:$0xff] }
 0x74a   :  { %2854 = vrot.lane.b32.xlu1 %v2841_v9, %s4128_s30  ;;  %v5996_v14 = vrot.slane %v5990_v48, 6  ;;  %2610 = vst.msk [vmem:[#allocation5 + $0xa8] sm:$0x3] %vm2609_vm3, %v5990_v48  ;;  %v2783_v6 = vrot.slane %v5990_v48, 7  ;;  %v2846_v51 = vrot.slane %v5990_v48, 4  ;;  %v2894_v59 = vrot.slane %v5990_v48, 5 }
 0x74b   :  { %v2598_v1 = vpop.f32.mrf.mxu3 }
 0x74c   :  { %v6004_v10 = vsel %vm2718_vm8, %v2730_v41, %v5996_v14  ;;  %v2784_v57 = vsel %vm2769_vm1, %v2781_v0, %v2783_v6  ;;  %v2682_v0 = vrot.slane %v5990_v48, 2 }
 0x74d   :  { %2809 = vrot.lane.b32.xlu0 %v5934_v34, %s4126_s7  ;;  %2902 = vrot.lane.b32.xlu2 %v2889_v8, %s4127_s29  ;;  %2945 = vst.msk [vmem:[#allocation5 + $0x88] sm:$0xff] %vm2601_vm13, %v6004_v10  ;;  %v2892_v34 = vrot.slane %v5970_v37, 5  ;;  %v2996_v8 = vld [vmem:[%s6466_s8 + $0xc0] sm:$0xff] }
 0x74e   :  { %2801 = vst.msk [vmem:[#allocation5 + $0x98] sm:$0xff] %vm2601_vm13, %v2784_v57  ;;  %v2995_v57 = vld [vmem:[%s6466_s8 + $0xb8] sm:$0xff] }
 0x74f   :  { %v2554_v2 = vpop.f32.mrf.mxu0  ;;  %v2893_v62 = vsel %vm2882_vm11, %v2890_v26, %v2892_v34  ;;  %v2895_v40 = vsel %vm2882_vm11, %v2892_v34, %v2894_v59 }
 0x750   :  { %v6013_v11 = vadd.f32 %v2598_v1, %v2554_v2  ;;  %v2994_v1 = vld [vmem:[%s6466_s8 + $0xb0] sm:$0xff] }
 0x752   :  { %2742 = vrot.lane.b32.xlu1 %v2729_v3, %s4127_s29  ;;  %v2930_v16 = vrot.slane %v6013_v11, 6  ;;  %v2785_v19 = vrot.slane %v6013_v11, 7  ;;  %v3002_v3 = vld [vmem:[%s6466_s8 + $0xf0] sm:$0xff]  ;;  %v2848_v2 = vrot.slane %v6013_v11, 4 }
 0x753   :  { %3078 = vmatpush.msra.mxu2 %v3002_v3 }
 0x754   :  { %v2931_v23 = vsel %vm2718_vm8, %v5996_v14, %v2930_v16  ;;  %2947 = vst.msk [vmem:[#allocation5 + $0xb8] sm:$0x3] %vm2609_vm3, %v2930_v16  ;;  %v2786_v24 = vsel %vm2769_vm1, %v2783_v6, %v2785_v19  ;;  %vm6546_vm1 = vmmov %vm6539_vm0  ;;  %v2632_v6 = vrot.slane %v5990_v48, 1  ;;  %v2896_v16 = vrot.slane %v6013_v11, 5 }
 0x755   :  { %2640 = vrot.lane.b32.xlu0 %v2627_v20, %s4126_s7  ;;  %2692 = vrot.lane.b32.xlu2 %v2679_v22, %s4128_s30  ;;  %2946 = vst.msk [vmem:[#allocation5 + $0xa0] sm:$0xff] %vm2601_vm13, %v2931_v23  ;;  %v2847_v50 = vsel %vm6546_vm1, %v2844_v31, %v2846_v51  ;;  %v2991_v20 = vld [vmem:[%s6466_s8 + $0x98] sm:$0xff]  ;;  %v2990_v22 = vld [vmem:[%s6466_s8 + $0x90] sm:$0xff]  ;;  %vm6550_vm1 = vmmov %vm6547_vm14 }
 0x756   :  { %2802 = vst.msk [vmem:[#allocation5 + $0xb0] sm:$0x3] %vm2609_vm3, %v2786_v24  ;;  %3079 = vmatpush.msra.mxu2 %v3001_v46  ;;  %v2897_v24 = vsel %vm2882_vm11, %v2894_v59, %v2896_v16  ;;  %v3254_v31 = vld [vmem:[%s6468_s10] sm:$0xff]  ;;  %v3006_v59 = vld [vmem:[%s6466_s8 + $0x110] sm:$0xff]  ;;  %vm2666_vm3 = vcmask 517376  }
 0x758   :  { %3080 = vmatpush.msra.mxu2 %v3000_v47 }
 0x75a   :  { %2856 = vrot.lane.b32.xlu1 %v2843_v28, %s4128_s30  ;;  %3081 = vmatpush.msra.mxu2 %v2999_v49 }
 0x75c   :  { %3082 = vmatpush.msra.mxu2 %v2998_v5 }
 0x75d   :  { %2904 = vrot.lane.b32.xlu2 %v2891_v29, %s4127_s29  ;;  %2642 = vrot.lane.b32.xlu0 %v2629_v30, %s4126_s7 }
 0x75e   :  { %3083 = vmatpush.msra.mxu2 %v2997_v60 }
 0x760   :  { %3084 = vmatpush.msra.mxu2 %v2996_v8 }
 0x762   :  { %2858 = vrot.lane.b32.xlu1 %v2845_v35, %s4128_s30  ;;  %3085 = vmatpush.msra.mxu2 %v2995_v57 }
 0x764   :  { %3086 = vmatpush.msra.mxu2 %v2994_v1 }
 0x765   :  { %2811 = vrot.lane.b32.xlu0 %v5952_v43, %s4126_s7  ;;  %2906 = vrot.lane.b32.xlu2 %v2893_v62, %s4127_s29  ;;  %v2979_v43 = vld [vmem:[%s6466_s8 + $0x38] sm:$0xff] }
 0x766   :  { %3044 = vmatpush.msrb.mxu1 %v2979_v43  ;;  %4004 = vmatpush.msra.mxu3 %v2979_v43  ;;  %v3007_v43 = vld [vmem:[%s6466_s8 + $0x118] sm:$0xff] }
 0x767   :  { %3087 = vmatpush.msra.mxu2 %v2993_v12 }
 0x768   :  { %3045 = vmatpush.msrb.mxu1 %v2978_v45  ;;  %4005 = vmatpush.msra.mxu3 %v2978_v45  ;;  %v3005_v45 = vld [vmem:[%s6466_s8 + $0x108] sm:$0xff] }
 0x76a   :  { %2694 = vrot.lane.b32.xlu1 %v2681_v61, %s4128_s30  ;;  %3046 = vmatpush.msrb.mxu1 %v2977_v56 }
 0x76b   :  { %4006 = vmatpush.msra.mxu3 %v2977_v56 }
 0x76c   :  { %3047 = vmatpush.msrb.mxu1 %v2976_v39 }
 0x76d   :  { %2813 = vrot.lane.b32.xlu0 %v5970_v37, %s4126_s7  ;;  %2744 = vrot.lane.b32.xlu2 %v5981_v52, %s4127_s29  ;;  %v2974_v52 = vld [vmem:[%s6466_s8 + $0x10] sm:$0xff]  ;;  %v2633_v37 = vsel %vm6548_vm15, %v2630_v42, %v2632_v6  ;;  %vm6551_vm15 = vmmov %vm6550_vm1 }
 0x76e   :  { %3048 = vmatpush.msrb.mxu1 %v2975_v13  ;;  %4007 = vmatpush.msra.mxu3 %v2976_v39 }
 0x770   :  { %3049 = vmatpush.msrb.mxu1 %v2974_v52  ;;  %4008 = vmatpush.msra.mxu3 %v2975_v13 }
 0x772   :  { %2860 = vrot.lane.b32.xlu1 %v2847_v50, %s4128_s30  ;;  %3050 = vmatpush.msrb.mxu1 %v2973_v44  ;;  %v3004_v50 = vld [vmem:[%s6466_s8 + $0x100] sm:$0xff] }
 0x773   :  { %4009 = vmatpush.msra.mxu3 %v2974_v52 }
 0x774   :  { %3051 = vmatpush.msrb.mxu1 %v2972_v7 }
 0x775   :  { %2644 = vrot.lane.b32.xlu0 %v2631_v58, %s4126_s7  ;;  %2908 = vrot.lane.b32.xlu2 %v2895_v40, %s4127_s29 }
 0x776   :  { %4010 = vmatpush.msra.mxu3 %v2973_v44  ;;  %3130 = vmatpush.msra.mxu1 %v3007_v43 }
 0x777   :  { %v6117_v41 = vpop.permute.xlu2 %2734 }
 0x778   :  { %4011 = vmatpush.msra.mxu3 %v2972_v7  ;;  %3131 = vmatpush.msra.mxu1 %v3006_v59 }
 0x77a   :  { %2698 = vrot.lane.b32.xlu1 %v2682_v0, %s4128_s30  ;;  %3132 = vmatpush.msra.mxu1 %v3005_v45 }
 0x77c   :  { %3133 = vmatpush.msra.mxu1 %v3004_v50 }
 0x77d   :  { %2815 = vrot.lane.b32.xlu0 %v5990_v48, %s4126_s7  ;;  %2748 = vrot.lane.b32.xlu2 %v5996_v14, %s4127_s29  ;;  %v2683_v14 = vsel %vm2668_vm10, %v2680_v53, %v2682_v0  ;;  %vm6549_vm10 = vmmov %vm6539_vm0  ;;  %v2988_v48 = vld [vmem:[%s6466_s8 + $0x80] sm:$0xff]  ;;  %vm2708_vm0 = vcmask 785920  }
 0x77e   :  { %v2849_v19 = vsel %vm6549_vm10, %v2846_v51, %v2848_v2  ;;  %vm6552_vm10 = vmmov %vm6550_vm1 }
 0x77f   :  { %v6146_v9 = vpop.permute.xlu2 %2736 }
 0x782   :  { %2696 = vrot.lane.b32.xlu1 %v2683_v14, %s4128_s30  ;;  %v2950_v14 = vld [vmem:[#allocation5 + $0x10] sm:$0xff] }
 0x785   :  { %2746 = vrot.lane.b32.xlu2 %v6004_v10, %s4127_s29  ;;  %2646 = vrot.lane.b32.xlu0 %v2633_v37, %s4126_s7  ;;  %v2992_v10 = vld [vmem:[%s6466_s8 + $0xa0] sm:$0xff]  ;;  %v2953_v37 = vld [vmem:[#allocation5 + $0x28] sm:$0xff] }
 0x786   :  { %3088 = vmatpush.msra.mxu2 %v2992_v10 }
 0x787   :  { %v2899_v15 = vpop.permute.xlu2 %2898 }
 0x788   :  { %3089 = vmatpush.msra.mxu2 %v2991_v20 }
 0x78a   :  { %2862 = vrot.lane.b32.xlu1 %v2849_v19, %s4128_s30  ;;  %3090 = vmatpush.msra.mxu2 %v2990_v22  ;;  %v2956_v19 = vld [vmem:[#allocation5 + $0x40] sm:$0xff] }
 0x78c   :  { %v2804_v23 = vpop.permute.xlu1 %2803  ;;  %3091 = vmatpush.msra.mxu2 %v2989_v25 }
 0x78d   :  { %2827 = vst.msk [vmem:[#allocation5 + $0x8] sm:$0xff] %vm2658_vm2, %v2804_v23  ;;  %2648 = vrot.lane.b32.xlu0 %v2632_v6, %s4126_s7  ;;  %2910 = vrot.lane.b32.xlu2 %v2897_v24, %s4127_s29  ;;  %v2959_v23 = vld [vmem:[#allocation5 + $0x58] sm:$0xff] }
 0x78e   :  { %3092 = vmatpush.msra.mxu2 %v2988_v48  ;;  %v2962_v48 = vld [vmem:[#allocation5 + $0x70] sm:$0xff] }
 0x78f   :  { %v2635_v26 = vpop.permute.xlu0 %2634  ;;  %v2739_v27 = vpop.permute.xlu2 %2738 }
 0x790   :  { %2659 = vst.msk [vmem:[#allocation5] sm:$0xff] %vm2658_vm2, %v2635_v26 }
 0x792   :  { %2864 = vrot.lane.b32.xlu1 %v2848_v2, %s4128_s30 }
 0x794   :  { %v2685_v28 = vpop.permute.xlu1 %2684 }
 0x795   :  { %2709 = vst.msk [vmem:[#allocation5] sm:$0xff] %vm2708_vm0, %v2685_v28  ;;  %2817 = vrot.lane.b32.xlu0 %v6013_v11, %s4126_s7  ;;  %2912 = vrot.lane.b32.xlu2 %v2896_v16, %s4127_s29 }
 0x796   :  { %2759 = vst.msk [vmem:[#allocation5] sm:$0xff] %vm2758_vm4, %v6117_v41 }
 0x797   :  { %v2806_v29 = vpop.permute.xlu0 %2805  ;;  %v2901_v30 = vpop.permute.xlu2 %2900 }
 0x798   :  { %2828 = vst.msk [vmem:[#allocation5 + $0x20] sm:$0xff] %vm2658_vm2, %v2806_v29 }
 0x79c   :  { %v2687_v32 = vpop.permute.xlu1 %2686 }
 0x79d   :  { %3256 = vperm.xlu0 %4033, %v3254_v31   ;;  %v2948_v33 = vld [vmem:[#allocation5] sm:$0xff] }
 0x79e   :  { %3052 = vmatmul.f32.vlgmr.msrb.gmra.mxu1 %v2948_v33  ;;  %v2965_v33 = vld [vmem:[#allocation5 + $0x88] sm:$0xff] }
 0x79f   :  { %v2637_v34 = vpop.permute.xlu0 %2636  ;;  %v2741_v11 = vpop.permute.xlu2 %2740 }
 0x7a0   :  { %2660 = vst.msk [vmem:[#allocation5 + $0x18] sm:$0xff] %vm2658_vm2, %v2637_v34 }
 0x7a1   :  { %2710 = vst.msk [vmem:[#allocation5 + $0x18] sm:$0xff] %vm2708_vm0, %v2687_v32 }
 0x7a2   :  { %2760 = vst.msk [vmem:[#allocation5 + $0x18] sm:$0xff] %vm2758_vm4, %v6146_v9 }
 0x7a4   :  { %v2689_v35 = vpop.permute.xlu1 %2688 }
 0x7a7   :  { %v2851_v36 = vpop.permute.xlu0 %2850  ;;  %v2903_v53 = vpop.permute.xlu2 %2902 }
 0x7a8   :  { %2874 = vst.msk [vmem:[#allocation5 + $0x8] sm:$0xff] %vm2708_vm0, %v2851_v36  ;;  %v6275_v36 = vld [vmem:[%s6467_s9] ss:$0 sm:$0xff] }
 0x7a9   :  { %2922 = vst.msk [vmem:[#allocation5 + $0x8] sm:$0xff] %vm2758_vm4, %v2899_v15  ;;  %v2951_v63 = vld [vmem:[#allocation5 + $0x18] sm:$0xff] }
 0x7aa   :  { %3055 = vmatmul.f32.gmra.mxu1 %v2951_v63 }
 0x7ac   :  { %v2853_v62 = vpop.permute.xlu1 %2852 }
 0x7ad   :  { %2875 = vst.msk [vmem:[#allocation5 + $0x20] sm:$0xff] %vm2708_vm0, %v2853_v62 }
 0x7ae   :  { %2923 = vst.msk [vmem:[#allocation5 + $0x20] sm:$0xff] %vm2758_vm4, %v2901_v30 }
 0x7af   :  { %v2808_v38 = vpop.permute.xlu0 %2807  ;;  %v2693_v17 = vpop.permute.xlu2 %2692 }
 0x7b0   :  { %2829 = vst.msk [vmem:[#allocation5 + $0x38] sm:$0xff] %vm2658_vm2, %v2808_v38  ;;  %v2949_v54 = vld [vmem:[#allocation5 + $0x8] sm:$0xff] }
 0x7b1   :  { %3093 = vmatmul.f32.vlgmr.msra.gmra.mxu2 %v2949_v54 }
 0x7b4   :  { %v2691_v61 = vpop.permute.xlu1 %2690 }
 0x7b5   :  { %v2952_v55 = vld [vmem:[#allocation5 + $0x20] sm:$0xff] }
 0x7b7   :  { %v2639_v51 = vpop.permute.xlu0 %2638  ;;  %v2905_v56 = vpop.permute.xlu2 %2904 }
 0x7b8   :  { %2661 = vst.msk [vmem:[#allocation5 + $0x30] sm:$0xff] %vm2658_vm2, %v2639_v51 }
 0x7b9   :  { %2711 = vst.msk [vmem:[#allocation5 + $0x30] sm:$0xff] %vm2708_vm0, %v2689_v35  ;;  %3096 = vmatmul.f32.gmra.mxu2 %v2952_v55  ;;  %v2971_v35 = vld [vmem:[#allocation5 + $0xb8] sm:$0x3] }
 0x7ba   :  { %2761 = vst.msk [vmem:[#allocation5 + $0x30] sm:$0xff] %vm2758_vm4, %v2739_v27 }
 0x7bc   :  { %v2855_v42 = vpop.permute.xlu1 %2854 }
 0x7bd   :  { %2876 = vst.msk [vmem:[#allocation5 + $0x38] sm:$0xff] %vm2708_vm0, %v2855_v42 }
 0x7be   :  { %2924 = vst.msk [vmem:[#allocation5 + $0x38] sm:$0xff] %vm2758_vm4, %v2903_v53 }
 0x7bf   :  { %v2810_v4 = vpop.permute.xlu0 %2809  ;;  %v2907_v46 = vpop.permute.xlu2 %2906 }
 0x7c0   :  { %2830 = vst.msk [vmem:[#allocation5 + $0x50] sm:$0xff] %vm2658_vm2, %v2810_v4 }
 0x7c1   :  { %v2954_v3 = vld [vmem:[#allocation5 + $0x30] sm:$0xff] }
 0x7c2   :  { %3058 = vmatmul.f32.gmra.mxu1 %v2954_v3 }
 0x7c4   :  { %v2743_v58 = vpop.permute.xlu1 %2742 }
 0x7c5   :  { %v2955_v40 = vld [vmem:[#allocation5 + $0x38] sm:$0xff] }
 0x7c6   :  { %3099 = vmatmul.f32.gmra.mxu2 %v2955_v40 }
 0x7c7   :  { %v2641_v39 = vpop.permute.xlu0 %2640  ;;  %v2745_v52 = vpop.permute.xlu2 %2744 }
 0x7c8   :  { %2662 = vst.msk [vmem:[#allocation5 + $0x48] sm:$0xff] %vm2658_vm2, %v2641_v39 }
 0x7c9   :  { %2712 = vst.msk [vmem:[#allocation5 + $0x48] sm:$0xff] %vm2708_vm0, %v2691_v61 }
 0x7ca   :  { %2762 = vst.msk [vmem:[#allocation5 + $0x48] sm:$0xff] %vm2758_vm4, %v2741_v11  ;;  %v2968_v11 = vld [vmem:[#allocation5 + $0xa0] sm:$0xff] }
 0x7cc   :  { %v2857_v13 = vpop.permute.xlu1 %2856 }
 0x7cd   :  { %2877 = vst.msk [vmem:[#allocation5 + $0x50] sm:$0xff] %vm2708_vm0, %v2857_v13 }
 0x7ce   :  { %2925 = vst.msk [vmem:[#allocation5 + $0x50] sm:$0xff] %vm2758_vm4, %v2905_v56 }
 0x7cf   :  { %v2643_v41 = vpop.permute.xlu0 %2642  ;;  %v2909_v60 = vpop.permute.xlu2 %2908 }
 0x7d0   :  { %2663 = vst.msk [vmem:[#allocation5 + $0x60] sm:$0xff] %vm2658_vm2, %v2643_v41 }
 0x7d1   :  { %2713 = vst.msk [vmem:[#allocation5 + $0x60] sm:$0xff] %vm2708_vm0, %v2693_v17  ;;  %v2957_v0 = vld [vmem:[#allocation5 + $0x48] sm:$0xff] }
 0x7d2   :  { %2763 = vst.msk [vmem:[#allocation5 + $0x60] sm:$0xff] %vm2758_vm4, %v2743_v58  ;;  %3061 = vmatmul.f32.gmra.mxu1 %v2957_v0 }
 0x7d4   :  { %v2859_v47 = vpop.permute.xlu1 %2858 }
 0x7d5   :  { %v2958_v49 = vld [vmem:[#allocation5 + $0x50] sm:$0xff] }
 0x7d6   :  { %3102 = vmatmul.f32.gmra.mxu2 %v2958_v49 }
 0x7d7   :  { %v2812_v44 = vpop.permute.xlu0 %2811  ;;  %v2749_v1 = vpop.permute.xlu2 %2748 }
 0x7d8   :  { %2831 = vst.msk [vmem:[#allocation5 + $0x68] sm:$0xff] %vm2658_vm2, %v2812_v44 }
 0x7d9   :  { %2878 = vst.msk [vmem:[#allocation5 + $0x68] sm:$0xff] %vm2708_vm0, %v2859_v47  ;;  %v2960_v5 = vld [vmem:[#allocation5 + $0x60] sm:$0xff] }
 0x7da   :  { %2926 = vst.msk [vmem:[#allocation5 + $0x68] sm:$0xff] %vm2758_vm4, %v2907_v46  ;;  %3064 = vmatmul.f32.gmra.mxu1 %v2960_v5 }
 0x7dc   :  { %v2695_v7 = vpop.permute.xlu1 %2694 }
 0x7df   :  { %v2814_v9 = vpop.permute.xlu0 %2813  ;;  %v2747_v10 = vpop.permute.xlu2 %2746 }
 0x7e0   :  { %2832 = vst.msk [vmem:[#allocation5 + $0x80] sm:$0xff] %vm2658_vm2, %v2814_v9 }
 0x7e1   :  { %v2961_v6 = vld [vmem:[#allocation5 + $0x68] sm:$0xff] }
 0x7e2   :  { %3105 = vmatmul.f32.gmra.mxu2 %v2961_v6  ;;  %3984 = vmatmul.msk.f32.vlgmr.msra.gmra.mxu1 %vm2601_vm13, %v2950_v14 }
 0x7e4   :  { %v2861_v8 = vpop.permute.xlu1 %2860 }
 0x7e5   :  { %2879 = vst.msk [vmem:[#allocation5 + $0x80] sm:$0xff] %vm2708_vm0, %v2861_v8 }
 0x7e6   :  { %2927 = vst.msk [vmem:[#allocation5 + $0x80] sm:$0xff] %vm2758_vm4, %v2909_v60 }
 0x7e7   :  { %v2645_v57 = vpop.permute.xlu0 %2644  ;;  %v2911_v25 = vpop.permute.xlu2 %2910 }
 0x7e8   :  { %2664 = vst.msk [vmem:[#allocation5 + $0x78] sm:$0xff] %vm2658_vm2, %v2645_v57 }
 0x7e9   :  { %2714 = vst.msk [vmem:[#allocation5 + $0x78] sm:$0xff] %vm2708_vm0, %v2695_v7 }
 0x7ea   :  { %2764 = vst.msk [vmem:[#allocation5 + $0x78] sm:$0xff] %vm2758_vm4, %v2745_v52  ;;  %3985 = vmatmul.msk.f32.gmra.mxu1 %vm2601_vm13, %v2953_v37 }
 0x7ec   :  { %v2699_v2 = vpop.permute.xlu1 %2698 }
 0x7ed   :  { %v2964_v12 = vld [vmem:[#allocation5 + $0x80] sm:$0xff] }
 0x7ee   :  { %3108 = vmatmul.f32.gmra.mxu2 %v2964_v12 }
 0x7ef   :  { %v2816_v15 = vpop.permute.xlu0 %2815  ;;  %v2913_v31 = vpop.permute.xlu2 %2912 }
 0x7f0   :  { %2833 = vst.msk [vmem:[#allocation5 + $0x98] sm:$0xff] %vm2658_vm2, %v2816_v15 }
 0x7f1   :  { %v2963_v16 = vld [vmem:[#allocation5 + $0x78] sm:$0xff] }
 0x7f2   :  { %3067 = vmatmul.f32.vlgmr.msra.gmra.mxu3 %v2963_v16  ;;  %3986 = vmatmul.msk.f32.gmra.mxu1 %vm2601_vm13, %v2956_v19 }
 0x7f4   :  { %v2697_v20 = vpop.permute.xlu1 %2696 }
 0x7f7   :  { %v2647_v22 = vpop.permute.xlu0 %2646 }
 0x7f8   :  { %2665 = vst.msk [vmem:[#allocation5 + $0x90] sm:$0xff] %vm2658_vm2, %v2647_v22 }
 0x7f9   :  { %2715 = vst.msk [vmem:[#allocation5 + $0x90] sm:$0xff] %vm2708_vm0, %v2697_v20 }
 0x7fa   :  { %2765 = vst.msk [vmem:[#allocation5 + $0x90] sm:$0xff] %vm2758_vm4, %v2747_v10  ;;  %3987 = vmatmul.msk.f32.gmra.mxu1 %vm2601_vm13, %v2959_v23 }
 0x7fc   :  { %v2863_v24 = vpop.permute.xlu1 %2862 }
 0x7fd   :  { %2880 = vst.msk [vmem:[#allocation5 + $0x98] sm:$0xff] %vm2708_vm0, %v2863_v24 }
 0x7fe   :  { %2928 = vst.msk [vmem:[#allocation5 + $0x98] sm:$0xff] %vm2758_vm4, %v2911_v25 }
 0x7ff   :  { %v2649_v26 = vpop.permute.xlu0 %2648 }
 0x800   :  { %2667 = vst.msk [vmem:[#allocation5 + $0xa8] sm:$0x3] %vm2666_vm3, %v2649_v26 }
 0x801   :  { %2717 = vst.msk [vmem:[#allocation5 + $0xa8] sm:$0x3] %vm2716_vm7, %v2699_v2  ;;  %v2966_v27 = vld [vmem:[#allocation5 + $0x90] sm:$0xff] }
 0x802   :  { %2767 = vst.msk [vmem:[#allocation5 + $0xa8] sm:$0x3] %vm2766_vm9, %v2749_v1  ;;  %3070 = vmatmul.f32.gmra.mxu3 %v2966_v27  ;;  %3988 = vmatmul.msk.f32.gmra.mxu1 %vm2601_vm13, %v2962_v48 }
 0x804   :  { %v2865_v30 = vpop.permute.xlu1 %2864 }
 0x805   :  { %v2967_v28 = vld [vmem:[#allocation5 + $0x98] sm:$0xff] }
 0x806   :  { %3111 = vmatmul.f32.gmra.mxu2 %v2967_v28 }
 0x807   :  { %v2818_v29 = vpop.permute.xlu0 %2817 }
 0x808   :  { %2834 = vst.msk [vmem:[#allocation5 + $0xb0] sm:$0x3] %vm2666_vm3, %v2818_v29  ;;  %vm6553_vm3 = vmmov %vm6550_vm1 }
 0x809   :  { %2881 = vst.msk [vmem:[#allocation5 + $0xb0] sm:$0x3] %vm2716_vm7, %v2865_v30  ;;  %v2969_v32 = vld [vmem:[#allocation5 + $0xa8] sm:$0x3]  ;;  %vm6554_vm7 = vmmov %vm6550_vm1 }
 0x80a   :  { %2929 = vst.msk [vmem:[#allocation5 + $0xb0] sm:$0x3] %vm2766_vm9, %v2913_v31  ;;  %3073 = vmatmul.f32.gmra.mxu3 %v2969_v32  ;;  %3989 = vmatmul.msk.f32.gmra.mxu1 %vm2601_vm13, %v2965_v33  ;;  %vm6555_vm9 = vmmov %vm6550_vm1 }
 0x811   :  { %v2970_v34 = vld [vmem:[#allocation5 + $0xb0] sm:$0x3] }
 0x812   :  { %3114 = vmatmul.f32.gmra.mxu2 %v2970_v34  ;;  %3990 = vmatmul.msk.f32.gmra.mxu1 %vm2601_vm13, %v2968_v11 }
 0x81a   :  { %3991 = vmatmul.msk.f32.gmra.mxu1 %vm2601_vm13, %v2971_v35 }
 0x81b   :  { %v3053_v63 = vpop.f32.mrf.mxu1 }
 0x81c   :  { %v3054_v62 = vadd.f32 %v6275_v36, %v3053_v63 }
 0x827   :  { %v3056_v54 = vpop.f32.mrf.mxu1 }
 0x828   :  { %v3057_v59 = vadd.f32 %v6275_v36, %v3056_v54 }
 0x834   :  { %v3094_v53 = vpop.f32.mrf.mxu2 }
 0x835   :  { %v3095_v38 = vadd.f32 %v3094_v53, %v3054_v62 }
 0x83c   :  { %v3097_v42 = vpop.f32.mrf.mxu2 }
 0x83d   :  { %v3098_v45 = vadd.f32 %v3097_v42, %v3057_v59 }
 0x83f   :  { %v3059_v61 = vpop.f32.mrf.mxu1 }
 0x840   :  { %v3060_v39 = vadd.f32 %v6275_v36, %v3059_v61 }
 0x849   :  { %v3100_v40 = vpop.f32.mrf.mxu2 }
 0x84a   :  { %v3101_v0 = vadd.f32 %v3100_v40, %v3060_v39  ;;  %v3294_v40 = vld [vmem:[%s6469_s11 + $0x30] sm:$0xff] }
 0x84f   :  { %v3062_v17 = vpop.f32.mrf.mxu1 }
 0x850   :  { %v3063_v60 = vadd.f32 %v6275_v36, %v3062_v17 }
 0x857   :  { %v3065_v51 = vpop.f32.mrf.mxu1 }
 0x858   :  { %v3066_v19 = vadd.f32 %v6275_v36, %v3065_v51 }
 0x859   :  { %v3103_v7 = vpop.f32.mrf.mxu2 }
 0x85a   :  { %v3104_v14 = vadd.f32 %v3103_v7, %v3063_v60 }
 0x85f   :  { %v3135_v55 = vpop.f32.mrf.mxu1 }
 0x860   :  { %v3136_v43 = vadd.f32 %v3135_v55, %v3095_v38 }
 0x862   :  { %v3167_v4 = vmul.f32 0.01, %v3136_v43  ;;  %vm3159_vm13 = vcmp.ge.f32.partialorder %v3136_v43, 0.0 }
 0x864   :  { %v3175_v3 = vsel %vm3159_vm13, %v3136_v43, %v3167_v4  ;;  %vm3261_vm13 = vcmask 416768  }
 0x865   :  { %v3191_v13 = vrot.slane %v3175_v3, 6  ;;  %v3106_v16 = vpop.f32.mrf.mxu2 }
 0x866   :  { %v3107_v24 = vadd.f32 %v3106_v16, %v3066_v19 }
 0x867   :  { %v3138_v50 = vpop.f32.mrf.mxu1 }
 0x868   :  { %v3139_v56 = vadd.f32 %v3138_v50, %v3098_v45 }
 0x86a   :  { %vm3160_vm5 = vcmp.ge.f32.partialorder %v3139_v56, 0.0  ;;  %v3168_v58 = vmul.f32 0.01, %v3139_v56 }
 0x86c   :  { %v3176_v46 = vsel %vm3160_vm5, %v3139_v56, %v3168_v58  ;;  %v3295_v58 = vld [vmem:[%s6469_s11 + $0x38] sm:$0xff] }
 0x86d   :  { %v3192_v41 = vrot.slane %v3176_v46, 6  ;;  %3312 = vmatpush.msrb.mxu3 %v3295_v58 }
 0x86f   :  { %v3141_v47 = vpop.f32.mrf.mxu1  ;;  %v3193_v52 = vsel %vm2718_vm8, %v3191_v13, %v3192_v41  ;;  %3313 = vmatpush.msrb.mxu3 %v3294_v40  ;;  %v3331_v40 = vld [vmem:[%s6471_s13 + $0x20] sm:$0xff] }
 0x870   :  { %v3142_v49 = vadd.f32 %v3141_v47, %v3101_v0  ;;  %v6281_v44 = vmax.f32 %v3175_v3, %v3193_v52  ;;  %v3293_v0 = vld [vmem:[%s6469_s11 + $0x28] sm:$0xff] }
 0x871   :  { %v3109_v31 = vpop.f32.mrf.mxu2  ;;  %3314 = vmatpush.msrb.mxu3 %v3293_v0  ;;  %v3328_v0 = vld [vmem:[%s6471_s13 + $0x8] sm:$0xff] }
 0x872   :  { %vm3161_vm6 = vcmp.ge.f32.partialorder %v3142_v49, 0.0  ;;  %v3169_v5 = vmul.f32 0.01, %v3142_v49  ;;  %v3227_v15 = vrot.slane %v6281_v44, 1 }
 0x874   :  { %v3177_v9 = vsel %vm3161_vm6, %v3142_v49, %v3169_v5  ;;  %v3292_v5 = vld [vmem:[%s6469_s11 + $0x20] sm:$0xff] }
 0x875   :  { %v3194_v6 = vrot.slane %v3177_v9, 6  ;;  %v3068_v25 = vpop.f32.mrf.mxu3  ;;  %3315 = vmatpush.msrb.mxu3 %v3292_v5 }
 0x876   :  { %v3069_v35 = vadd.f32 %v6275_v36, %v3068_v25 }
 0x877   :  { %v3144_v8 = vpop.f32.mrf.mxu1  ;;  %v3195_v57 = vsel %vm2718_vm8, %v3192_v41, %v3194_v6 }
 0x878   :  { %v3145_v1 = vadd.f32 %v3144_v8, %v3104_v14  ;;  %v6285_v37 = vmax.f32 %v3176_v46, %v3195_v57  ;;  %v3110_v61 = vadd.f32 %v3109_v31, %v3069_v35  ;;  %v3290_v14 = vld [vmem:[%s6469_s11 + $0x10] sm:$0xff]  ;;  %v3257_v31 = vpop.permute.xlu0 %3256 }
 0x879   :  { %v3349_v35 = vld [vmem:[%s6471_s13 + $0xb0] sm:$0xff] }
 0x87a   :  { %vm3162_vm12 = vcmp.ge.f32.partialorder %v3145_v1, 0.0  ;;  %v3170_v2 = vmul.f32 0.01, %v3145_v1  ;;  %v3228_v12 = vrot.slane %v6285_v37, 1 }
 0x87c   :  { %v3178_v10 = vsel %vm3162_vm12, %v3145_v1, %v3170_v2  ;;  %v6291_v20 = vsel %vm6550_vm1, %v3227_v15, %v3228_v12 }
 0x87d   :  { %v3196_v22 = vrot.slane %v3178_v10, 6  ;;  %v3247_v23 = vmax.f32 %v6281_v44, %v6291_v20  ;;  %v3356_v44 = vld [vmem:[%s6471_s13 + $0xe8] sm:$0xff]  ;;  %v3353_v20 = vld [vmem:[%s6471_s13 + $0xd0] sm:$0xff] }
 0x87f   :  { %v3147_v26 = vpop.f32.mrf.mxu1  ;;  %v3197_v27 = vsel %vm2718_vm8, %v3194_v6, %v3196_v22 }
 0x880   :  { %v3148_v48 = vadd.f32 %v3147_v26, %v3107_v24  ;;  %v6296_v28 = vmax.f32 %v3177_v9, %v3197_v27 }
 0x882   :  { %vm3163_vm14 = vcmp.ge.f32.partialorder %v3148_v48, 0.0  ;;  %v3171_v29 = vmul.f32 0.01, %v3148_v48  ;;  %v3230_v30 = vrot.slane %v6296_v28, 1 }
 0x884   :  { %v3179_v32 = vsel %vm3163_vm14, %v3148_v48, %v3171_v29  ;;  %v6300_v33 = vsel %vm6551_vm15, %v3228_v12, %v3230_v30  ;;  %v3289_v12 = vld [vmem:[%s6469_s11 + $0x8] sm:$0xff] }
 0x885   :  { %v3198_v34 = vrot.slane %v3179_v32, 6  ;;  %v3248_v11 = vmax.f32 %v6285_v37, %v6300_v33  ;;  %v3071_v63 = vpop.f32.mrf.mxu3  ;;  %v3358_v37 = vld [vmem:[%s6471_s13 + $0xf8] sm:$0xff]  ;;  %v3351_v33 = vld [vmem:[%s6471_s13 + $0xc0] sm:$0xff] }
 0x886   :  { %v3072_v51 = vadd.f32 %v6275_v36, %v3071_v63  ;;  %v3350_v63 = vld [vmem:[%s6471_s13 + $0xb8] sm:$0xff] }
 0x887   :  { %v3150_v62 = vpop.f32.mrf.mxu1  ;;  %v3199_v53 = vsel %vm2718_vm8, %v3196_v22, %v3198_v34 }
 0x888   :  { %v6306_v38 = vmax.f32 %v3178_v10, %v3199_v53  ;;  %v3151_v43 = vadd.f32 %v3150_v62, %v3110_v61  ;;  %v3347_v62 = vld [vmem:[%s6471_s13 + $0xa0] sm:$0xff]  ;;  %v3348_v53 = vld [vmem:[%s6471_s13 + $0xa8] sm:$0xff] }
 0x889   :  { %v3112_v17 = vpop.f32.mrf.mxu2  ;;  %v3343_v61 = vld [vmem:[%s6471_s13 + $0x80] sm:$0xff] }
 0x88a   :  { %v3232_v54 = vrot.slane %v6306_v38, 1  ;;  %v3113_v59 = vadd.f32 %v3112_v17, %v3072_v51  ;;  %v3172_v50 = vmul.f32 0.01, %v3151_v43  ;;  %vm3164_vm2 = vcmp.ge.f32.partialorder %v3151_v43, 0.0  ;;  %v3344_v17 = vld [vmem:[%s6471_s13 + $0x88] sm:$0xff]  ;;  %v3341_v51 = vld [vmem:[%s6471_s13 + $0x70] sm:$0xff] }
 0x88c   :  { %v3233_v55 = vsel %vm6552_vm10, %v3230_v30, %v3232_v54  ;;  %v3180_v13 = vsel %vm3164_vm2, %v3151_v43, %v3172_v50  ;;  %v3339_v43 = vld [vmem:[%s6471_s13 + $0x60] sm:$0xff]  ;;  %v3336_v50 = vld [vmem:[%s6471_s13 + $0x48] sm:$0xff] }
 0x88d   :  { %v3249_v42 = vmax.f32 %v6296_v28, %v3233_v55  ;;  %v3074_v56 = vpop.f32.mrf.mxu3  ;;  %v3200_v7 = vrot.slane %v3180_v13, 6  ;;  %v3342_v55 = vld [vmem:[%s6471_s13 + $0x78] sm:$0xff] }
 0x88e   :  { %v3075_v39 = vadd.f32 %v6275_v36, %v3074_v56  ;;  %v3291_v36 = vld [vmem:[%s6469_s11 + $0x18] sm:$0xff]  ;;  %v3333_v56 = vld [vmem:[%s6471_s13 + $0x30] sm:$0xff] }
 0x88f   :  { %v3153_v45 = vpop.f32.mrf.mxu1  ;;  %v3201_v57 = vsel %vm2718_vm8, %v3198_v34, %v3200_v7  ;;  %3316 = vmatpush.msrb.mxu3 %v3291_v36  ;;  %v3288_v34 = vld [vmem:[%s6469_s11] sm:$0xff] }
 0x890   :  { %v3154_v4 = vadd.f32 %v3153_v45, %v3113_v59  ;;  %v3217_v16 = vmax.f32 %v3179_v32, %v3201_v57  ;;  %v3337_v59 = vld [vmem:[%s6471_s13 + $0x50] sm:$0xff]  ;;  %v3338_v45 = vld [vmem:[%s6471_s13 + $0x58] sm:$0xff] }
 0x891   :  { %3317 = vmatpush.msrb.mxu3 %v3290_v14 }
 0x892   :  { %vm3165_vm0 = vcmp.ge.f32.partialorder %v3154_v4, 0.0  ;;  %v3173_v3 = vmul.f32 0.01, %v3154_v4  ;;  %v3234_v24 = vrot.slane %v3217_v16, 1 }
 0x893   :  { %3318 = vmatpush.msrb.mxu3 %v3289_v12 }
 0x894   :  { %v3181_v46 = vsel %vm3165_vm0, %v3154_v4, %v3173_v3  ;;  %v3235_v28 = vsel %vm6555_vm9, %v3232_v54, %v3234_v24  ;;  %v3346_v54 = vld [vmem:[%s6471_s13 + $0x98] sm:$0xff]  ;;  %v3335_v4 = vld [vmem:[%s6471_s13 + $0x40] sm:$0xff] }
 0x895   :  { %v3115_v41 = vpop.f32.mrf.mxu2  ;;  %v3202_v47 = vrot.slane %v3181_v46, 6  ;;  %v3250_v30 = vmax.f32 %v6306_v38, %v3235_v28  ;;  %3319 = vmatpush.msrb.mxu3 %v3288_v34  ;;  %v3345_v38 = vld [vmem:[%s6471_s13 + $0x90] sm:$0xff]  ;;  %v3334_v3 = vld [vmem:[%s6471_s13 + $0x38] sm:$0xff] }
 0x896   :  { %v3116_v52 = vadd.f32 %v3115_v41, %v3075_v39  ;;  %v3332_v39 = vld [vmem:[%s6471_s13 + $0x28] sm:$0xff]  ;;  %v3327_v41 = vld [vmem:[%s6471_s13] sm:$0xff] }
 0x897   :  { %v3156_v49 = vpop.f32.mrf.mxu1  ;;  %v3203_v6 = vsel %vm2718_vm8, %v3200_v7, %v3202_v47 }
 0x898   :  { %v3157_v60 = vadd.f32 %v3156_v49, %v3116_v52  ;;  %v3218_v2 = vmax.f32 %v3180_v13, %v3203_v6  ;;  %v3330_v13 = vld [vmem:[%s6471_s13 + $0x18] sm:$0xff] }
 0x89a   :  { %vm3166_vm4 = vcmp.ge.f32.partialorder %v3157_v60, 0.0  ;;  %v3174_v9 = vmul.f32 0.01, %v3157_v60  ;;  %v3236_v10 = vrot.slane %v3218_v2, 1 }
 0x89c   :  { %v3182_v8 = vsel %vm3166_vm4, %v3157_v60, %v3174_v9  ;;  %v3237_v48 = vsel %vm6554_vm7, %v3234_v24, %v3236_v10  ;;  %v3359_v60 = vld [vmem:[%s6472_s14] sm:$0x3] }
 0x89d   :  { %v3204_v1 = vrot.slane %v3182_v8, 6  ;;  %v3251_v29 = vmax.f32 %v3217_v16, %v3237_v48  ;;  %v3362_v36 = vperm.slane %v3359_v60, 1  ;;  %v3361_v8 = vperm.slane %v3359_v60, 0 }
 0x89f   :  { %v3205_v15 = vsel %vm2718_vm8, %v3202_v47, %v3204_v1  ;;  %vm3258_vm8 = vcmp.eq.s32.totalorder %v5824_v18, %v3257_v31  ;;  %v3357_v18 = vld [vmem:[%s6471_s13 + $0xf0] sm:$0xff]  ;;  %v4082_v47 = vld [vmem:[%s6470_s12] ss:$0 sm:$0xff]  ;;  %s4129_s12 = smov [#allocation6]  }
 0x8a0   :  { %v3219_v19 = vmax.f32 %v3181_v46, %v3205_v15  ;;  %v3992_v32 = vsel %vm3258_vm8, 1.0, %v6518_v21  ;;  %v3355_v21 = vld [vmem:[%s6471_s13 + $0xe0] sm:$0xff]  ;;  %3365 = vmatpush.msrb.mxu2 %v3357_v18  ;;  %v3329_v46 = vld [vmem:[%s6471_s13 + $0x10] sm:$0xff] }
 0x8a2   :  { %v3238_v22 = vrot.slane %v3219_v19, 1  ;;  %3366 = vmatpush.msrb.mxu2 %v3355_v21 }
 0x8a4   :  { %v3253_v25 = vmax.f32 %v3219_v19, %v3238_v22  ;;  %v3239_v26 = vsel %vm6553_vm3, %v3236_v10, %v3238_v22  ;;  %3367 = vmatpush.msrb.mxu2 %v3353_v20 }
 0x8a5   :  { %v3252_v27 = vmax.f32 %v3218_v2, %v3239_v26 }
 0x8a6   :  { %3993 = vmatpush.msk.msra.mxu0 %vm2882_vm11, %v3253_v25  ;;  %3368 = vmatpush.msrb.mxu2 %v3351_v33  ;;  %vm3300_vm11 = vcmask 523264  }
 0x8a8   :  { %3278 = vmatpush.msra.mxu0 %v3252_v27  ;;  %3369 = vmatpush.msrb.mxu2 %v3349_v35 }
 0x8aa   :  { %3279 = vmatpush.msra.mxu0 %v3251_v29  ;;  %3370 = vmatpush.msrb.mxu2 %v3347_v62 }
 0x8ac   :  { %3280 = vmatpush.msra.mxu0 %v3250_v30  ;;  %3371 = vmatpush.msrb.mxu2 %v3345_v38 }
 0x8ae   :  { %3281 = vmatpush.msra.mxu0 %v3249_v42  ;;  %3372 = vmatpush.msrb.mxu2 %v3343_v61  ;;  %v3340_v42 = vld [vmem:[%s6471_s13 + $0x68] sm:$0xff] }
 0x8b0   :  { %3282 = vmatpush.msra.mxu0 %v3248_v11  ;;  %v3352_v11 = vld [vmem:[%s6471_s13 + $0xc8] sm:$0xff]  ;;  %3373 = vmatpush.msrb.mxu2 %v3341_v51 }
 0x8b2   :  { %3283 = vmatpush.msra.mxu0 %v3247_v23  ;;  %v3354_v23 = vld [vmem:[%s6471_s13 + $0xd8] sm:$0xff]  ;;  %3374 = vmatpush.msrb.mxu2 %v3339_v43  ;;  %s3418_s13 = sshll.u32 %s4129_s12, 4  ;;  %s3419_s13 = int_to_ptr.vmem [resolvable:$true] %s3418_s13 }
 0x8b3   :  { %3994 = vmatmul.msk.f32.vlgmr.msra.gmra.mxu0 %vm3261_vm13, %v3992_v32 }
 0x8b4   :  { %3385 = vmatpush.msrb.mxu0 %v3358_v37  ;;  %3375 = vmatpush.msrb.mxu2 %v3337_v59 }
 0x8b6   :  { %3386 = vmatpush.msrb.mxu0 %v3356_v44  ;;  %3376 = vmatpush.msrb.mxu2 %v3335_v4 }
 0x8b8   :  { %3387 = vmatpush.msrb.mxu0 %v3354_v23  ;;  %3377 = vmatpush.msrb.mxu2 %v3333_v56 }
 0x8ba   :  { %3388 = vmatpush.msrb.mxu0 %v3352_v11  ;;  %3378 = vmatpush.msrb.mxu2 %v3331_v40 }
 0x8bc   :  { %3389 = vmatpush.msrb.mxu0 %v3350_v63  ;;  %3379 = vmatpush.msrb.mxu2 %v3329_v46 }
 0x8be   :  { %3390 = vmatpush.msrb.mxu0 %v3348_v53  ;;  %3380 = vmatpush.msrb.mxu2 %v3327_v41 }
 0x8c0   :  { %3391 = vmatpush.msrb.mxu0 %v3346_v54 }
 0x8c2   :  { %3392 = vmatpush.msrb.mxu0 %v3344_v17 }
 0x8c4   :  { %3393 = vmatpush.msrb.mxu0 %v3342_v55 }
 0x8c6   :  { %3394 = vmatpush.msrb.mxu0 %v3340_v42 }
 0x8c8   :  { %3395 = vmatpush.msrb.mxu0 %v3338_v45 }
 0x8ca   :  { %3396 = vmatpush.msrb.mxu0 %v3336_v50 }
 0x8cc   :  { %3397 = vmatpush.msrb.mxu0 %v3334_v3 }
 0x8ce   :  { %3398 = vmatpush.msrb.mxu0 %v3332_v39 }
 0x8d0   :  { %3399 = vmatpush.msrb.mxu0 %v3330_v13 }
 0x8d2   :  { %3400 = vmatpush.msrb.mxu0 %v3328_v0 }
 0x930   :  { %v3285_v58 = vpop.f32.mrf.mxu0 }
 0x931   :  { %3995 = vmatmul.msk.f32.vlgmr.msrb.gmra.mxu3 %vm3300_vm11, %v3285_v58 }
 0x9b4   :  { %v3321_v52 = vpop.f32.mrf.mxu3 }
 0x9b5   :  { %v3322_v49 = vadd.f32 %v4082_v47, %v3321_v52 }
 0x9b7   :  { %vm3324_vm5 = vcmp.ge.f32.partialorder %v3322_v49, 0.0  ;;  %v3325_v5 = vmul.f32 0.01, %v3322_v49 }
 0x9b9   :  { %v3326_v7 = vsel %vm3324_vm5, %v3322_v49, %v3325_v5 }
 0x9ba   :  { %3381 = vmatmul.f32.vlgmr.msrb.gmra.mxu2 %v3326_v7  ;;  %3401 = vmatmul.f32.vlgmr.msrb.gmra.mxu0 %v3326_v7 }
 0xa37   :  { %v3402_v9 = vpop.f32.mrf.mxu0 }
 0xa38   :  { %v3403_v6 = vadd.f32 %v3402_v9, %v3362_v36 }
 0xa3a   :  { %vm3406_vm6 = vcmp.ge.f32.partialorder %v3403_v6, 0.0  ;;  %v3408_v14 = vmul.f32 0.01, %v3403_v6 }
 0xa3c   :  { %v3410_v57 = vsel %vm3406_vm6, %v3403_v6, %v3408_v14 }
 0xa3d   :  { %3412 = vst [vmem:[#allocation6 + $0x8] sm:$0xff] %v3410_v57  ;;  %v3382_v1 = vpop.f32.mrf.mxu2 }
 0xa3e   :  { %v3383_v2 = vadd.f32 %v3382_v1, %v3361_v8 }
 0xa40   :  { %vm3405_vm12 = vcmp.ge.f32.partialorder %v3383_v2, 0.0  ;;  %v3407_v12 = vmul.f32 0.01, %v3383_v2 }
 0xa42   :  { %v3409_v15 = vsel %vm3405_vm12, %v3383_v2, %v3407_v12 }
 0xa43   :  { %3411 = vst [vmem:[#allocation6] sm:$0xff] %v3409_v15 }
 0xa44   :  { %3423 = dma.vmem_to_hbm [thread:$0]  %s3419_s13, 256, %s3421_s4, [#allocation7]  }
 0xa45   :  { %4107 = dma.done.wait [#allocation7], 256  }
 0xa46   :  { %4108 = vsyncadd [#allocation7], 4294967040 }
 0xa47   :  { %3428 = vsyncpa [#allocation7], 1 }

</bundles_post_ra>
